<compile_context>
chip_gen: v7x
topology: tpu7x:2x2x1
jax: 0.10.0
libtpu: 0.0.40
codegen_flags: <defaults>
</compile_context>

<pallas_src>
import functools
import math

import numpy as np
import jax
import jax.numpy as jnp
from jax import lax
from jax.experimental import pallas as pl
from jax.experimental.pallas import tpu as pltpu

NEG_BIG = -1e9  # logit for padded vocabulary columns (kills softmax weight)


def _round_up(x, m):
    return (x + m - 1) // m * m


def _pad_gates(w, H, H_p):
    """Zero-pad the trailing 4*H gate axis of an LSTM weight/bias per gate."""
    lead = w.shape[:-1]
    w4 = w.reshape(lead + (4, H))
    pad = [(0, 0)] * len(lead) + [(0, 0), (0, H_p - H)]
    return jnp.pad(w4, pad).reshape(lead + (4 * H_p,))


# --------------------------------------------------------------------------
# Generation-aware VMEM / tile caps (trace-time constants).
# --------------------------------------------------------------------------
def _tpu_vmem_bytes():
    try:
        info = pltpu.get_tpu_info()
        for attr in ("vmem_capacity_bytes", "vmem_bytes", "vmem_size_bytes"):
            v = getattr(info, attr, None)
            if v:
                return int(v)
    except Exception:
        pass
    return 64 * 1024 * 1024          # conservative (v7x-sized) default


_VMEM_PHYS = _tpu_vmem_bytes()
if _VMEM_PHYS >= 100 * 1024 * 1024:  # v5e / v6e: 128 MiB physical VMEM
    _VMEM_LIMIT = 96 * 1024 * 1024
    _TM_CAP, _TV_CAP = 1024, 2048
else:                                # v7x: 64 MiB physical VMEM
    _VMEM_LIMIT = 48 * 1024 * 1024
    _TM_CAP, _TV_CAP = 512, 1024


# --------------------------------------------------------------------------
# Phase A: LSTM over time (+ time-invariant y projection of the MLP)
# --------------------------------------------------------------------------
def _lstm_kernel(z_ref, y_ref, wih_ref, b_ref, w1y_ref, b1_ref, whh_hbm,
                 hs_ref, yc_ref,
                 whh_ref, xg_ref, hc_ref, stage_ref,
                 *, H, T_CHUNK, bs_p, unroll):
    # One grid step advances the LSTM by T_CHUNK time steps and fills the
    # corresponding (T_CHUNK*bs_p, H) output block (lane-dense bf16 slab).
    @pl.when(pl.program_id(0) == 0)
    def _init():
        # w_hh is grid-invariant: copy it once from HBM into a single VMEM
        # scratch (no double buffering).
        pltpu.sync_copy(whh_hbm, whh_ref)
        # Input gates are time-invariant (the LSTM input is zvecs every step).
        xg_ref[...] = jnp.dot(z_ref[...], wih_ref[...],
                              preferred_element_type=jnp.float32) + b_ref[...]
        # y-projection of the MLP is time-invariant: compute it exactly once.
        yc_ref[...] = jnp.dot(y_ref[...], w1y_ref[...],
                              preferred_element_type=jnp.float32) + b1_ref[...]
        hc_ref[...] = jnp.zeros(hc_ref.shape, jnp.float32)

    xg = xg_ref[...]
    whh = whh_ref[...]                                   # bf16, single copy

    def step(s, carry):
        h, c = carry
        # bf16 MXU operands on the serial critical path; f32 accumulate,
        # f32 carries / gate math (per review correctness note).
        gates = xg + jnp.dot(h.astype(whh.dtype), whh,
                             preferred_element_type=jnp.float32)
        # H is a multiple of 128 -> lane-aligned gate slices (f32 activations).
        i_g = jax.nn.sigmoid(gates[:, 0 * H:1 * H])
        f_g = jax.nn.sigmoid(gates[:, 1 * H:2 * H])
        g_g = jnp.tanh(gates[:, 2 * H:3 * H])
        o_g = jax.nn.sigmoid(gates[:, 3 * H:4 * H])
        c_new = f_g * c + i_g * g_g
        h_new = o_g * jnp.tanh(c_new)
        row = pl.multiple_of(s * bs_p, bs_p)
        stage_ref[pl.ds(row, bs_p), :] = h_new           # f32 staging (VMEM)
        return h_new, c_new

    h_f, c_f = lax.fori_loop(0, T_CHUNK, step, (hc_ref[0], hc_ref[1]),
                             unroll=unroll)
    hc_ref[0] = h_f
    hc_ref[1] = c_f
    # Single bulk cast + full-block store -> bf16 HBM traffic is halved while
    # the per-step dynamic stores stay on a plain f32 scratch.
    hs_ref[...] = stage_ref[...].astype(hs_ref.dtype)


# --------------------------------------------------------------------------
# Phase B: tiled MLP + fused cross entropy (lane-wise online logsumexp)
# --------------------------------------------------------------------------
def _mlp_ce_kernel(h_ref, yc_ref, w1h_ref, w2_ref, b2_ref, tgt_ref, msk_ref,
                   loss_ref,
                   hid_ref, m_ref, l_ref, tl_ref,
                   *, bs_p, TV):
    k = pl.program_id(1)
    nk = pl.num_programs(1)
    TM = h_ref.shape[0]
    M = hid_ref.shape[1]
    G = TV // 128                                        # lane groups per tile

    @pl.when(k == 0)
    def _init():
        # hid = relu(h_prev @ w1_h + y_contrib); y_contrib broadcast over the
        # T_CHUNK time steps contained in this row tile (rows are time-major,
        # so each bs_p-row group shares the same y_contrib).
        yc = yc_ref[...]
        yb = jnp.broadcast_to(yc[None, :, :],
                              (TM // bs_p, bs_p, M)).reshape(TM, M)
        pre = jnp.dot(h_ref[...], w1h_ref[...],
                      preferred_element_type=jnp.float32) + yb
        hid_ref[...] = jnp.maximum(pre, 0.0).astype(hid_ref.dtype)
        m_ref[...] = jnp.full(m_ref.shape, -jnp.inf, jnp.float32)
        l_ref[...] = jnp.zeros(l_ref.shape, jnp.float32)
        tl_ref[...] = jnp.zeros(tl_ref.shape, jnp.float32)

    # Logits for this vocab tile: bf16 MXU inputs, f32 accumulation.
    logits = jnp.dot(hid_ref[...], w2_ref[...],
                     preferred_element_type=jnp.float32) + b2_ref[...]  # [TM,TV]

    # ---- lane-wise online softmax: only elementwise VPU/EUP work here ----
    m_prev = m_ref[...]                                  # (TM, 128)
    m_tile = logits[:, 0:128]
    for g in range(1, G):                                # static, unrolled
        m_tile = jnp.maximum(m_tile, logits[:, g * 128:(g + 1) * 128])
    m_new = jnp.maximum(m_prev, m_tile)
    alpha = jnp.exp(m_prev - m_new)

    # Targets arrive sublane-major (TM, 1): no lane->sublane relayout needed.
    tgt_shift = tgt_ref[...] - k * TV                    # (TM, 1) int32
    col = lax.broadcasted_iota(jnp.int32, (TM, 128), 1)

    l_acc = jnp.zeros((TM, 128), jnp.float32)
    tl_acc = jnp.zeros((TM, 128), jnp.float32)
    for g in range(G):
        chunk = logits[:, g * 128:(g + 1) * 128]
        l_acc = l_acc + jnp.exp(chunk - m_new)
        hit = (col + g * 128) == tgt_shift               # lane broadcast
        tl_acc = tl_acc + jnp.where(hit, chunk, 0.0)

    l_ref[...] = alpha * l_ref[...] + l_acc
    tl_ref[...] = tl_ref[...] + tl_acc
    m_ref[...] = m_new

    @pl.when(k == nk - 1)
    def _finalize():
        # Single cross-lane (XLU) combine per row tile.
        m_lane = m_ref[...]
        m_row = jnp.max(m_lane, axis=-1, keepdims=True)              # (TM, 1)
        l_row = jnp.sum(l_ref[...] * jnp.exp(m_lane - m_row),
                        axis=-1, keepdims=True)
        tl_row = jnp.sum(tl_ref[...], axis=-1, keepdims=True)
        lse = m_row + jnp.log(l_row)
        tok = (lse - tl_row)[:, 0]                                   # (TM,)
        loss_ref[0, 0, :] = tok * msk_ref[0, 0, :]       # lane-dense store


# --------------------------------------------------------------------------
# Wrapper
# --------------------------------------------------------------------------
@functools.partial(jax.jit, static_argnames=("mlp_dtype",))
def lstm_decoder_forward(yvecs, zvecs, tgts, tgts_mask, params,
                         mlp_dtype=jnp.bfloat16):
    f32 = jnp.float32
    bf16 = jnp.bfloat16
    bs, sl = tgts_mask.shape
    zsize = zvecs.shape[1]
    ysize = yvecs.shape[1]
    H = params["w_hh"].shape[0]
    M = params["w1"].shape[1]
    V = params["w2"].shape[1]

    # ---- padded / tiled geometry (lane-dense: H, M, V -> x128; bs -> x8) ----
    bs_p = _round_up(bs, 8)
    H_p = _round_up(H, 128)
    M_p = _round_up(M, 128)

    V_128 = _round_up(V, 128)
    if V_128 <= _TV_CAP:
        TV = V_128
        V_p = V_128
    else:
        TV = _TV_CAP
        V_p = _round_up(V, TV)
    n_v = V_p // TV

    base = (bs_p * 128) // math.gcd(bs_p, 128)      # lcm(bs_p, 128)
    rows = (sl - 1) * bs_p                          # token rows (time-major)
    TM = _round_up(min(rows, _TM_CAP), base)        # row tile (mult of 128/bs_p)
    T_CHUNK = TM // bs_p                            # LSTM steps per grid step
    n_row_tiles = (rows + TM - 1) // TM
    rows_padded = n_row_tiles * TM
    n_t_pad = rows_padded // bs_p

    # ---- pad batch inputs ----
    y_p = jnp.pad(yvecs.astype(f32), ((0, bs_p - bs), (0, 0)))
    z_p = jnp.pad(zvecs.astype(f32), ((0, bs_p - bs), (0, 0)))

    # ---- LSTM weights: per-gate zero-pad H -> H_p (padded lanes stay 0) ----
    w_ih = _pad_gates(params["w_ih"].astype(f32), H, H_p)
    w_hh = _pad_gates(jnp.pad(params["w_hh"].astype(f32),
                              ((0, H_p - H), (0, 0))), H, H_p).astype(bf16)
    b = _pad_gates(params["b"].astype(f32), H, H_p)

    # ---- MLP weights: split w1 into [h | y] parts (removes concat) ----
    w1 = params["w1"].astype(f32)
    w1_h = jnp.pad(w1[:H, :], ((0, H_p - H), (0, M_p - M))).astype(mlp_dtype)
    w1_y = jnp.pad(w1[H:, :], ((0, 0), (0, M_p - M)))          # f32, tiny
    b1 = jnp.pad(params["b1"].astype(f32), ((0, 0), (0, M_p - M)))
    w2 = jnp.pad(params["w2"].astype(f32),
                 ((0, M_p - M), (0, V_p - V))).astype(mlp_dtype)
    b2 = jnp.pad(params["b2"].astype(f32), ((0, 0), (0, V_p - V)),
                 constant_values=NEG_BIG)

    # ---- targets sublane-major, mask lane-major (time-major rows) ----
    tgt_tb = jnp.pad(tgts[:, 1:].T.astype(jnp.int32),
                     ((0, n_t_pad - (sl - 1)), (0, bs_p - bs)))
    msk_tb = jnp.pad(tgts_mask[:, 1:].T.astype(f32),
                     ((0, n_t_pad - (sl - 1)), (0, bs_p - bs)))
    tgt_rows = tgt_tb.reshape(rows_padded, 1)       # [rows, 1]  (sublane-major)
    msk_rows = msk_tb.reshape(n_row_tiles, 1, TM)   # [tiles, 1, TM] (lane-major)

    unroll = T_CHUNK if T_CHUNK <= 16 else 8

    # -------------------- Phase A: serial LSTM -----------------------------
    hs, y_contrib = pl.pallas_call(
        functools.partial(_lstm_kernel, H=H_p, T_CHUNK=T_CHUNK,
                          bs_p=bs_p, unroll=unroll),
        grid=(n_row_tiles,),
        out_shape=(jax.ShapeDtypeStruct((rows_padded, H_p), bf16),
                   jax.ShapeDtypeStruct((bs_p, M_p), f32)),
        in_specs=[
            pl.BlockSpec((bs_p, zsize), lambda i: (0, 0)),
            pl.BlockSpec((bs_p, ysize), lambda i: (0, 0)),
            pl.BlockSpec((zsize, 4 * H_p), lambda i: (0, 0)),
            pl.BlockSpec((1, 4 * H_p), lambda i: (0, 0)),
            pl.BlockSpec((ysize, M_p), lambda i: (0, 0)),
            pl.BlockSpec((1, M_p), lambda i: (0, 0)),
            pl.BlockSpec(memory_space=pl.ANY),          # w_hh raw HBM ref
        ],
        out_specs=(pl.BlockSpec((TM, H_p), lambda i: (i, 0)),
                   pl.BlockSpec((bs_p, M_p), lambda i: (0, 0))),
        scratch_shapes=[pltpu.VMEM((H_p, 4 * H_p), bf16),   # w_hh single copy
                        pltpu.VMEM((bs_p, 4 * H_p), f32),   # x-gates (cached)
                        pltpu.VMEM((2, bs_p, H_p), f32),    # h / c carry
                        pltpu.VMEM((TM, H_p), f32)],        # f32 h staging
        compiler_params=pltpu.CompilerParams(
            dimension_semantics=("arbitrary",),
            vmem_limit_bytes=_VMEM_LIMIT),
    )(z_p, y_p, w_ih, b, w1_y, b1, w_hh)

    # ------------- Phase B: tiled MLP + fused cross entropy ----------------
    loss_rows = pl.pallas_call(
        functools.partial(_mlp_ce_kernel, bs_p=bs_p, TV=TV),
        grid=(n_row_tiles, n_v),
        out_shape=jax.ShapeDtypeStruct((n_row_tiles, 1, TM), f32),
        in_specs=[
            pl.BlockSpec((TM, H_p), lambda i, k: (i, 0)),      # h_prev (bf16)
            pl.BlockSpec((bs_p, M_p), lambda i, k: (0, 0)),    # y contribution
            pl.BlockSpec((H_p, M_p), lambda i, k: (0, 0)),     # w1_h (bf16)
            pl.BlockSpec((M_p, TV), lambda i, k: (0, k)),      # w2 vocab tile
            pl.BlockSpec((1, TV), lambda i, k: (0, k)),        # b2 vocab tile
            pl.BlockSpec((TM, 1), lambda i, k: (i, 0)),        # targets (sublane)
            pl.BlockSpec((1, 1, TM), lambda i, k: (i, 0, 0)),  # mask (lane)
        ],
        out_specs=pl.BlockSpec((1, 1, TM), lambda i, k: (i, 0, 0)),
        scratch_shapes=[pltpu.VMEM((TM, M_p), mlp_dtype),      # hid (row tile)
                        pltpu.VMEM((TM, 128), f32),            # lane-wise max
                        pltpu.VMEM((TM, 128), f32),            # lane-wise sumexp
                        pltpu.VMEM((TM, 128), f32)],           # lane-wise tgt logit
        compiler_params=pltpu.CompilerParams(
            dimension_semantics=("parallel", "arbitrary"),
            vmem_limit_bytes=_VMEM_LIMIT),
    )(hs, y_contrib, w1_h, w2, b2, tgt_rows, msk_rows)

    # ---- tiny O(sl*bs) per-sequence reduction (plain JAX glue) ----
    tok = loss_rows.reshape(n_t_pad, bs_p)[:sl - 1, :bs]       # masked losses
    num = tok.sum(axis=0)                                      # [bs]
    den = tgts_mask[:, 1:].astype(f32).sum(axis=-1)            # [bs]
    # NOTE: zero-length sequences divide by zero, exactly like the reference.
    logloss = num / den
    return logloss, logloss.mean()


# --------------------------------------------------------------------------
# Pure-JAX reference (mirrors the PyTorch forward, f32)
# --------------------------------------------------------------------------
def reference_forward(yvecs, zvecs, tgts, tgts_mask, params):
    bs, sl = tgts_mask.shape
    H = params["w_hh"].shape[0]
    x_gates = zvecs @ params["w_ih"] + params["b"]

    def step(carry, _):
        h, c = carry
        gates = x_gates + h @ params["w_hh"]
        i = jax.nn.sigmoid(gates[:, :H])
        f = jax.nn.sigmoid(gates[:, H:2 * H])
        g = jnp.tanh(gates[:, 2 * H:3 * H])
        o = jax.nn.sigmoid(gates[:, 3 * H:])
        c = f * c + i * g
        h = o * jnp.tanh(c)
        return (h, c), h

    (_, _), hs = lax.scan(step, (jnp.zeros((bs, H)), jnp.zeros((bs, H))),
                          None, length=sl)
    hs = jnp.transpose(hs, (1, 0, 2))                          # [bs, sl, H]
    y_exp = jnp.broadcast_to(yvecs[:, None, :], (bs, sl, yvecs.shape[1]))
    feat = jnp.concatenate([hs, y_exp], -1)[:, :-1, :]
    hid = jax.nn.relu(feat @ params["w1"] + params["b1"])
    logits = hid @ params["w2"] + params["b2"]
    lse = jax.nn.logsumexp(logits, -1)
    tl = jnp.take_along_axis(logits, tgts[:, 1:][..., None], axis=-1)[..., 0]
    loss = lse - tl
    m = tgts_mask[:, 1:]
    per = (loss * m).sum(-1) / m.sum(-1)
    return per, per.mean()


def init_params(key, zsize, ysize, H, V):
    ks = jax.random.split(key, 8)
    s_lstm = 1.0 / np.sqrt(H)
    u = lambda k, shape, s: jax.random.uniform(k, shape, jnp.float32, -s, s)
    return {
        "w_ih": u(ks[0], (zsize, 4 * H), s_lstm),
        "w_hh": u(ks[1], (H, 4 * H), s_lstm),
        "b":    u(ks[2], (1, 4 * H), s_lstm),      # b_ih + b_hh combined
        "w1":   u(ks[3], (H + ysize, H), 1.0 / np.sqrt(H + ysize)),
        "b1":   u(ks[4], (1, H), 1.0 / np.sqrt(H + ysize)),
        "w2":   u(ks[5], (H, V), 1.0 / np.sqrt(H)),
        "b2":   u(ks[6], (1, V), 1.0 / np.sqrt(H)),
    }


if __name__ == "__main__":
    bs, sl = 4, 8
    zsize, ysize = 8, 8
    hidden_size, vocab_size = 32, 32

    key = jax.random.PRNGKey(0)
    k_y, k_z, k_t, k_p = jax.random.split(key, 4)

    yvecs = jax.random.normal(k_y, (bs, ysize), jnp.float32)
    zvecs = jax.random.normal(k_z, (bs, zsize), jnp.float32)
    tgts = jax.random.randint(k_t, (bs, sl), 0, vocab_size, jnp.int32)
    # variable-length mask to exercise the masked loss path
    lengths = jnp.array([8, 6, 7, 5], jnp.int32)
    tgts_mask = (jnp.arange(sl)[None, :] < lengths[:, None]).astype(jnp.float32)

    params = init_params(k_p, zsize, ysize, hidden_size, vocab_size)

    logloss, mean_loss = lstm_decoder_forward(yvecs, zvecs, tgts, tgts_mask,
                                              params)
    jax.block_until_ready((logloss, mean_loss))

    ref_logloss, ref_mean = reference_forward(yvecs, zvecs, tgts, tgts_mask,
                                              params)
    # bf16 MXU inputs on the recurrence and both MLP matmuls -> compare to the
    # f32 reference with a bf16-appropriate tolerance (carries stay f32; at
    # production sequence lengths re-validate per the review note).
    np.testing.assert_allclose(np.asarray(logloss), np.asarray(ref_logloss),
                               rtol=2e-2, atol=2e-2)
    np.testing.assert_allclose(float(mean_loss), float(ref_mean),
                               rtol=2e-2, atol=2e-2)

    print("KERNEL_OK")
</pallas_src>

<mosaic_0001>
module attributes {stable_mosaic.version = 11 : i64} {
  func.func @_lstm_kernel(%arg0: i32, %arg1: memref<8x8xf32, #tpu.memory_space<vmem>>, %arg2: memref<8x8xf32, #tpu.memory_space<vmem>>, %arg3: memref<8x512xf32, #tpu.memory_space<vmem>>, %arg4: memref<1x512xf32, #tpu.memory_space<vmem>>, %arg5: memref<8x128xf32, #tpu.memory_space<vmem>>, %arg6: memref<1x128xf32, #tpu.memory_space<vmem>>, %arg7: memref<128x512xbf16, #tpu.memory_space<any>>, %arg8: memref<128x128xbf16, #tpu.memory_space<vmem>>, %arg9: memref<8x128xf32, #tpu.memory_space<vmem>>, %arg10: memref<128x512xbf16, #tpu.memory_space<vmem>>, %arg11: memref<8x512xf32, #tpu.memory_space<vmem>>, %arg12: memref<2x8x128xf32, #tpu.memory_space<vmem>>, %arg13: memref<128x128xf32, #tpu.memory_space<vmem>>) attributes {dimension_semantics = [#tpu.dimension_semantics<arbitrary>], iteration_bounds = array<i64: 1>, scalar_prefetch = 0 : i64, scratch_operands = 4 : i64, tpu.core_type = #tpu.core_type<tc>, window_params = [{pipeline_mode = #tpu.pipeline_mode<synchronous>, transform_indices = @transform_0, window_bounds = array<i64: 8, 8>}, {pipeline_mode = #tpu.pipeline_mode<synchronous>, transform_indices = @transform_1, window_bounds = array<i64: 8, 8>}, {pipeline_mode = #tpu.pipeline_mode<synchronous>, transform_indices = @transform_2, window_bounds = array<i64: 8, 512>}, {pipeline_mode = #tpu.pipeline_mode<synchronous>, transform_indices = @transform_3, window_bounds = array<i64: 1, 512>}, {pipeline_mode = #tpu.pipeline_mode<synchronous>, transform_indices = @transform_4, window_bounds = array<i64: 8, 128>}, {pipeline_mode = #tpu.pipeline_mode<synchronous>, transform_indices = @transform_5, window_bounds = array<i64: 1, 128>}, {}, {transform_indices = @transform_7, window_bounds = array<i64: 128, 128>}, {pipeline_mode = #tpu.pipeline_mode<synchronous>, transform_indices = @transform_8, window_bounds = array<i64: 8, 128>}]} {
    %c0_i32 = arith.constant 0 : i32
    %0 = arith.cmpi eq, %arg0, %c0_i32 : i32
    %1 = arith.extui %0 : i1 to i32
    %c0_i32_0 = arith.constant 0 : i32
    %2 = arith.cmpi ne, %1, %c0_i32_0 : i32
    scf.if %2 {
      "tpu.region"() ({
        %546 = tpu.sem_alloc : memref<!tpu.dma_semaphore, #tpu.memory_space<semaphore_mem>>
        tpu.enqueue_dma source(%arg7 : memref<128x512xbf16, #tpu.memory_space<any>>) target(%arg10 : memref<128x512xbf16, #tpu.memory_space<vmem>>) target_semaphore(%546 : memref<!tpu.dma_semaphore, #tpu.memory_space<semaphore_mem>>)
        tpu.wait_dma2 semaphore(%546 : memref<!tpu.dma_semaphore, #tpu.memory_space<semaphore_mem>>) src(%arg7 : memref<128x512xbf16, #tpu.memory_space<any>>) dst(%arg10 : memref<128x512xbf16, #tpu.memory_space<vmem>>)
        tpu.yield
      }) : () -> ()
      %c0_115 = arith.constant 0 : index
      %c0_116 = arith.constant 0 : index
      %530 = vector.load %arg1[%c0_115, %c0_116] : memref<8x8xf32, #tpu.memory_space<vmem>>, vector<8x8xf32>
      %c0_117 = arith.constant 0 : index
      %c0_118 = arith.constant 0 : index
      %531 = vector.load %arg3[%c0_117, %c0_118] : memref<8x512xf32, #tpu.memory_space<vmem>>, vector<8x512xf32>
      %cst_119 = arith.constant dense<0.000000e+00> : vector<8x512xf32>
      %532 = tpu.matmul %530, %531, %cst_119 {dimension_numbers = #tpu.dot_dimension_numbers<[1], [0], [0], [1], [0, 0, 1, 1], [], []>} : vector<8x8xf32>, vector<8x512xf32>, vector<8x512xf32> -> vector<8x512xf32>
      %c0_120 = arith.constant 0 : index
      %c0_121 = arith.constant 0 : index
      %533 = vector.load %arg4[%c0_120, %c0_121] : memref<1x512xf32, #tpu.memory_space<vmem>>, vector<1x512xf32>
      %534 = vector.broadcast %533 : vector<1x512xf32> to vector<8x512xf32>
      %535 = arith.addf %532, %534 : vector<8x512xf32>
      %c0_122 = arith.constant 0 : index
      %c0_123 = arith.constant 0 : index
      %536 = vector.load %arg11[%c0_122, %c0_123] : memref<8x512xf32, #tpu.memory_space<vmem>>, vector<8x512xf32>
      tpu.vector_store %arg11[%c0_122, %c0_123], %535 {strides = array<i32>} : memref<8x512xf32, #tpu.memory_space<vmem>>, vector<8x512xf32>,
      %c0_124 = arith.constant 0 : index
      %c0_125 = arith.constant 0 : index
      %537 = vector.load %arg2[%c0_124, %c0_125] : memref<8x8xf32, #tpu.memory_space<vmem>>, vector<8x8xf32>
      %c0_126 = arith.constant 0 : index
      %c0_127 = arith.constant 0 : index
      %538 = vector.load %arg5[%c0_126, %c0_127] : memref<8x128xf32, #tpu.memory_space<vmem>>, vector<8x128xf32>
      %cst_128 = arith.constant dense<0.000000e+00> : vector<8x128xf32>
      %539 = tpu.matmul %537, %538, %cst_128 {dimension_numbers = #tpu.dot_dimension_numbers<[1], [0], [0], [1], [0, 0, 1, 1], [], []>} : vector<8x8xf32>, vector<8x128xf32>, vector<8x128xf32> -> vector<8x128xf32>
      %c0_129 = arith.constant 0 : index
      %c0_130 = arith.constant 0 : index
      %540 = vector.load %arg6[%c0_129, %c0_130] : memref<1x128xf32, #tpu.memory_space<vmem>>, vector<1x128xf32>
      %541 = vector.broadcast %540 : vector<1x128xf32> to vector<8x128xf32>
      %542 = arith.addf %539, %541 : vector<8x128xf32>
      %c0_131 = arith.constant 0 : index
      %c0_132 = arith.constant 0 : index
      %543 = vector.load %arg9[%c0_131, %c0_132] : memref<8x128xf32, #tpu.memory_space<vmem>>, vector<8x128xf32>
      tpu.vector_store %arg9[%c0_131, %c0_132], %542 {strides = array<i32>} : memref<8x128xf32, #tpu.memory_space<vmem>>, vector<8x128xf32>,
      %cst_133 = arith.constant 0.000000e+00 : f32
      %544 = vector.broadcast %cst_133 : f32 to vector<2x8x128xf32>
      %c0_134 = arith.constant 0 : index
      %c0_135 = arith.constant 0 : index
      %c0_136 = arith.constant 0 : index
      %545 = vector.load %arg12[%c0_134, %c0_135, %c0_136] : memref<2x8x128xf32, #tpu.memory_space<vmem>>, vector<2x8x128xf32>
      tpu.vector_store %arg12[%c0_134, %c0_135, %c0_136], %544 {strides = array<i32>} : memref<2x8x128xf32, #tpu.memory_space<vmem>>, vector<2x8x128xf32>,
    } else {
    }
    %c0 = arith.constant 0 : index
    %c0_1 = arith.constant 0 : index
    %3 = vector.load %arg11[%c0, %c0_1] : memref<8x512xf32, #tpu.memory_space<vmem>>, vector<8x512xf32>
    %c0_2 = arith.constant 0 : index
    %c0_3 = arith.constant 0 : index
    %4 = vector.load %arg10[%c0_2, %c0_3] : memref<128x512xbf16, #tpu.memory_space<vmem>>, vector<128x512xbf16>
    %c0_4 = arith.constant 0 : index
    %c0_5 = arith.constant 0 : index
    %c0_6 = arith.constant 0 : index
    %5 = vector.load %arg12[%c0_4, %c0_5, %c0_6] : memref<2x8x128xf32, #tpu.memory_space<vmem>>, vector<1x8x128xf32>
    %6 = vector.shape_cast %5 : vector<1x8x128xf32> to vector<8x128xf32>
    %c1 = arith.constant 1 : index
    %c0_7 = arith.constant 0 : index
    %c0_8 = arith.constant 0 : index
    %7 = vector.load %arg12[%c1, %c0_7, %c0_8] : memref<2x8x128xf32, #tpu.memory_space<vmem>>, vector<1x8x128xf32>
    %8 = vector.shape_cast %7 : vector<1x8x128xf32> to vector<8x128xf32>
    %c0_i32_9 = arith.constant 0 : i32
    %9 = arith.truncf %6 : vector<8x128xf32> to vector<8x128xbf16>
    %cst = arith.constant dense<0.000000e+00> : vector<8x512xf32>
    %10 = tpu.matmul %9, %4, %cst {dimension_numbers = #tpu.dot_dimension_numbers<[1], [0], [0], [1], [0, 0, 1, 1], [], []>} : vector<8x128xbf16>, vector<128x512xbf16>, vector<8x512xf32> -> vector<8x512xf32>
    %11 = arith.addf %3, %10 : vector<8x512xf32>
    %12 = vector.extract_strided_slice %11 {offsets = [0, 0], sizes = [8, 128], strides = [1, 1]} : vector<8x512xf32> to vector<8x128xf32>
    %13 = arith.negf %12 : vector<8x128xf32>
    %14 = math.exp %13 : vector<8x128xf32>
    %cst_10 = arith.constant 1.000000e+00 : f32
    %15 = vector.broadcast %cst_10 : f32 to vector<8x128xf32>
    %16 = arith.addf %15, %14 : vector<8x128xf32>
    %17 = arith.divf %15, %16 : vector<8x128xf32>
    %18 = vector.extract_strided_slice %11 {offsets = [0, 128], sizes = [8, 128], strides = [1, 1]} : vector<8x512xf32> to vector<8x128xf32>
    %19 = arith.negf %18 : vector<8x128xf32>
    %20 = math.exp %19 : vector<8x128xf32>
    %cst_11 = arith.constant 1.000000e+00 : f32
    %21 = vector.broadcast %cst_11 : f32 to vector<8x128xf32>
    %22 = arith.addf %21, %20 : vector<8x128xf32>
    %23 = arith.divf %21, %22 : vector<8x128xf32>
    %24 = vector.extract_strided_slice %11 {offsets = [0, 256], sizes = [8, 128], strides = [1, 1]} : vector<8x512xf32> to vector<8x128xf32>
    %25 = math.tanh %24 : vector<8x128xf32>
    %26 = vector.extract_strided_slice %11 {offsets = [0, 384], sizes = [8, 128], strides = [1, 1]} : vector<8x512xf32> to vector<8x128xf32>
    %27 = arith.negf %26 : vector<8x128xf32>
    %28 = math.exp %27 : vector<8x128xf32>
    %cst_12 = arith.constant 1.000000e+00 : f32
    %29 = vector.broadcast %cst_12 : f32 to vector<8x128xf32>
    %30 = arith.addf %29, %28 : vector<8x128xf32>
    %31 = arith.divf %29, %30 : vector<8x128xf32>
    %32 = arith.mulf %23, %8 : vector<8x128xf32>
    %33 = arith.mulf %17, %25 : vector<8x128xf32>
    %34 = arith.addf %32, %33 : vector<8x128xf32>
    %35 = math.tanh %34 : vector<8x128xf32>
    %36 = arith.mulf %31, %35 : vector<8x128xf32>
    %c8_i32 = arith.constant 8 : i32
    %37 = arith.muli %c0_i32_9, %c8_i32 : i32
    %38 = tpu.assume_multiple %37, 8 : i32
    %39 = arith.index_cast %38 : i32 to index
    %c0_13 = arith.constant 0 : index
    %40 = vector.load %arg13[%39, %c0_13] : memref<128x128xf32, #tpu.memory_space<vmem>>, vector<8x128xf32>
    tpu.vector_store %arg13[%39, %c0_13], %36 {strides = array<i32>} : memref<128x128xf32, #tpu.memory_space<vmem>>, vector<8x128xf32>,
    %c1_i32 = arith.constant 1 : i32
    %41 = arith.truncf %36 : vector<8x128xf32> to vector<8x128xbf16>
    %cst_14 = arith.constant dense<0.000000e+00> : vector<8x512xf32>
    %42 = tpu.matmul %41, %4, %cst_14 {dimension_numbers = #tpu.dot_dimension_numbers<[1], [0], [0], [1], [0, 0, 1, 1], [], []>} : vector<8x128xbf16>, vector<128x512xbf16>, vector<8x512xf32> -> vector<8x512xf32>
    %43 = arith.addf %3, %42 : vector<8x512xf32>
    %44 = vector.extract_strided_slice %43 {offsets = [0, 0], sizes = [8, 128], strides = [1, 1]} : vector<8x512xf32> to vector<8x128xf32>
    %45 = arith.negf %44 : vector<8x128xf32>
    %46 = math.exp %45 : vector<8x128xf32>
    %cst_15 = arith.constant 1.000000e+00 : f32
    %47 = vector.broadcast %cst_15 : f32 to vector<8x128xf32>
    %48 = arith.addf %47, %46 : vector<8x128xf32>
    %49 = arith.divf %47, %48 : vector<8x128xf32>
    %50 = vector.extract_strided_slice %43 {offsets = [0, 128], sizes = [8, 128], strides = [1, 1]} : vector<8x512xf32> to vector<8x128xf32>
    %51 = arith.negf %50 : vector<8x128xf32>
    %52 = math.exp %51 : vector<8x128xf32>
    %cst_16 = arith.constant 1.000000e+00 : f32
    %53 = vector.broadcast %cst_16 : f32 to vector<8x128xf32>
    %54 = arith.addf %53, %52 : vector<8x128xf32>
    %55 = arith.divf %53, %54 : vector<8x128xf32>
    %56 = vector.extract_strided_slice %43 {offsets = [0, 256], sizes = [8, 128], strides = [1, 1]} : vector<8x512xf32> to vector<8x128xf32>
    %57 = math.tanh %56 : vector<8x128xf32>
    %58 = vector.extract_strided_slice %43 {offsets = [0, 384], sizes = [8, 128], strides = [1, 1]} : vector<8x512xf32> to vector<8x128xf32>
    %59 = arith.negf %58 : vector<8x128xf32>
    %60 = math.exp %59 : vector<8x128xf32>
    %cst_17 = arith.constant 1.000000e+00 : f32
    %61 = vector.broadcast %cst_17 : f32 to vector<8x128xf32>
    %62 = arith.addf %61, %60 : vector<8x128xf32>
    %63 = arith.divf %61, %62 : vector<8x128xf32>
    %64 = arith.mulf %55, %34 : vector<8x128xf32>
    %65 = arith.mulf %49, %57 : vector<8x128xf32>
    %66 = arith.addf %64, %65 : vector<8x128xf32>
    %67 = math.tanh %66 : vector<8x128xf32>
    %68 = arith.mulf %63, %67 : vector<8x128xf32>
    %c8_i32_18 = arith.constant 8 : i32
    %69 = arith.muli %c1_i32, %c8_i32_18 : i32
    %70 = tpu.assume_multiple %69, 8 : i32
    %71 = arith.index_cast %70 : i32 to index
    %c0_19 = arith.constant 0 : index
    %72 = vector.load %arg13[%71, %c0_19] : memref<128x128xf32, #tpu.memory_space<vmem>>, vector<8x128xf32>
    tpu.vector_store %arg13[%71, %c0_19], %68 {strides = array<i32>} : memref<128x128xf32, #tpu.memory_space<vmem>>, vector<8x128xf32>,
    %c2_i32 = arith.constant 2 : i32
    %73 = arith.truncf %68 : vector<8x128xf32> to vector<8x128xbf16>
    %cst_20 = arith.constant dense<0.000000e+00> : vector<8x512xf32>
    %74 = tpu.matmul %73, %4, %cst_20 {dimension_numbers = #tpu.dot_dimension_numbers<[1], [0], [0], [1], [0, 0, 1, 1], [], []>} : vector<8x128xbf16>, vector<128x512xbf16>, vector<8x512xf32> -> vector<8x512xf32>
    %75 = arith.addf %3, %74 : vector<8x512xf32>
    %76 = vector.extract_strided_slice %75 {offsets = [0, 0], sizes = [8, 128], strides = [1, 1]} : vector<8x512xf32> to vector<8x128xf32>
    %77 = arith.negf %76 : vector<8x128xf32>
    %78 = math.exp %77 : vector<8x128xf32>
    %cst_21 = arith.constant 1.000000e+00 : f32
    %79 = vector.broadcast %cst_21 : f32 to vector<8x128xf32>
    %80 = arith.addf %79, %78 : vector<8x128xf32>
    %81 = arith.divf %79, %80 : vector<8x128xf32>
    %82 = vector.extract_strided_slice %75 {offsets = [0, 128], sizes = [8, 128], strides = [1, 1]} : vector<8x512xf32> to vector<8x128xf32>
    %83 = arith.negf %82 : vector<8x128xf32>
    %84 = math.exp %83 : vector<8x128xf32>
    %cst_22 = arith.constant 1.000000e+00 : f32
    %85 = vector.broadcast %cst_22 : f32 to vector<8x128xf32>
    %86 = arith.addf %85, %84 : vector<8x128xf32>
    %87 = arith.divf %85, %86 : vector<8x128xf32>
    %88 = vector.extract_strided_slice %75 {offsets = [0, 256], sizes = [8, 128], strides = [1, 1]} : vector<8x512xf32> to vector<8x128xf32>
    %89 = math.tanh %88 : vector<8x128xf32>
    %90 = vector.extract_strided_slice %75 {offsets = [0, 384], sizes = [8, 128], strides = [1, 1]} : vector<8x512xf32> to vector<8x128xf32>
    %91 = arith.negf %90 : vector<8x128xf32>
    %92 = math.exp %91 : vector<8x128xf32>
    %cst_23 = arith.constant 1.000000e+00 : f32
    %93 = vector.broadcast %cst_23 : f32 to vector<8x128xf32>
    %94 = arith.addf %93, %92 : vector<8x128xf32>
    %95 = arith.divf %93, %94 : vector<8x128xf32>
    %96 = arith.mulf %87, %66 : vector<8x128xf32>
    %97 = arith.mulf %81, %89 : vector<8x128xf32>
    %98 = arith.addf %96, %97 : vector<8x128xf32>
    %99 = math.tanh %98 : vector<8x128xf32>
    %100 = arith.mulf %95, %99 : vector<8x128xf32>
    %c8_i32_24 = arith.constant 8 : i32
    %101 = arith.muli %c2_i32, %c8_i32_24 : i32
    %102 = tpu.assume_multiple %101, 8 : i32
    %103 = arith.index_cast %102 : i32 to index
    %c0_25 = arith.constant 0 : index
    %104 = vector.load %arg13[%103, %c0_25] : memref<128x128xf32, #tpu.memory_space<vmem>>, vector<8x128xf32>
    tpu.vector_store %arg13[%103, %c0_25], %100 {strides = array<i32>} : memref<128x128xf32, #tpu.memory_space<vmem>>, vector<8x128xf32>,
    %c3_i32 = arith.constant 3 : i32
    %105 = arith.truncf %100 : vector<8x128xf32> to vector<8x128xbf16>
    %cst_26 = arith.constant dense<0.000000e+00> : vector<8x512xf32>
    %106 = tpu.matmul %105, %4, %cst_26 {dimension_numbers = #tpu.dot_dimension_numbers<[1], [0], [0], [1], [0, 0, 1, 1], [], []>} : vector<8x128xbf16>, vector<128x512xbf16>, vector<8x512xf32> -> vector<8x512xf32>
    %107 = arith.addf %3, %106 : vector<8x512xf32>
    %108 = vector.extract_strided_slice %107 {offsets = [0, 0], sizes = [8, 128], strides = [1, 1]} : vector<8x512xf32> to vector<8x128xf32>
    %109 = arith.negf %108 : vector<8x128xf32>
    %110 = math.exp %109 : vector<8x128xf32>
    %cst_27 = arith.constant 1.000000e+00 : f32
    %111 = vector.broadcast %cst_27 : f32 to vector<8x128xf32>
    %112 = arith.addf %111, %110 : vector<8x128xf32>
    %113 = arith.divf %111, %112 : vector<8x128xf32>
    %114 = vector.extract_strided_slice %107 {offsets = [0, 128], sizes = [8, 128], strides = [1, 1]} : vector<8x512xf32> to vector<8x128xf32>
    %115 = arith.negf %114 : vector<8x128xf32>
    %116 = math.exp %115 : vector<8x128xf32>
    %cst_28 = arith.constant 1.000000e+00 : f32
    %117 = vector.broadcast %cst_28 : f32 to vector<8x128xf32>
    %118 = arith.addf %117, %116 : vector<8x128xf32>
    %119 = arith.divf %117, %118 : vector<8x128xf32>
    %120 = vector.extract_strided_slice %107 {offsets = [0, 256], sizes = [8, 128], strides = [1, 1]} : vector<8x512xf32> to vector<8x128xf32>
    %121 = math.tanh %120 : vector<8x128xf32>
    %122 = vector.extract_strided_slice %107 {offsets = [0, 384], sizes = [8, 128], strides = [1, 1]} : vector<8x512xf32> to vector<8x128xf32>
    %123 = arith.negf %122 : vector<8x128xf32>
    %124 = math.exp %123 : vector<8x128xf32>
    %cst_29 = arith.constant 1.000000e+00 : f32
    %125 = vector.broadcast %cst_29 : f32 to vector<8x128xf32>
    %126 = arith.addf %125, %124 : vector<8x128xf32>
    %127 = arith.divf %125, %126 : vector<8x128xf32>
    %128 = arith.mulf %119, %98 : vector<8x128xf32>
    %129 = arith.mulf %113, %121 : vector<8x128xf32>
    %130 = arith.addf %128, %129 : vector<8x128xf32>
    %131 = math.tanh %130 : vector<8x128xf32>
    %132 = arith.mulf %127, %131 : vector<8x128xf32>
    %c8_i32_30 = arith.constant 8 : i32
    %133 = arith.muli %c3_i32, %c8_i32_30 : i32
    %134 = tpu.assume_multiple %133, 8 : i32
    %135 = arith.index_cast %134 : i32 to index
    %c0_31 = arith.constant 0 : index
    %136 = vector.load %arg13[%135, %c0_31] : memref<128x128xf32, #tpu.memory_space<vmem>>, vector<8x128xf32>
    tpu.vector_store %arg13[%135, %c0_31], %132 {strides = array<i32>} : memref<128x128xf32, #tpu.memory_space<vmem>>, vector<8x128xf32>,
    %c4_i32 = arith.constant 4 : i32
    %137 = arith.truncf %132 : vector<8x128xf32> to vector<8x128xbf16>
    %cst_32 = arith.constant dense<0.000000e+00> : vector<8x512xf32>
    %138 = tpu.matmul %137, %4, %cst_32 {dimension_numbers = #tpu.dot_dimension_numbers<[1], [0], [0], [1], [0, 0, 1, 1], [], []>} : vector<8x128xbf16>, vector<128x512xbf16>, vector<8x512xf32> -> vector<8x512xf32>
    %139 = arith.addf %3, %138 : vector<8x512xf32>
    %140 = vector.extract_strided_slice %139 {offsets = [0, 0], sizes = [8, 128], strides = [1, 1]} : vector<8x512xf32> to vector<8x128xf32>
    %141 = arith.negf %140 : vector<8x128xf32>
    %142 = math.exp %141 : vector<8x128xf32>
    %cst_33 = arith.constant 1.000000e+00 : f32
    %143 = vector.broadcast %cst_33 : f32 to vector<8x128xf32>
    %144 = arith.addf %143, %142 : vector<8x128xf32>
    %145 = arith.divf %143, %144 : vector<8x128xf32>
    %146 = vector.extract_strided_slice %139 {offsets = [0, 128], sizes = [8, 128], strides = [1, 1]} : vector<8x512xf32> to vector<8x128xf32>
    %147 = arith.negf %146 : vector<8x128xf32>
    %148 = math.exp %147 : vector<8x128xf32>
    %cst_34 = arith.constant 1.000000e+00 : f32
    %149 = vector.broadcast %cst_34 : f32 to vector<8x128xf32>
    %150 = arith.addf %149, %148 : vector<8x128xf32>
    %151 = arith.divf %149, %150 : vector<8x128xf32>
    %152 = vector.extract_strided_slice %139 {offsets = [0, 256], sizes = [8, 128], strides = [1, 1]} : vector<8x512xf32> to vector<8x128xf32>
    %153 = math.tanh %152 : vector<8x128xf32>
    %154 = vector.extract_strided_slice %139 {offsets = [0, 384], sizes = [8, 128], strides = [1, 1]} : vector<8x512xf32> to vector<8x128xf32>
    %155 = arith.negf %154 : vector<8x128xf32>
    %156 = math.exp %155 : vector<8x128xf32>
    %cst_35 = arith.constant 1.000000e+00 : f32
    %157 = vector.broadcast %cst_35 : f32 to vector<8x128xf32>
    %158 = arith.addf %157, %156 : vector<8x128xf32>
    %159 = arith.divf %157, %158 : vector<8x128xf32>
    %160 = arith.mulf %151, %130 : vector<8x128xf32>
    %161 = arith.mulf %145, %153 : vector<8x128xf32>
    %162 = arith.addf %160, %161 : vector<8x128xf32>
    %163 = math.tanh %162 : vector<8x128xf32>
    %164 = arith.mulf %159, %163 : vector<8x128xf32>
    %c8_i32_36 = arith.constant 8 : i32
    %165 = arith.muli %c4_i32, %c8_i32_36 : i32
    %166 = tpu.assume_multiple %165, 8 : i32
    %167 = arith.index_cast %166 : i32 to index
    %c0_37 = arith.constant 0 : index
    %168 = vector.load %arg13[%167, %c0_37] : memref<128x128xf32, #tpu.memory_space<vmem>>, vector<8x128xf32>
    tpu.vector_store %arg13[%167, %c0_37], %164 {strides = array<i32>} : memref<128x128xf32, #tpu.memory_space<vmem>>, vector<8x128xf32>,
    %c5_i32 = arith.constant 5 : i32
    %169 = arith.truncf %164 : vector<8x128xf32> to vector<8x128xbf16>
    %cst_38 = arith.constant dense<0.000000e+00> : vector<8x512xf32>
    %170 = tpu.matmul %169, %4, %cst_38 {dimension_numbers = #tpu.dot_dimension_numbers<[1], [0], [0], [1], [0, 0, 1, 1], [], []>} : vector<8x128xbf16>, vector<128x512xbf16>, vector<8x512xf32> -> vector<8x512xf32>
    %171 = arith.addf %3, %170 : vector<8x512xf32>
    %172 = vector.extract_strided_slice %171 {offsets = [0, 0], sizes = [8, 128], strides = [1, 1]} : vector<8x512xf32> to vector<8x128xf32>
    %173 = arith.negf %172 : vector<8x128xf32>
    %174 = math.exp %173 : vector<8x128xf32>
    %cst_39 = arith.constant 1.000000e+00 : f32
    %175 = vector.broadcast %cst_39 : f32 to vector<8x128xf32>
    %176 = arith.addf %175, %174 : vector<8x128xf32>
    %177 = arith.divf %175, %176 : vector<8x128xf32>
    %178 = vector.extract_strided_slice %171 {offsets = [0, 128], sizes = [8, 128], strides = [1, 1]} : vector<8x512xf32> to vector<8x128xf32>
    %179 = arith.negf %178 : vector<8x128xf32>
    %180 = math.exp %179 : vector<8x128xf32>
    %cst_40 = arith.constant 1.000000e+00 : f32
    %181 = vector.broadcast %cst_40 : f32 to vector<8x128xf32>
    %182 = arith.addf %181, %180 : vector<8x128xf32>
    %183 = arith.divf %181, %182 : vector<8x128xf32>
    %184 = vector.extract_strided_slice %171 {offsets = [0, 256], sizes = [8, 128], strides = [1, 1]} : vector<8x512xf32> to vector<8x128xf32>
    %185 = math.tanh %184 : vector<8x128xf32>
    %186 = vector.extract_strided_slice %171 {offsets = [0, 384], sizes = [8, 128], strides = [1, 1]} : vector<8x512xf32> to vector<8x128xf32>
    %187 = arith.negf %186 : vector<8x128xf32>
    %188 = math.exp %187 : vector<8x128xf32>
    %cst_41 = arith.constant 1.000000e+00 : f32
    %189 = vector.broadcast %cst_41 : f32 to vector<8x128xf32>
    %190 = arith.addf %189, %188 : vector<8x128xf32>
    %191 = arith.divf %189, %190 : vector<8x128xf32>
    %192 = arith.mulf %183, %162 : vector<8x128xf32>
    %193 = arith.mulf %177, %185 : vector<8x128xf32>
    %194 = arith.addf %192, %193 : vector<8x128xf32>
    %195 = math.tanh %194 : vector<8x128xf32>
    %196 = arith.mulf %191, %195 : vector<8x128xf32>
    %c8_i32_42 = arith.constant 8 : i32
    %197 = arith.muli %c5_i32, %c8_i32_42 : i32
    %198 = tpu.assume_multiple %197, 8 : i32
    %199 = arith.index_cast %198 : i32 to index
    %c0_43 = arith.constant 0 : index
    %200 = vector.load %arg13[%199, %c0_43] : memref<128x128xf32, #tpu.memory_space<vmem>>, vector<8x128xf32>
    tpu.vector_store %arg13[%199, %c0_43], %196 {strides = array<i32>} : memref<128x128xf32, #tpu.memory_space<vmem>>, vector<8x128xf32>,
    %c6_i32 = arith.constant 6 : i32
    %201 = arith.truncf %196 : vector<8x128xf32> to vector<8x128xbf16>
    %cst_44 = arith.constant dense<0.000000e+00> : vector<8x512xf32>
    %202 = tpu.matmul %201, %4, %cst_44 {dimension_numbers = #tpu.dot_dimension_numbers<[1], [0], [0], [1], [0, 0, 1, 1], [], []>} : vector<8x128xbf16>, vector<128x512xbf16>, vector<8x512xf32> -> vector<8x512xf32>
    %203 = arith.addf %3, %202 : vector<8x512xf32>
    %204 = vector.extract_strided_slice %203 {offsets = [0, 0], sizes = [8, 128], strides = [1, 1]} : vector<8x512xf32> to vector<8x128xf32>
    %205 = arith.negf %204 : vector<8x128xf32>
    %206 = math.exp %205 : vector<8x128xf32>
    %cst_45 = arith.constant 1.000000e+00 : f32
    %207 = vector.broadcast %cst_45 : f32 to vector<8x128xf32>
    %208 = arith.addf %207, %206 : vector<8x128xf32>
    %209 = arith.divf %207, %208 : vector<8x128xf32>
    %210 = vector.extract_strided_slice %203 {offsets = [0, 128], sizes = [8, 128], strides = [1, 1]} : vector<8x512xf32> to vector<8x128xf32>
    %211 = arith.negf %210 : vector<8x128xf32>
    %212 = math.exp %211 : vector<8x128xf32>
    %cst_46 = arith.constant 1.000000e+00 : f32
    %213 = vector.broadcast %cst_46 : f32 to vector<8x128xf32>
    %214 = arith.addf %213, %212 : vector<8x128xf32>
    %215 = arith.divf %213, %214 : vector<8x128xf32>
    %216 = vector.extract_strided_slice %203 {offsets = [0, 256], sizes = [8, 128], strides = [1, 1]} : vector<8x512xf32> to vector<8x128xf32>
    %217 = math.tanh %216 : vector<8x128xf32>
    %218 = vector.extract_strided_slice %203 {offsets = [0, 384], sizes = [8, 128], strides = [1, 1]} : vector<8x512xf32> to vector<8x128xf32>
    %219 = arith.negf %218 : vector<8x128xf32>
    %220 = math.exp %219 : vector<8x128xf32>
    %cst_47 = arith.constant 1.000000e+00 : f32
    %221 = vector.broadcast %cst_47 : f32 to vector<8x128xf32>
    %222 = arith.addf %221, %220 : vector<8x128xf32>
    %223 = arith.divf %221, %222 : vector<8x128xf32>
    %224 = arith.mulf %215, %194 : vector<8x128xf32>
    %225 = arith.mulf %209, %217 : vector<8x128xf32>
    %226 = arith.addf %224, %225 : vector<8x128xf32>
    %227 = math.tanh %226 : vector<8x128xf32>
    %228 = arith.mulf %223, %227 : vector<8x128xf32>
    %c8_i32_48 = arith.constant 8 : i32
    %229 = arith.muli %c6_i32, %c8_i32_48 : i32
    %230 = tpu.assume_multiple %229, 8 : i32
    %231 = arith.index_cast %230 : i32 to index
    %c0_49 = arith.constant 0 : index
    %232 = vector.load %arg13[%231, %c0_49] : memref<128x128xf32, #tpu.memory_space<vmem>>, vector<8x128xf32>
    tpu.vector_store %arg13[%231, %c0_49], %228 {strides = array<i32>} : memref<128x128xf32, #tpu.memory_space<vmem>>, vector<8x128xf32>,
    %c7_i32 = arith.constant 7 : i32
    %233 = arith.truncf %228 : vector<8x128xf32> to vector<8x128xbf16>
    %cst_50 = arith.constant dense<0.000000e+00> : vector<8x512xf32>
    %234 = tpu.matmul %233, %4, %cst_50 {dimension_numbers = #tpu.dot_dimension_numbers<[1], [0], [0], [1], [0, 0, 1, 1], [], []>} : vector<8x128xbf16>, vector<128x512xbf16>, vector<8x512xf32> -> vector<8x512xf32>
    %235 = arith.addf %3, %234 : vector<8x512xf32>
    %236 = vector.extract_strided_slice %235 {offsets = [0, 0], sizes = [8, 128], strides = [1, 1]} : vector<8x512xf32> to vector<8x128xf32>
    %237 = arith.negf %236 : vector<8x128xf32>
    %238 = math.exp %237 : vector<8x128xf32>
    %cst_51 = arith.constant 1.000000e+00 : f32
    %239 = vector.broadcast %cst_51 : f32 to vector<8x128xf32>
    %240 = arith.addf %239, %238 : vector<8x128xf32>
    %241 = arith.divf %239, %240 : vector<8x128xf32>
    %242 = vector.extract_strided_slice %235 {offsets = [0, 128], sizes = [8, 128], strides = [1, 1]} : vector<8x512xf32> to vector<8x128xf32>
    %243 = arith.negf %242 : vector<8x128xf32>
    %244 = math.exp %243 : vector<8x128xf32>
    %cst_52 = arith.constant 1.000000e+00 : f32
    %245 = vector.broadcast %cst_52 : f32 to vector<8x128xf32>
    %246 = arith.addf %245, %244 : vector<8x128xf32>
    %247 = arith.divf %245, %246 : vector<8x128xf32>
    %248 = vector.extract_strided_slice %235 {offsets = [0, 256], sizes = [8, 128], strides = [1, 1]} : vector<8x512xf32> to vector<8x128xf32>
    %249 = math.tanh %248 : vector<8x128xf32>
    %250 = vector.extract_strided_slice %235 {offsets = [0, 384], sizes = [8, 128], strides = [1, 1]} : vector<8x512xf32> to vector<8x128xf32>
    %251 = arith.negf %250 : vector<8x128xf32>
    %252 = math.exp %251 : vector<8x128xf32>
    %cst_53 = arith.constant 1.000000e+00 : f32
    %253 = vector.broadcast %cst_53 : f32 to vector<8x128xf32>
    %254 = arith.addf %253, %252 : vector<8x128xf32>
    %255 = arith.divf %253, %254 : vector<8x128xf32>
    %256 = arith.mulf %247, %226 : vector<8x128xf32>
    %257 = arith.mulf %241, %249 : vector<8x128xf32>
    %258 = arith.addf %256, %257 : vector<8x128xf32>
    %259 = math.tanh %258 : vector<8x128xf32>
    %260 = arith.mulf %255, %259 : vector<8x128xf32>
    %c8_i32_54 = arith.constant 8 : i32
    %261 = arith.muli %c7_i32, %c8_i32_54 : i32
    %262 = tpu.assume_multiple %261, 8 : i32
    %263 = arith.index_cast %262 : i32 to index
    %c0_55 = arith.constant 0 : index
    %264 = vector.load %arg13[%263, %c0_55] : memref<128x128xf32, #tpu.memory_space<vmem>>, vector<8x128xf32>
    tpu.vector_store %arg13[%263, %c0_55], %260 {strides = array<i32>} : memref<128x128xf32, #tpu.memory_space<vmem>>, vector<8x128xf32>,
    %c8_i32_56 = arith.constant 8 : i32
    %265 = arith.truncf %260 : vector<8x128xf32> to vector<8x128xbf16>
    %cst_57 = arith.constant dense<0.000000e+00> : vector<8x512xf32>
    %266 = tpu.matmul %265, %4, %cst_57 {dimension_numbers = #tpu.dot_dimension_numbers<[1], [0], [0], [1], [0, 0, 1, 1], [], []>} : vector<8x128xbf16>, vector<128x512xbf16>, vector<8x512xf32> -> vector<8x512xf32>
    %267 = arith.addf %3, %266 : vector<8x512xf32>
    %268 = vector.extract_strided_slice %267 {offsets = [0, 0], sizes = [8, 128], strides = [1, 1]} : vector<8x512xf32> to vector<8x128xf32>
    %269 = arith.negf %268 : vector<8x128xf32>
    %270 = math.exp %269 : vector<8x128xf32>
    %cst_58 = arith.constant 1.000000e+00 : f32
    %271 = vector.broadcast %cst_58 : f32 to vector<8x128xf32>
    %272 = arith.addf %271, %270 : vector<8x128xf32>
    %273 = arith.divf %271, %272 : vector<8x128xf32>
    %274 = vector.extract_strided_slice %267 {offsets = [0, 128], sizes = [8, 128], strides = [1, 1]} : vector<8x512xf32> to vector<8x128xf32>
    %275 = arith.negf %274 : vector<8x128xf32>
    %276 = math.exp %275 : vector<8x128xf32>
    %cst_59 = arith.constant 1.000000e+00 : f32
    %277 = vector.broadcast %cst_59 : f32 to vector<8x128xf32>
    %278 = arith.addf %277, %276 : vector<8x128xf32>
    %279 = arith.divf %277, %278 : vector<8x128xf32>
    %280 = vector.extract_strided_slice %267 {offsets = [0, 256], sizes = [8, 128], strides = [1, 1]} : vector<8x512xf32> to vector<8x128xf32>
    %281 = math.tanh %280 : vector<8x128xf32>
    %282 = vector.extract_strided_slice %267 {offsets = [0, 384], sizes = [8, 128], strides = [1, 1]} : vector<8x512xf32> to vector<8x128xf32>
    %283 = arith.negf %282 : vector<8x128xf32>
    %284 = math.exp %283 : vector<8x128xf32>
    %cst_60 = arith.constant 1.000000e+00 : f32
    %285 = vector.broadcast %cst_60 : f32 to vector<8x128xf32>
    %286 = arith.addf %285, %284 : vector<8x128xf32>
    %287 = arith.divf %285, %286 : vector<8x128xf32>
    %288 = arith.mulf %279, %258 : vector<8x128xf32>
    %289 = arith.mulf %273, %281 : vector<8x128xf32>
    %290 = arith.addf %288, %289 : vector<8x128xf32>
    %291 = math.tanh %290 : vector<8x128xf32>
    %292 = arith.mulf %287, %291 : vector<8x128xf32>
    %c8_i32_61 = arith.constant 8 : i32
    %293 = arith.muli %c8_i32_56, %c8_i32_61 : i32
    %294 = tpu.assume_multiple %293, 8 : i32
    %295 = arith.index_cast %294 : i32 to index
    %c0_62 = arith.constant 0 : index
    %296 = vector.load %arg13[%295, %c0_62] : memref<128x128xf32, #tpu.memory_space<vmem>>, vector<8x128xf32>
    tpu.vector_store %arg13[%295, %c0_62], %292 {strides = array<i32>} : memref<128x128xf32, #tpu.memory_space<vmem>>, vector<8x128xf32>,
    %c9_i32 = arith.constant 9 : i32
    %297 = arith.truncf %292 : vector<8x128xf32> to vector<8x128xbf16>
    %cst_63 = arith.constant dense<0.000000e+00> : vector<8x512xf32>
    %298 = tpu.matmul %297, %4, %cst_63 {dimension_numbers = #tpu.dot_dimension_numbers<[1], [0], [0], [1], [0, 0, 1, 1], [], []>} : vector<8x128xbf16>, vector<128x512xbf16>, vector<8x512xf32> -> vector<8x512xf32>
    %299 = arith.addf %3, %298 : vector<8x512xf32>
    %300 = vector.extract_strided_slice %299 {offsets = [0, 0], sizes = [8, 128], strides = [1, 1]} : vector<8x512xf32> to vector<8x128xf32>
    %301 = arith.negf %300 : vector<8x128xf32>
    %302 = math.exp %301 : vector<8x128xf32>
    %cst_64 = arith.constant 1.000000e+00 : f32
    %303 = vector.broadcast %cst_64 : f32 to vector<8x128xf32>
    %304 = arith.addf %303, %302 : vector<8x128xf32>
    %305 = arith.divf %303, %304 : vector<8x128xf32>
    %306 = vector.extract_strided_slice %299 {offsets = [0, 128], sizes = [8, 128], strides = [1, 1]} : vector<8x512xf32> to vector<8x128xf32>
    %307 = arith.negf %306 : vector<8x128xf32>
    %308 = math.exp %307 : vector<8x128xf32>
    %cst_65 = arith.constant 1.000000e+00 : f32
    %309 = vector.broadcast %cst_65 : f32 to vector<8x128xf32>
    %310 = arith.addf %309, %308 : vector<8x128xf32>
    %311 = arith.divf %309, %310 : vector<8x128xf32>
    %312 = vector.extract_strided_slice %299 {offsets = [0, 256], sizes = [8, 128], strides = [1, 1]} : vector<8x512xf32> to vector<8x128xf32>
    %313 = math.tanh %312 : vector<8x128xf32>
    %314 = vector.extract_strided_slice %299 {offsets = [0, 384], sizes = [8, 128], strides = [1, 1]} : vector<8x512xf32> to vector<8x128xf32>
    %315 = arith.negf %314 : vector<8x128xf32>
    %316 = math.exp %315 : vector<8x128xf32>
    %cst_66 = arith.constant 1.000000e+00 : f32
    %317 = vector.broadcast %cst_66 : f32 to vector<8x128xf32>
    %318 = arith.addf %317, %316 : vector<8x128xf32>
    %319 = arith.divf %317, %318 : vector<8x128xf32>
    %320 = arith.mulf %311, %290 : vector<8x128xf32>
    %321 = arith.mulf %305, %313 : vector<8x128xf32>
    %322 = arith.addf %320, %321 : vector<8x128xf32>
    %323 = math.tanh %322 : vector<8x128xf32>
    %324 = arith.mulf %319, %323 : vector<8x128xf32>
    %c8_i32_67 = arith.constant 8 : i32
    %325 = arith.muli %c9_i32, %c8_i32_67 : i32
    %326 = tpu.assume_multiple %325, 8 : i32
    %327 = arith.index_cast %326 : i32 to index
    %c0_68 = arith.constant 0 : index
    %328 = vector.load %arg13[%327, %c0_68] : memref<128x128xf32, #tpu.memory_space<vmem>>, vector<8x128xf32>
    tpu.vector_store %arg13[%327, %c0_68], %324 {strides = array<i32>} : memref<128x128xf32, #tpu.memory_space<vmem>>, vector<8x128xf32>,
    %c10_i32 = arith.constant 10 : i32
    %329 = arith.truncf %324 : vector<8x128xf32> to vector<8x128xbf16>
    %cst_69 = arith.constant dense<0.000000e+00> : vector<8x512xf32>
    %330 = tpu.matmul %329, %4, %cst_69 {dimension_numbers = #tpu.dot_dimension_numbers<[1], [0], [0], [1], [0, 0, 1, 1], [], []>} : vector<8x128xbf16>, vector<128x512xbf16>, vector<8x512xf32> -> vector<8x512xf32>
    %331 = arith.addf %3, %330 : vector<8x512xf32>
    %332 = vector.extract_strided_slice %331 {offsets = [0, 0], sizes = [8, 128], strides = [1, 1]} : vector<8x512xf32> to vector<8x128xf32>
    %333 = arith.negf %332 : vector<8x128xf32>
    %334 = math.exp %333 : vector<8x128xf32>
    %cst_70 = arith.constant 1.000000e+00 : f32
    %335 = vector.broadcast %cst_70 : f32 to vector<8x128xf32>
    %336 = arith.addf %335, %334 : vector<8x128xf32>
    %337 = arith.divf %335, %336 : vector<8x128xf32>
    %338 = vector.extract_strided_slice %331 {offsets = [0, 128], sizes = [8, 128], strides = [1, 1]} : vector<8x512xf32> to vector<8x128xf32>
    %339 = arith.negf %338 : vector<8x128xf32>
    %340 = math.exp %339 : vector<8x128xf32>
    %cst_71 = arith.constant 1.000000e+00 : f32
    %341 = vector.broadcast %cst_71 : f32 to vector<8x128xf32>
    %342 = arith.addf %341, %340 : vector<8x128xf32>
    %343 = arith.divf %341, %342 : vector<8x128xf32>
    %344 = vector.extract_strided_slice %331 {offsets = [0, 256], sizes = [8, 128], strides = [1, 1]} : vector<8x512xf32> to vector<8x128xf32>
    %345 = math.tanh %344 : vector<8x128xf32>
    %346 = vector.extract_strided_slice %331 {offsets = [0, 384], sizes = [8, 128], strides = [1, 1]} : vector<8x512xf32> to vector<8x128xf32>
    %347 = arith.negf %346 : vector<8x128xf32>
    %348 = math.exp %347 : vector<8x128xf32>
    %cst_72 = arith.constant 1.000000e+00 : f32
    %349 = vector.broadcast %cst_72 : f32 to vector<8x128xf32>
    %350 = arith.addf %349, %348 : vector<8x128xf32>
    %351 = arith.divf %349, %350 : vector<8x128xf32>
    %352 = arith.mulf %343, %322 : vector<8x128xf32>
    %353 = arith.mulf %337, %345 : vector<8x128xf32>
    %354 = arith.addf %352, %353 : vector<8x128xf32>
    %355 = math.tanh %354 : vector<8x128xf32>
    %356 = arith.mulf %351, %355 : vector<8x128xf32>
    %c8_i32_73 = arith.constant 8 : i32
    %357 = arith.muli %c10_i32, %c8_i32_73 : i32
    %358 = tpu.assume_multiple %357, 8 : i32
    %359 = arith.index_cast %358 : i32 to index
    %c0_74 = arith.constant 0 : index
    %360 = vector.load %arg13[%359, %c0_74] : memref<128x128xf32, #tpu.memory_space<vmem>>, vector<8x128xf32>
    tpu.vector_store %arg13[%359, %c0_74], %356 {strides = array<i32>} : memref<128x128xf32, #tpu.memory_space<vmem>>, vector<8x128xf32>,
    %c11_i32 = arith.constant 11 : i32
    %361 = arith.truncf %356 : vector<8x128xf32> to vector<8x128xbf16>
    %cst_75 = arith.constant dense<0.000000e+00> : vector<8x512xf32>
    %362 = tpu.matmul %361, %4, %cst_75 {dimension_numbers = #tpu.dot_dimension_numbers<[1], [0], [0], [1], [0, 0, 1, 1], [], []>} : vector<8x128xbf16>, vector<128x512xbf16>, vector<8x512xf32> -> vector<8x512xf32>
    %363 = arith.addf %3, %362 : vector<8x512xf32>
    %364 = vector.extract_strided_slice %363 {offsets = [0, 0], sizes = [8, 128], strides = [1, 1]} : vector<8x512xf32> to vector<8x128xf32>
    %365 = arith.negf %364 : vector<8x128xf32>
    %366 = math.exp %365 : vector<8x128xf32>
    %cst_76 = arith.constant 1.000000e+00 : f32
    %367 = vector.broadcast %cst_76 : f32 to vector<8x128xf32>
    %368 = arith.addf %367, %366 : vector<8x128xf32>
    %369 = arith.divf %367, %368 : vector<8x128xf32>
    %370 = vector.extract_strided_slice %363 {offsets = [0, 128], sizes = [8, 128], strides = [1, 1]} : vector<8x512xf32> to vector<8x128xf32>
    %371 = arith.negf %370 : vector<8x128xf32>
    %372 = math.exp %371 : vector<8x128xf32>
    %cst_77 = arith.constant 1.000000e+00 : f32
    %373 = vector.broadcast %cst_77 : f32 to vector<8x128xf32>
    %374 = arith.addf %373, %372 : vector<8x128xf32>
    %375 = arith.divf %373, %374 : vector<8x128xf32>
    %376 = vector.extract_strided_slice %363 {offsets = [0, 256], sizes = [8, 128], strides = [1, 1]} : vector<8x512xf32> to vector<8x128xf32>
    %377 = math.tanh %376 : vector<8x128xf32>
    %378 = vector.extract_strided_slice %363 {offsets = [0, 384], sizes = [8, 128], strides = [1, 1]} : vector<8x512xf32> to vector<8x128xf32>
    %379 = arith.negf %378 : vector<8x128xf32>
    %380 = math.exp %379 : vector<8x128xf32>
    %cst_78 = arith.constant 1.000000e+00 : f32
    %381 = vector.broadcast %cst_78 : f32 to vector<8x128xf32>
    %382 = arith.addf %381, %380 : vector<8x128xf32>
    %383 = arith.divf %381, %382 : vector<8x128xf32>
    %384 = arith.mulf %375, %354 : vector<8x128xf32>
    %385 = arith.mulf %369, %377 : vector<8x128xf32>
    %386 = arith.addf %384, %385 : vector<8x128xf32>
    %387 = math.tanh %386 : vector<8x128xf32>
    %388 = arith.mulf %383, %387 : vector<8x128xf32>
    %c8_i32_79 = arith.constant 8 : i32
    %389 = arith.muli %c11_i32, %c8_i32_79 : i32
    %390 = tpu.assume_multiple %389, 8 : i32
    %391 = arith.index_cast %390 : i32 to index
    %c0_80 = arith.constant 0 : index
    %392 = vector.load %arg13[%391, %c0_80] : memref<128x128xf32, #tpu.memory_space<vmem>>, vector<8x128xf32>
    tpu.vector_store %arg13[%391, %c0_80], %388 {strides = array<i32>} : memref<128x128xf32, #tpu.memory_space<vmem>>, vector<8x128xf32>,
    %c12_i32 = arith.constant 12 : i32
    %393 = arith.truncf %388 : vector<8x128xf32> to vector<8x128xbf16>
    %cst_81 = arith.constant dense<0.000000e+00> : vector<8x512xf32>
    %394 = tpu.matmul %393, %4, %cst_81 {dimension_numbers = #tpu.dot_dimension_numbers<[1], [0], [0], [1], [0, 0, 1, 1], [], []>} : vector<8x128xbf16>, vector<128x512xbf16>, vector<8x512xf32> -> vector<8x512xf32>
    %395 = arith.addf %3, %394 : vector<8x512xf32>
    %396 = vector.extract_strided_slice %395 {offsets = [0, 0], sizes = [8, 128], strides = [1, 1]} : vector<8x512xf32> to vector<8x128xf32>
    %397 = arith.negf %396 : vector<8x128xf32>
    %398 = math.exp %397 : vector<8x128xf32>
    %cst_82 = arith.constant 1.000000e+00 : f32
    %399 = vector.broadcast %cst_82 : f32 to vector<8x128xf32>
    %400 = arith.addf %399, %398 : vector<8x128xf32>
    %401 = arith.divf %399, %400 : vector<8x128xf32>
    %402 = vector.extract_strided_slice %395 {offsets = [0, 128], sizes = [8, 128], strides = [1, 1]} : vector<8x512xf32> to vector<8x128xf32>
    %403 = arith.negf %402 : vector<8x128xf32>
    %404 = math.exp %403 : vector<8x128xf32>
    %cst_83 = arith.constant 1.000000e+00 : f32
    %405 = vector.broadcast %cst_83 : f32 to vector<8x128xf32>
    %406 = arith.addf %405, %404 : vector<8x128xf32>
    %407 = arith.divf %405, %406 : vector<8x128xf32>
    %408 = vector.extract_strided_slice %395 {offsets = [0, 256], sizes = [8, 128], strides = [1, 1]} : vector<8x512xf32> to vector<8x128xf32>
    %409 = math.tanh %408 : vector<8x128xf32>
    %410 = vector.extract_strided_slice %395 {offsets = [0, 384], sizes = [8, 128], strides = [1, 1]} : vector<8x512xf32> to vector<8x128xf32>
    %411 = arith.negf %410 : vector<8x128xf32>
    %412 = math.exp %411 : vector<8x128xf32>
    %cst_84 = arith.constant 1.000000e+00 : f32
    %413 = vector.broadcast %cst_84 : f32 to vector<8x128xf32>
    %414 = arith.addf %413, %412 : vector<8x128xf32>
    %415 = arith.divf %413, %414 : vector<8x128xf32>
    %416 = arith.mulf %407, %386 : vector<8x128xf32>
    %417 = arith.mulf %401, %409 : vector<8x128xf32>
    %418 = arith.addf %416, %417 : vector<8x128xf32>
    %419 = math.tanh %418 : vector<8x128xf32>
    %420 = arith.mulf %415, %419 : vector<8x128xf32>
    %c8_i32_85 = arith.constant 8 : i32
    %421 = arith.muli %c12_i32, %c8_i32_85 : i32
    %422 = tpu.assume_multiple %421, 8 : i32
    %423 = arith.index_cast %422 : i32 to index
    %c0_86 = arith.constant 0 : index
    %424 = vector.load %arg13[%423, %c0_86] : memref<128x128xf32, #tpu.memory_space<vmem>>, vector<8x128xf32>
    tpu.vector_store %arg13[%423, %c0_86], %420 {strides = array<i32>} : memref<128x128xf32, #tpu.memory_space<vmem>>, vector<8x128xf32>,
    %c13_i32 = arith.constant 13 : i32
    %425 = arith.truncf %420 : vector<8x128xf32> to vector<8x128xbf16>
    %cst_87 = arith.constant dense<0.000000e+00> : vector<8x512xf32>
    %426 = tpu.matmul %425, %4, %cst_87 {dimension_numbers = #tpu.dot_dimension_numbers<[1], [0], [0], [1], [0, 0, 1, 1], [], []>} : vector<8x128xbf16>, vector<128x512xbf16>, vector<8x512xf32> -> vector<8x512xf32>
    %427 = arith.addf %3, %426 : vector<8x512xf32>
    %428 = vector.extract_strided_slice %427 {offsets = [0, 0], sizes = [8, 128], strides = [1, 1]} : vector<8x512xf32> to vector<8x128xf32>
    %429 = arith.negf %428 : vector<8x128xf32>
    %430 = math.exp %429 : vector<8x128xf32>
    %cst_88 = arith.constant 1.000000e+00 : f32
    %431 = vector.broadcast %cst_88 : f32 to vector<8x128xf32>
    %432 = arith.addf %431, %430 : vector<8x128xf32>
    %433 = arith.divf %431, %432 : vector<8x128xf32>
    %434 = vector.extract_strided_slice %427 {offsets = [0, 128], sizes = [8, 128], strides = [1, 1]} : vector<8x512xf32> to vector<8x128xf32>
    %435 = arith.negf %434 : vector<8x128xf32>
    %436 = math.exp %435 : vector<8x128xf32>
    %cst_89 = arith.constant 1.000000e+00 : f32
    %437 = vector.broadcast %cst_89 : f32 to vector<8x128xf32>
    %438 = arith.addf %437, %436 : vector<8x128xf32>
    %439 = arith.divf %437, %438 : vector<8x128xf32>
    %440 = vector.extract_strided_slice %427 {offsets = [0, 256], sizes = [8, 128], strides = [1, 1]} : vector<8x512xf32> to vector<8x128xf32>
    %441 = math.tanh %440 : vector<8x128xf32>
    %442 = vector.extract_strided_slice %427 {offsets = [0, 384], sizes = [8, 128], strides = [1, 1]} : vector<8x512xf32> to vector<8x128xf32>
    %443 = arith.negf %442 : vector<8x128xf32>
    %444 = math.exp %443 : vector<8x128xf32>
    %cst_90 = arith.constant 1.000000e+00 : f32
    %445 = vector.broadcast %cst_90 : f32 to vector<8x128xf32>
    %446 = arith.addf %445, %444 : vector<8x128xf32>
    %447 = arith.divf %445, %446 : vector<8x128xf32>
    %448 = arith.mulf %439, %418 : vector<8x128xf32>
    %449 = arith.mulf %433, %441 : vector<8x128xf32>
    %450 = arith.addf %448, %449 : vector<8x128xf32>
    %451 = math.tanh %450 : vector<8x128xf32>
    %452 = arith.mulf %447, %451 : vector<8x128xf32>
    %c8_i32_91 = arith.constant 8 : i32
    %453 = arith.muli %c13_i32, %c8_i32_91 : i32
    %454 = tpu.assume_multiple %453, 8 : i32
    %455 = arith.index_cast %454 : i32 to index
    %c0_92 = arith.constant 0 : index
    %456 = vector.load %arg13[%455, %c0_92] : memref<128x128xf32, #tpu.memory_space<vmem>>, vector<8x128xf32>
    tpu.vector_store %arg13[%455, %c0_92], %452 {strides = array<i32>} : memref<128x128xf32, #tpu.memory_space<vmem>>, vector<8x128xf32>,
    %c14_i32 = arith.constant 14 : i32
    %457 = arith.truncf %452 : vector<8x128xf32> to vector<8x128xbf16>
    %cst_93 = arith.constant dense<0.000000e+00> : vector<8x512xf32>
    %458 = tpu.matmul %457, %4, %cst_93 {dimension_numbers = #tpu.dot_dimension_numbers<[1], [0], [0], [1], [0, 0, 1, 1], [], []>} : vector<8x128xbf16>, vector<128x512xbf16>, vector<8x512xf32> -> vector<8x512xf32>
    %459 = arith.addf %3, %458 : vector<8x512xf32>
    %460 = vector.extract_strided_slice %459 {offsets = [0, 0], sizes = [8, 128], strides = [1, 1]} : vector<8x512xf32> to vector<8x128xf32>
    %461 = arith.negf %460 : vector<8x128xf32>
    %462 = math.exp %461 : vector<8x128xf32>
    %cst_94 = arith.constant 1.000000e+00 : f32
    %463 = vector.broadcast %cst_94 : f32 to vector<8x128xf32>
    %464 = arith.addf %463, %462 : vector<8x128xf32>
    %465 = arith.divf %463, %464 : vector<8x128xf32>
    %466 = vector.extract_strided_slice %459 {offsets = [0, 128], sizes = [8, 128], strides = [1, 1]} : vector<8x512xf32> to vector<8x128xf32>
    %467 = arith.negf %466 : vector<8x128xf32>
    %468 = math.exp %467 : vector<8x128xf32>
    %cst_95 = arith.constant 1.000000e+00 : f32
    %469 = vector.broadcast %cst_95 : f32 to vector<8x128xf32>
    %470 = arith.addf %469, %468 : vector<8x128xf32>
    %471 = arith.divf %469, %470 : vector<8x128xf32>
    %472 = vector.extract_strided_slice %459 {offsets = [0, 256], sizes = [8, 128], strides = [1, 1]} : vector<8x512xf32> to vector<8x128xf32>
    %473 = math.tanh %472 : vector<8x128xf32>
    %474 = vector.extract_strided_slice %459 {offsets = [0, 384], sizes = [8, 128], strides = [1, 1]} : vector<8x512xf32> to vector<8x128xf32>
    %475 = arith.negf %474 : vector<8x128xf32>
    %476 = math.exp %475 : vector<8x128xf32>
    %cst_96 = arith.constant 1.000000e+00 : f32
    %477 = vector.broadcast %cst_96 : f32 to vector<8x128xf32>
    %478 = arith.addf %477, %476 : vector<8x128xf32>
    %479 = arith.divf %477, %478 : vector<8x128xf32>
    %480 = arith.mulf %471, %450 : vector<8x128xf32>
    %481 = arith.mulf %465, %473 : vector<8x128xf32>
    %482 = arith.addf %480, %481 : vector<8x128xf32>
    %483 = math.tanh %482 : vector<8x128xf32>
    %484 = arith.mulf %479, %483 : vector<8x128xf32>
    %c8_i32_97 = arith.constant 8 : i32
    %485 = arith.muli %c14_i32, %c8_i32_97 : i32
    %486 = tpu.assume_multiple %485, 8 : i32
    %487 = arith.index_cast %486 : i32 to index
    %c0_98 = arith.constant 0 : index
    %488 = vector.load %arg13[%487, %c0_98] : memref<128x128xf32, #tpu.memory_space<vmem>>, vector<8x128xf32>
    tpu.vector_store %arg13[%487, %c0_98], %484 {strides = array<i32>} : memref<128x128xf32, #tpu.memory_space<vmem>>, vector<8x128xf32>,
    %c15_i32 = arith.constant 15 : i32
    %489 = arith.truncf %484 : vector<8x128xf32> to vector<8x128xbf16>
    %cst_99 = arith.constant dense<0.000000e+00> : vector<8x512xf32>
    %490 = tpu.matmul %489, %4, %cst_99 {dimension_numbers = #tpu.dot_dimension_numbers<[1], [0], [0], [1], [0, 0, 1, 1], [], []>} : vector<8x128xbf16>, vector<128x512xbf16>, vector<8x512xf32> -> vector<8x512xf32>
    %491 = arith.addf %3, %490 : vector<8x512xf32>
    %492 = vector.extract_strided_slice %491 {offsets = [0, 0], sizes = [8, 128], strides = [1, 1]} : vector<8x512xf32> to vector<8x128xf32>
    %493 = arith.negf %492 : vector<8x128xf32>
    %494 = math.exp %493 : vector<8x128xf32>
    %cst_100 = arith.constant 1.000000e+00 : f32
    %495 = vector.broadcast %cst_100 : f32 to vector<8x128xf32>
    %496 = arith.addf %495, %494 : vector<8x128xf32>
    %497 = arith.divf %495, %496 : vector<8x128xf32>
    %498 = vector.extract_strided_slice %491 {offsets = [0, 128], sizes = [8, 128], strides = [1, 1]} : vector<8x512xf32> to vector<8x128xf32>
    %499 = arith.negf %498 : vector<8x128xf32>
    %500 = math.exp %499 : vector<8x128xf32>
    %cst_101 = arith.constant 1.000000e+00 : f32
    %501 = vector.broadcast %cst_101 : f32 to vector<8x128xf32>
    %502 = arith.addf %501, %500 : vector<8x128xf32>
    %503 = arith.divf %501, %502 : vector<8x128xf32>
    %504 = vector.extract_strided_slice %491 {offsets = [0, 256], sizes = [8, 128], strides = [1, 1]} : vector<8x512xf32> to vector<8x128xf32>
    %505 = math.tanh %504 : vector<8x128xf32>
    %506 = vector.extract_strided_slice %491 {offsets = [0, 384], sizes = [8, 128], strides = [1, 1]} : vector<8x512xf32> to vector<8x128xf32>
    %507 = arith.negf %506 : vector<8x128xf32>
    %508 = math.exp %507 : vector<8x128xf32>
    %cst_102 = arith.constant 1.000000e+00 : f32
    %509 = vector.broadcast %cst_102 : f32 to vector<8x128xf32>
    %510 = arith.addf %509, %508 : vector<8x128xf32>
    %511 = arith.divf %509, %510 : vector<8x128xf32>
    %512 = arith.mulf %503, %482 : vector<8x128xf32>
    %513 = arith.mulf %497, %505 : vector<8x128xf32>
    %514 = arith.addf %512, %513 : vector<8x128xf32>
    %515 = math.tanh %514 : vector<8x128xf32>
    %516 = arith.mulf %511, %515 : vector<8x128xf32>
    %c8_i32_103 = arith.constant 8 : i32
    %517 = arith.muli %c15_i32, %c8_i32_103 : i32
    %518 = tpu.assume_multiple %517, 8 : i32
    %519 = arith.index_cast %518 : i32 to index
    %c0_104 = arith.constant 0 : index
    %520 = vector.load %arg13[%519, %c0_104] : memref<128x128xf32, #tpu.memory_space<vmem>>, vector<8x128xf32>
    tpu.vector_store %arg13[%519, %c0_104], %516 {strides = array<i32>} : memref<128x128xf32, #tpu.memory_space<vmem>>, vector<8x128xf32>,
    %c16_i32 = arith.constant 16 : i32
    %c0_105 = arith.constant 0 : index
    %c0_106 = arith.constant 0 : index
    %c0_107 = arith.constant 0 : index
    %521 = vector.load %arg12[%c0_105, %c0_106, %c0_107] : memref<2x8x128xf32, #tpu.memory_space<vmem>>, vector<1x8x128xf32>
    %522 = vector.shape_cast %521 : vector<1x8x128xf32> to vector<8x128xf32>
    %523 = vector.shape_cast %516 : vector<8x128xf32> to vector<1x8x128xf32>
    tpu.vector_store %arg12[%c0_105, %c0_106, %c0_107], %523 {strides = array<i32>} : memref<2x8x128xf32, #tpu.memory_space<vmem>>, vector<1x8x128xf32>,
    %c1_108 = arith.constant 1 : index
    %c0_109 = arith.constant 0 : index
    %c0_110 = arith.constant 0 : index
    %524 = vector.load %arg12[%c1_108, %c0_109, %c0_110] : memref<2x8x128xf32, #tpu.memory_space<vmem>>, vector<1x8x128xf32>
    %525 = vector.shape_cast %524 : vector<1x8x128xf32> to vector<8x128xf32>
    %526 = vector.shape_cast %514 : vector<8x128xf32> to vector<1x8x128xf32>
    tpu.vector_store %arg12[%c1_108, %c0_109, %c0_110], %526 {strides = array<i32>} : memref<2x8x128xf32, #tpu.memory_space<vmem>>, vector<1x8x128xf32>,
    %c0_111 = arith.constant 0 : index
    %c0_112 = arith.constant 0 : index
    %527 = vector.load %arg13[%c0_111, %c0_112] : memref<128x128xf32, #tpu.memory_space<vmem>>, vector<128x128xf32>
    %528 = arith.truncf %527 : vector<128x128xf32> to vector<128x128xbf16>
    %c0_113 = arith.constant 0 : index
    %c0_114 = arith.constant 0 : index
    %529 = vector.load %arg8[%c0_113, %c0_114] : memref<128x128xbf16, #tpu.memory_space<vmem>>, vector<128x128xbf16>
    tpu.vector_store %arg8[%c0_113, %c0_114], %528 {strides = array<i32>} : memref<128x128xbf16, #tpu.memory_space<vmem>>, vector<128x128xbf16>,
    return
  }
  func.func @transform_0(%arg0: i32) -> (i32, i32) {
    %c0_i32 = arith.constant 0 : i32
    %c0_i32_0 = arith.constant 0 : i32
    %c0_i32_1 = arith.constant 0 : i32
    return %c0_i32, %c0_i32_0 : i32, i32
  }
  func.func @transform_1(%arg0: i32) -> (i32, i32) {
    %c0_i32 = arith.constant 0 : i32
    %c0_i32_0 = arith.constant 0 : i32
    %c0_i32_1 = arith.constant 0 : i32
    return %c0_i32, %c0_i32_0 : i32, i32
  }
  func.func @transform_2(%arg0: i32) -> (i32, i32) {
    %c0_i32 = arith.constant 0 : i32
    %c0_i32_0 = arith.constant 0 : i32
    %c0_i32_1 = arith.constant 0 : i32
    return %c0_i32, %c0_i32_0 : i32, i32
  }
  func.func @transform_3(%arg0: i32) -> (i32, i32) {
    %c0_i32 = arith.constant 0 : i32
    %c0_i32_0 = arith.constant 0 : i32
    %c0_i32_1 = arith.constant 0 : i32
    return %c0_i32, %c0_i32_0 : i32, i32
  }
  func.func @transform_4(%arg0: i32) -> (i32, i32) {
    %c0_i32 = arith.constant 0 : i32
    %c0_i32_0 = arith.constant 0 : i32
    %c0_i32_1 = arith.constant 0 : i32
    return %c0_i32, %c0_i32_0 : i32, i32
  }
  func.func @transform_5(%arg0: i32) -> (i32, i32) {
    %c0_i32 = arith.constant 0 : i32
    %c0_i32_0 = arith.constant 0 : i32
    %c0_i32_1 = arith.constant 0 : i32
    return %c0_i32, %c0_i32_0 : i32, i32
  }
  func.func @transform_7(%arg0: i32) -> (i32, i32) {
    %c0_i32 = arith.constant 0 : i32
    %c0_i32_0 = arith.constant 0 : i32
    return %arg0, %c0_i32 : i32, i32
  }
  func.func @transform_8(%arg0: i32) -> (i32, i32) {
    %c0_i32 = arith.constant 0 : i32
    %c0_i32_0 = arith.constant 0 : i32
    %c0_i32_1 = arith.constant 0 : i32
    return %c0_i32, %c0_i32_0 : i32, i32
  }
}

module attributes {stable_mosaic.version = 11 : i64} {
  func.func @_mlp_ce_kernel(%arg0: i32, %arg1: i32, %arg2: memref<128x128xbf16, #tpu.memory_space<vmem>>, %arg3: memref<8x128xf32, #tpu.memory_space<vmem>>, %arg4: memref<128x128xbf16, #tpu.memory_space<vmem>>, %arg5: memref<128x128xbf16, #tpu.memory_space<vmem>>, %arg6: memref<1x128xf32, #tpu.memory_space<vmem>>, %arg7: memref<128x1xi32, #tpu.memory_space<vmem>>, %arg8: memref<1x1x128xf32, #tpu.memory_space<vmem>>, %arg9: memref<1x1x128xf32, #tpu.memory_space<vmem>>, %arg10: memref<128x128xbf16, #tpu.memory_space<vmem>>, %arg11: memref<128x128xf32, #tpu.memory_space<vmem>>, %arg12: memref<128x128xf32, #tpu.memory_space<vmem>>, %arg13: memref<128x128xf32, #tpu.memory_space<vmem>>) attributes {dimension_semantics = [#tpu.dimension_semantics<parallel>, #tpu.dimension_semantics<arbitrary>], iteration_bounds = array<i64: 1, 1>, scalar_prefetch = 0 : i64, scratch_operands = 4 : i64, tpu.core_type = #tpu.core_type<tc>, window_params = [{transform_indices = @transform_0, window_bounds = array<i64: 128, 128>}, {pipeline_mode = #tpu.pipeline_mode<synchronous>, transform_indices = @transform_1, window_bounds = array<i64: 8, 128>}, {pipeline_mode = #tpu.pipeline_mode<synchronous>, transform_indices = @transform_2, window_bounds = array<i64: 128, 128>}, {transform_indices = @transform_3, window_bounds = array<i64: 128, 128>}, {transform_indices = @transform_4, window_bounds = array<i64: 1, 128>}, {transform_indices = @transform_5, window_bounds = array<i64: 128, 1>}, {transform_indices = @transform_6, window_bounds = array<i64: 1, 1, 128>}, {transform_indices = @transform_7, window_bounds = array<i64: 1, 1, 128>}]} {
    %c0_i32 = arith.constant 0 : i32
    %0 = arith.cmpi eq, %arg1, %c0_i32 : i32
    %1 = arith.extui %0 : i1 to i32
    %c0_i32_0 = arith.constant 0 : i32
    %2 = arith.cmpi ne, %1, %c0_i32_0 : i32
    scf.if %2 {
      %c0_26 = arith.constant 0 : index
      %c0_27 = arith.constant 0 : index
      %41 = vector.load %arg3[%c0_26, %c0_27] : memref<8x128xf32, #tpu.memory_space<vmem>>, vector<8x128xf32>
      %42 = vector.shape_cast %41 : vector<8x128xf32> to vector<1x8x128xf32>
      %43 = vector.shape_cast %42 : vector<1x8x128xf32> to vector<1x8x128xf32>
      %44 = vector.broadcast %43 : vector<1x8x128xf32> to vector<16x8x128xf32>
      %45 = vector.shape_cast %44 : vector<16x8x128xf32> to vector<128x128xf32>
      %c0_28 = arith.constant 0 : index
      %c0_29 = arith.constant 0 : index
      %46 = vector.load %arg2[%c0_28, %c0_29] : memref<128x128xbf16, #tpu.memory_space<vmem>>, vector<128x128xbf16>
      %c0_30 = arith.constant 0 : index
      %c0_31 = arith.constant 0 : index
      %47 = vector.load %arg4[%c0_30, %c0_31] : memref<128x128xbf16, #tpu.memory_space<vmem>>, vector<128x128xbf16>
      %cst_32 = arith.constant dense<0.000000e+00> : vector<128x128xf32>
      %48 = tpu.matmul %46, %47, %cst_32 {dimension_numbers = #tpu.dot_dimension_numbers<[1], [0], [0], [1], [0, 0, 1, 1], [], []>} : vector<128x128xbf16>, vector<128x128xbf16>, vector<128x128xf32> -> vector<128x128xf32>
      %49 = arith.addf %48, %45 : vector<128x128xf32>
      %cst_33 = arith.constant 0.000000e+00 : f32
      %50 = vector.broadcast %cst_33 : f32 to vector<128x128xf32>
      %51 = arith.maximumf %49, %50 : vector<128x128xf32>
      %52 = arith.truncf %51 : vector<128x128xf32> to vector<128x128xbf16>
      %c0_34 = arith.constant 0 : index
      %c0_35 = arith.constant 0 : index
      %53 = vector.load %arg10[%c0_34, %c0_35] : memref<128x128xbf16, #tpu.memory_space<vmem>>, vector<128x128xbf16>
      tpu.vector_store %arg10[%c0_34, %c0_35], %52 {strides = array<i32>} : memref<128x128xbf16, #tpu.memory_space<vmem>>, vector<128x128xbf16>,
      %cst_36 = arith.constant 0xFF800000 : f32
      %54 = vector.broadcast %cst_36 : f32 to vector<128x128xf32>
      %c0_37 = arith.constant 0 : index
      %c0_38 = arith.constant 0 : index
      %55 = vector.load %arg11[%c0_37, %c0_38] : memref<128x128xf32, #tpu.memory_space<vmem>>, vector<128x128xf32>
      tpu.vector_store %arg11[%c0_37, %c0_38], %54 {strides = array<i32>} : memref<128x128xf32, #tpu.memory_space<vmem>>, vector<128x128xf32>,
      %cst_39 = arith.constant 0.000000e+00 : f32
      %56 = vector.broadcast %cst_39 : f32 to vector<128x128xf32>
      %c0_40 = arith.constant 0 : index
      %c0_41 = arith.constant 0 : index
      %57 = vector.load %arg12[%c0_40, %c0_41] : memref<128x128xf32, #tpu.memory_space<vmem>>, vector<128x128xf32>
      tpu.vector_store %arg12[%c0_40, %c0_41], %56 {strides = array<i32>} : memref<128x128xf32, #tpu.memory_space<vmem>>, vector<128x128xf32>,
      %cst_42 = arith.constant 0.000000e+00 : f32
      %58 = vector.broadcast %cst_42 : f32 to vector<128x128xf32>
      %c0_43 = arith.constant 0 : index
      %c0_44 = arith.constant 0 : index
      %59 = vector.load %arg13[%c0_43, %c0_44] : memref<128x128xf32, #tpu.memory_space<vmem>>, vector<128x128xf32>
      tpu.vector_store %arg13[%c0_43, %c0_44], %58 {strides = array<i32>} : memref<128x128xf32, #tpu.memory_space<vmem>>, vector<128x128xf32>,
    } else {
    }
    %c0 = arith.constant 0 : index
    %c0_1 = arith.constant 0 : index
    %3 = vector.load %arg10[%c0, %c0_1] : memref<128x128xbf16, #tpu.memory_space<vmem>>, vector<128x128xbf16>
    %c0_2 = arith.constant 0 : index
    %c0_3 = arith.constant 0 : index
    %4 = vector.load %arg5[%c0_2, %c0_3] : memref<128x128xbf16, #tpu.memory_space<vmem>>, vector<128x128xbf16>
    %cst = arith.constant dense<0.000000e+00> : vector<128x128xf32>
    %5 = tpu.matmul %3, %4, %cst {dimension_numbers = #tpu.dot_dimension_numbers<[1], [0], [0], [1], [0, 0, 1, 1], [], []>} : vector<128x128xbf16>, vector<128x128xbf16>, vector<128x128xf32> -> vector<128x128xf32>
    %c0_4 = arith.constant 0 : index
    %c0_5 = arith.constant 0 : index
    %6 = vector.load %arg6[%c0_4, %c0_5] : memref<1x128xf32, #tpu.memory_space<vmem>>, vector<1x128xf32>
    %7 = vector.broadcast %6 : vector<1x128xf32> to vector<128x128xf32>
    %8 = arith.addf %5, %7 : vector<128x128xf32>
    %c0_6 = arith.constant 0 : index
    %c0_7 = arith.constant 0 : index
    %9 = vector.load %arg11[%c0_6, %c0_7] : memref<128x128xf32, #tpu.memory_space<vmem>>, vector<128x128xf32>
    %10 = arith.maximumf %9, %8 : vector<128x128xf32>
    %11 = arith.subf %9, %10 : vector<128x128xf32>
    %12 = math.exp %11 : vector<128x128xf32>
    %c0_8 = arith.constant 0 : index
    %c0_9 = arith.constant 0 : index
    %13 = vector.load %arg7[%c0_8, %c0_9] : memref<128x1xi32, #tpu.memory_space<vmem>>, vector<128x1xi32>
    %c128_i32 = arith.constant 128 : i32
    %14 = arith.muli %arg1, %c128_i32 : i32
    %15 = vector.broadcast %14 : i32 to vector<128x1xi32>
    %16 = arith.subi %13, %15 : vector<128x1xi32>
    %17 = tpu.iota {dimensions = array<i32: 1>} : vector<128x128xi32>
    %cst_10 = arith.constant 0.000000e+00 : f32
    %18 = vector.broadcast %cst_10 : f32 to vector<128x128xf32>
    %cst_11 = arith.constant 0.000000e+00 : f32
    %19 = vector.broadcast %cst_11 : f32 to vector<128x128xf32>
    %20 = arith.subf %8, %10 : vector<128x128xf32>
    %21 = math.exp %20 : vector<128x128xf32>
    %22 = arith.addf %18, %21 : vector<128x128xf32>
    %c0_i32_12 = arith.constant 0 : i32
    %23 = vector.broadcast %c0_i32_12 : i32 to vector<128x128xi32>
    %24 = arith.addi %17, %23 : vector<128x128xi32>
    %25 = vector.broadcast %16 : vector<128x1xi32> to vector<128x128xi32>
    %26 = arith.cmpi eq, %24, %25 : vector<128x128xi32>
    %cst_13 = arith.constant 0.000000e+00 : f32
    %27 = vector.broadcast %cst_13 : f32 to vector<128x128xf32>
    %28 = arith.select %26, %8, %27 : vector<128x128xi1>, vector<128x128xf32>
    %29 = arith.addf %19, %28 : vector<128x128xf32>
    %c0_14 = arith.constant 0 : index
    %c0_15 = arith.constant 0 : index
    %30 = vector.load %arg12[%c0_14, %c0_15] : memref<128x128xf32, #tpu.memory_space<vmem>>, vector<128x128xf32>
    %31 = arith.mulf %12, %30 : vector<128x128xf32>
    %32 = arith.addf %31, %22 : vector<128x128xf32>
    %c0_16 = arith.constant 0 : index
    %c0_17 = arith.constant 0 : index
    %33 = vector.load %arg12[%c0_16, %c0_17] : memref<128x128xf32, #tpu.memory_space<vmem>>, vector<128x128xf32>
    tpu.vector_store %arg12[%c0_16, %c0_17], %32 {strides = array<i32>} : memref<128x128xf32, #tpu.memory_space<vmem>>, vector<128x128xf32>,
    %c0_18 = arith.constant 0 : index
    %c0_19 = arith.constant 0 : index
    %34 = vector.load %arg13[%c0_18, %c0_19] : memref<128x128xf32, #tpu.memory_space<vmem>>, vector<128x128xf32>
    %35 = arith.addf %34, %29 : vector<128x128xf32>
    %c0_20 = arith.constant 0 : index
    %c0_21 = arith.constant 0 : index
    %36 = vector.load %arg13[%c0_20, %c0_21] : memref<128x128xf32, #tpu.memory_space<vmem>>, vector<128x128xf32>
    tpu.vector_store %arg13[%c0_20, %c0_21], %35 {strides = array<i32>} : memref<128x128xf32, #tpu.memory_space<vmem>>, vector<128x128xf32>,
    %c0_22 = arith.constant 0 : index
    %c0_23 = arith.constant 0 : index
    %37 = vector.load %arg11[%c0_22, %c0_23] : memref<128x128xf32, #tpu.memory_space<vmem>>, vector<128x128xf32>
    tpu.vector_store %arg11[%c0_22, %c0_23], %10 {strides = array<i32>} : memref<128x128xf32, #tpu.memory_space<vmem>>, vector<128x128xf32>,
    %c0_i32_24 = arith.constant 0 : i32
    %38 = arith.cmpi eq, %arg1, %c0_i32_24 : i32
    %39 = arith.extui %38 : i1 to i32
    %c0_i32_25 = arith.constant 0 : i32
    %40 = arith.cmpi ne, %39, %c0_i32_25 : i32
    scf.if %40 {
      %c0_26 = arith.constant 0 : index
      %c0_27 = arith.constant 0 : index
      %41 = vector.load %arg11[%c0_26, %c0_27] : memref<128x128xf32, #tpu.memory_space<vmem>>, vector<128x128xf32>
      %cst_28 = arith.constant dense<0xFF800000> : vector<128xf32>
      %42 = vector.multi_reduction <maximumf>, %41, %cst_28 [1] : vector<128x128xf32> to vector<128xf32>
      %43 = vector.shape_cast %42 : vector<128xf32> to vector<128x1xf32>
      %c0_29 = arith.constant 0 : index
      %c0_30 = arith.constant 0 : index
      %44 = vector.load %arg12[%c0_29, %c0_30] : memref<128x128xf32, #tpu.memory_space<vmem>>, vector<128x128xf32>
      %45 = vector.broadcast %43 : vector<128x1xf32> to vector<128x128xf32>
      %46 = arith.subf %41, %45 : vector<128x128xf32>
      %47 = math.exp %46 : vector<128x128xf32>
      %48 = arith.mulf %44, %47 : vector<128x128xf32>
      %cst_31 = arith.constant dense<0.000000e+00> : vector<128xf32>
      %49 = vector.multi_reduction <add>, %48, %cst_31 [1] : vector<128x128xf32> to vector<128xf32>
      %50 = vector.shape_cast %49 : vector<128xf32> to vector<128x1xf32>
      %c0_32 = arith.constant 0 : index
      %c0_33 = arith.constant 0 : index
      %51 = vector.load %arg13[%c0_32, %c0_33] : memref<128x128xf32, #tpu.memory_space<vmem>>, vector<128x128xf32>
      %cst_34 = arith.constant dense<0.000000e+00> : vector<128xf32>
      %52 = vector.multi_reduction <add>, %51, %cst_34 [1] : vector<128x128xf32> to vector<128xf32>
      %53 = vector.shape_cast %52 : vector<128xf32> to vector<128x1xf32>
      %54 = math.log %50 : vector<128x1xf32>
      %55 = arith.addf %43, %54 : vector<128x1xf32>
      %56 = arith.subf %55, %53 : vector<128x1xf32>
      %57 = vector.shape_cast %56 : vector<128x1xf32> to vector<128xf32>
      %c0_35 = arith.constant 0 : index
      %c0_36 = arith.constant 0 : index
      %c0_37 = arith.constant 0 : index
      %58 = vector.load %arg8[%c0_35, %c0_36, %c0_37] : memref<1x1x128xf32, #tpu.memory_space<vmem>>, vector<1x1x128xf32>
      %59 = vector.shape_cast %58 : vector<1x1x128xf32> to vector<128xf32>
      %60 = arith.mulf %57, %59 : vector<128xf32>
      %c0_38 = arith.constant 0 : index
      %c0_39 = arith.constant 0 : index
      %c0_40 = arith.constant 0 : index
      %61 = vector.load %arg9[%c0_38, %c0_39, %c0_40] : memref<1x1x128xf32, #tpu.memory_space<vmem>>, vector<1x1x128xf32>
      %62 = vector.shape_cast %61 : vector<1x1x128xf32> to vector<128xf32>
      %63 = vector.shape_cast %60 : vector<128xf32> to vector<1x1x128xf32>
      tpu.vector_store %arg9[%c0_38, %c0_39, %c0_40], %63 {strides = array<i32>} : memref<1x1x128xf32, #tpu.memory_space<vmem>>, vector<1x1x128xf32>,
    } else {
    }
    return
  }
  func.func @transform_0(%arg0: i32, %arg1: i32) -> (i32, i32) {
    %c0_i32 = arith.constant 0 : i32
    %c0_i32_0 = arith.constant 0 : i32
    return %arg0, %c0_i32 : i32, i32
  }
  func.func @transform_1(%arg0: i32, %arg1: i32) -> (i32, i32) {
    %c0_i32 = arith.constant 0 : i32
    %c0_i32_0 = arith.constant 0 : i32
    %c0_i32_1 = arith.constant 0 : i32
    return %c0_i32, %c0_i32_0 : i32, i32
  }
  func.func @transform_2(%arg0: i32, %arg1: i32) -> (i32, i32) {
    %c0_i32 = arith.constant 0 : i32
    %c0_i32_0 = arith.constant 0 : i32
    %c0_i32_1 = arith.constant 0 : i32
    return %c0_i32, %c0_i32_0 : i32, i32
  }
  func.func @transform_3(%arg0: i32, %arg1: i32) -> (i32, i32) {
    %c0_i32 = arith.constant 0 : i32
    %c0_i32_0 = arith.constant 0 : i32
    return %c0_i32, %arg1 : i32, i32
  }
  func.func @transform_4(%arg0: i32, %arg1: i32) -> (i32, i32) {
    %c0_i32 = arith.constant 0 : i32
    %c0_i32_0 = arith.constant 0 : i32
    return %c0_i32, %arg1 : i32, i32
  }
  func.func @transform_5(%arg0: i32, %arg1: i32) -> (i32, i32) {
    %c0_i32 = arith.constant 0 : i32
    %c0_i32_0 = arith.constant 0 : i32
    return %arg0, %c0_i32 : i32, i32
  }
  func.func @transform_6(%arg0: i32, %arg1: i32) -> (i32, i32, i32) {
    %c0_i32 = arith.constant 0 : i32
    %c0_i32_0 = arith.constant 0 : i32
    %c0_i32_1 = arith.constant 0 : i32
    return %arg0, %c0_i32, %c0_i32_0 : i32, i32, i32
  }
  func.func @transform_7(%arg0: i32, %arg1: i32) -> (i32, i32, i32) {
    %c0_i32 = arith.constant 0 : i32
    %c0_i32_0 = arith.constant 0 : i32
    %c0_i32_1 = arith.constant 0 : i32
    return %arg0, %c0_i32, %c0_i32_0 : i32, i32, i32
  }
}

</mosaic_0001>

<bundles_post_ra>
// kernel: lstm_decoder_forward.2
= control target key start
LH: loop header
LB: loop body
LE: loop exit
PB: predicated region body
PF: predicated region fallthrough
CT: control target
= control target key end

     0   :  { %s4204_s0 = inlined_call_operand.vmem [shape: f32[8,8], index: 0, kind: input, shape index: {}]   ;;  %s4205_s1 = inlined_call_operand.vmem [shape: f32[8,8], index: 1, kind: input, shape index: {}]   ;;  %s4206_s2 = inlined_call_operand.vmem [shape: f32[8,512], index: 2, kind: input, shape index: {}]   ;;  %s4207_s3 = inlined_call_operand.vmem [shape: f32[1,512], index: 3, kind: input, shape index: {}]   ;;  %s4208_s4 = inlined_call_operand.vmem [shape: f32[8,128], index: 4, kind: input, shape index: {}]   ;;  %s4209_s5 = inlined_call_operand.vmem [shape: f32[1,128], index: 5, kind: input, shape index: {}]   ;;  %s4210_s6 = inlined_call_operand.vmem [shape: bf16[128,512], index: 6, kind: input, shape index: {}]   ;;  %s4211_s7 = inlined_call_operand.vmem [shape: bf16[128,128], index: 7, kind: output, shape index: {0}]   ;;  %s4212_s8 = inlined_call_operand.vmem [shape: f32[8,128], index: 8, kind: output, shape index: {1}]  }
   0x1   :  { %v48_v0 = vld [vmem:[%s4210_s6] sm:$0xf]  ;;  %v50_v1 = vld [vmem:[%s4210_s6 + $0x10] sm:$0xf]  ;;  %v52_v2 = vld [vmem:[%s4210_s6 + $0x4] sm:$0xf] }
   0x2   :  { %49 = vst [vmem:[#allocation2] sm:$0xf] %v48_v0  ;;  %51 = vst [vmem:[#allocation2 + $0x4] sm:$0xf] %v50_v1  ;;  %v54_v3 = vld [vmem:[%s4210_s6 + $0x14] sm:$0xf] }
   0x3   :  { %53 = vst [vmem:[#allocation2 + $0x8] sm:$0xf] %v52_v2  ;;  %v56_v4 = vld [vmem:[%s4210_s6 + $0x8] sm:$0xf]  ;;  %v58_v5 = vld [vmem:[%s4210_s6 + $0x18] sm:$0xf] }
   0x4   :  { %55 = vst [vmem:[#allocation2 + $0xc] sm:$0xf] %v54_v3  ;;  %57 = vst [vmem:[#allocation2 + $0x10] sm:$0xf] %v56_v4  ;;  %v60_v6 = vld [vmem:[%s4210_s6 + $0xc] sm:$0xf] }
   0x5   :  { %59 = vst [vmem:[#allocation2 + $0x14] sm:$0xf] %v58_v5  ;;  %v62_v7 = vld [vmem:[%s4210_s6 + $0x1c] sm:$0xff]   ;;  %v66_v8 = vld [vmem:[%s4210_s6 + $0x30] sm:$0xf] }
   0x6   :  { %61 = vst [vmem:[#allocation2 + $0x18] sm:$0xf] %v60_v6  ;;  %63 = vst [vmem:[#allocation2 + $0x1c] sm:$0xff] %v62_v7   ;;  %v68_v9 = vld [vmem:[%s4210_s6 + $0x24] sm:$0xf]  ;;  %v78_v14 = vld [vmem:[%s4210_s6 + $0x3c] sm:$0xff]  }
   0x7   :  { %67 = vst [vmem:[#allocation2 + $0x24] sm:$0xf] %v66_v8  ;;  %v70_v10 = vld [vmem:[%s4210_s6 + $0x34] sm:$0xf]  ;;  %v72_v11 = vld [vmem:[%s4210_s6 + $0x28] sm:$0xf] }
   0x8   :  { %69 = vst [vmem:[#allocation2 + $0x28] sm:$0xf] %v68_v9  ;;  %71 = vst [vmem:[#allocation2 + $0x2c] sm:$0xf] %v70_v10  ;;  %v74_v12 = vld [vmem:[%s4210_s6 + $0x38] sm:$0xf] }
   0x9   :  { %73 = vst [vmem:[#allocation2 + $0x30] sm:$0xf] %v72_v11  ;;  %v76_v13 = vld [vmem:[%s4210_s6 + $0x2c] sm:$0xf]  ;;  %75 = vst [vmem:[#allocation2 + $0x34] sm:$0xf] %v74_v12 }
   0xa   :  { %77 = vst [vmem:[#allocation2 + $0x38] sm:$0xf] %v76_v13  ;;  %79 = vst [vmem:[#allocation2 + $0x3c] sm:$0xff] %v78_v14   ;;  %v82_v15 = vld [vmem:[%s4210_s6 + $0x50] sm:$0xf]  ;;  %v94_v21 = vld [vmem:[%s4210_s6 + $0x5c] sm:$0xff]  }
   0xb   :  { %v84_v16 = vld [vmem:[%s4210_s6 + $0x44] sm:$0xf]  ;;  %v86_v17 = vld [vmem:[%s4210_s6 + $0x54] sm:$0xf]  ;;  %83 = vst [vmem:[#allocation2 + $0x44] sm:$0xf] %v82_v15 }
   0xc   :  { %85 = vst [vmem:[#allocation2 + $0x48] sm:$0xf] %v84_v16  ;;  %87 = vst [vmem:[#allocation2 + $0x4c] sm:$0xf] %v86_v17  ;;  %v88_v18 = vld [vmem:[%s4210_s6 + $0x48] sm:$0xf] }
   0xd   :  { %v90_v19 = vld [vmem:[%s4210_s6 + $0x58] sm:$0xf]  ;;  %v92_v20 = vld [vmem:[%s4210_s6 + $0x4c] sm:$0xf]  ;;  %89 = vst [vmem:[#allocation2 + $0x50] sm:$0xf] %v88_v18 }
   0xe   :  { %91 = vst [vmem:[#allocation2 + $0x54] sm:$0xf] %v90_v19  ;;  %93 = vst [vmem:[#allocation2 + $0x58] sm:$0xf] %v92_v20  ;;  %v98_v22 = vld [vmem:[%s4210_s6 + $0x70] sm:$0xf] }
   0xf   :  { %v100_v23 = vld [vmem:[%s4210_s6 + $0x64] sm:$0xf]  ;;  %95 = vst [vmem:[#allocation2 + $0x5c] sm:$0xff] %v94_v21   ;;  %99 = vst [vmem:[#allocation2 + $0x64] sm:$0xf] %v98_v22  ;;  %v110_v28 = vld [vmem:[%s4210_s6 + $0x7c] sm:$0xff]  }
  0x10   :  { %101 = vst [vmem:[#allocation2 + $0x68] sm:$0xf] %v100_v23  ;;  %v102_v24 = vld [vmem:[%s4210_s6 + $0x74] sm:$0xf]  ;;  %v104_v25 = vld [vmem:[%s4210_s6 + $0x68] sm:$0xf] }
  0x11   :  { %v106_v26 = vld [vmem:[%s4210_s6 + $0x78] sm:$0xf]  ;;  %103 = vst [vmem:[#allocation2 + $0x6c] sm:$0xf] %v102_v24  ;;  %105 = vst [vmem:[#allocation2 + $0x70] sm:$0xf] %v104_v25 }
  0x12   :  { %107 = vst [vmem:[#allocation2 + $0x74] sm:$0xf] %v106_v26  ;;  %v108_v27 = vld [vmem:[%s4210_s6 + $0x6c] sm:$0xf]  ;;  %v114_v29 = vld [vmem:[%s4210_s6 + $0x90] sm:$0xf] }
  0x13   :  { %109 = vst [vmem:[#allocation2 + $0x78] sm:$0xf] %v108_v27  ;;  %111 = vst [vmem:[#allocation2 + $0x7c] sm:$0xff] %v110_v28   ;;  %v116_v30 = vld [vmem:[%s4210_s6 + $0x84] sm:$0xf]  ;;  %v126_v35 = vld [vmem:[%s4210_s6 + $0x9c] sm:$0xff]  }
  0x14   :  { %115 = vst [vmem:[#allocation2 + $0x84] sm:$0xf] %v114_v29  ;;  %v118_v31 = vld [vmem:[%s4210_s6 + $0x94] sm:$0xf]  ;;  %v120_v32 = vld [vmem:[%s4210_s6 + $0x88] sm:$0xf] }
  0x15   :  { %117 = vst [vmem:[#allocation2 + $0x88] sm:$0xf] %v116_v30  ;;  %119 = vst [vmem:[#allocation2 + $0x8c] sm:$0xf] %v118_v31  ;;  %v122_v33 = vld [vmem:[%s4210_s6 + $0x98] sm:$0xf] }
  0x16   :  { %121 = vst [vmem:[#allocation2 + $0x90] sm:$0xf] %v120_v32  ;;  %v124_v34 = vld [vmem:[%s4210_s6 + $0x8c] sm:$0xf]  ;;  %123 = vst [vmem:[#allocation2 + $0x94] sm:$0xf] %v122_v33 }
  0x17   :  { %125 = vst [vmem:[#allocation2 + $0x98] sm:$0xf] %v124_v34  ;;  %127 = vst [vmem:[#allocation2 + $0x9c] sm:$0xff] %v126_v35   ;;  %v130_v36 = vld [vmem:[%s4210_s6 + $0xb0] sm:$0xf]  ;;  %v142_v42 = vld [vmem:[%s4210_s6 + $0xbc] sm:$0xff]  }
  0x18   :  { %v132_v37 = vld [vmem:[%s4210_s6 + $0xa4] sm:$0xf]  ;;  %v134_v38 = vld [vmem:[%s4210_s6 + $0xb4] sm:$0xf]  ;;  %131 = vst [vmem:[#allocation2 + $0xa4] sm:$0xf] %v130_v36 }
  0x19   :  { %133 = vst [vmem:[#allocation2 + $0xa8] sm:$0xf] %v132_v37  ;;  %135 = vst [vmem:[#allocation2 + $0xac] sm:$0xf] %v134_v38  ;;  %v136_v39 = vld [vmem:[%s4210_s6 + $0xa8] sm:$0xf] }
  0x1a   :  { %v138_v40 = vld [vmem:[%s4210_s6 + $0xb8] sm:$0xf]  ;;  %v140_v41 = vld [vmem:[%s4210_s6 + $0xac] sm:$0xf]  ;;  %137 = vst [vmem:[#allocation2 + $0xb0] sm:$0xf] %v136_v39 }
  0x1b   :  { %139 = vst [vmem:[#allocation2 + $0xb4] sm:$0xf] %v138_v40  ;;  %141 = vst [vmem:[#allocation2 + $0xb8] sm:$0xf] %v140_v41  ;;  %v146_v43 = vld [vmem:[%s4210_s6 + $0xd0] sm:$0xf] }
  0x1c   :  { %v148_v44 = vld [vmem:[%s4210_s6 + $0xc4] sm:$0xf]  ;;  %143 = vst [vmem:[#allocation2 + $0xbc] sm:$0xff] %v142_v42   ;;  %147 = vst [vmem:[#allocation2 + $0xc4] sm:$0xf] %v146_v43  ;;  %v158_v49 = vld [vmem:[%s4210_s6 + $0xdc] sm:$0xff]  }
  0x1d   :  { %149 = vst [vmem:[#allocation2 + $0xc8] sm:$0xf] %v148_v44  ;;  %v150_v45 = vld [vmem:[%s4210_s6 + $0xd4] sm:$0xf]  ;;  %v152_v46 = vld [vmem:[%s4210_s6 + $0xc8] sm:$0xf] }
  0x1e   :  { %v154_v47 = vld [vmem:[%s4210_s6 + $0xd8] sm:$0xf]  ;;  %151 = vst [vmem:[#allocation2 + $0xcc] sm:$0xf] %v150_v45  ;;  %153 = vst [vmem:[#allocation2 + $0xd0] sm:$0xf] %v152_v46 }
  0x1f   :  { %155 = vst [vmem:[#allocation2 + $0xd4] sm:$0xf] %v154_v47  ;;  %v156_v48 = vld [vmem:[%s4210_s6 + $0xcc] sm:$0xf]  ;;  %v162_v50 = vld [vmem:[%s4210_s6 + $0xf0] sm:$0xf] }
  0x20   :  { %157 = vst [vmem:[#allocation2 + $0xd8] sm:$0xf] %v156_v48  ;;  %159 = vst [vmem:[#allocation2 + $0xdc] sm:$0xff] %v158_v49   ;;  %v164_v51 = vld [vmem:[%s4210_s6 + $0xe4] sm:$0xf] }
  0x21   :  { %163 = vst [vmem:[#allocation2 + $0xe4] sm:$0xf] %v162_v50  ;;  %v166_v52 = vld [vmem:[%s4210_s6 + $0xf4] sm:$0xf]  ;;  %v168_v53 = vld [vmem:[%s4210_s6 + $0xe8] sm:$0xf] }
  0x22   :  { %165 = vst [vmem:[#allocation2 + $0xe8] sm:$0xf] %v164_v51  ;;  %167 = vst [vmem:[#allocation2 + $0xec] sm:$0xf] %v166_v52  ;;  %v170_v54 = vld [vmem:[%s4210_s6 + $0xf8] sm:$0xf] }
  0x23   :  { %169 = vst [vmem:[#allocation2 + $0xf0] sm:$0xf] %v168_v53  ;;  %v172_v55 = vld [vmem:[%s4210_s6 + $0xec] sm:$0xf]  ;;  %v174_v56 = vld [vmem:[%s4210_s6 + $0xfc] sm:$0xf] }
  0x24   :  { %171 = vst [vmem:[#allocation2 + $0xf4] sm:$0xf] %v170_v54  ;;  %173 = vst [vmem:[#allocation2 + $0xf8] sm:$0xf] %v172_v55 }
  0x25   :  { %175 = vst [vmem:[#allocation2 + $0xfc] sm:$0xf] %v174_v56 }
  0x26   :  { %334 = vsyncadd [#allocation6], 4096 }
  0x27   :  { %3029 = dma.done.wait [#allocation6], 4096 }
  0x28   :  { %3030 = vsyncadd [#allocation6], 4294963200  ;;  %v341_v57 = vld [vmem:[%s4206_s2 + $0x8] sm:$0xff]  ;;  %v343_v58 = vld [vmem:[%s4206_s2 + $0x18] sm:$0xff]  ;;  %vm366_vm0 = vcmask 64512   ;;  %v3031_v62 = vmov 0.0   ;;  %v346_v43 = vlaneseq }
  0x29   :  { %v340_v59 = vld [vmem:[%s4206_s2] sm:$0xff]  ;;  %370 = vmatprep.subr.mxu0 %v341_v57  ;;  %441 = vmatprep.subr.mxu1 %v343_v58  ;;  %v342_v60 = vld [vmem:[%s4206_s2 + $0x10] sm:$0xff]  ;;  %v3266_v63 = vld [vmem:[#allocation2 + $0x8] sm:$0xff]  ;;  %vm3032_vm1 = vmmov 0   ;;  %v3033_v9 = vmov 0   ;;  %v3034_v34 = vmov 0.0|0.0  }
  0x2a   :  { %v339_v61 = vld [vmem:[%s4204_s0] sm:$0xff]  ;;  %371 = vmatpush1.msra.mxu0 %v340_v59  ;;  %434 = vmatprep.mubr.f32.mxu0 %v3031_v62  ;;  %v3275_v2 = vld [vmem:[#allocation2 + $0x18] sm:$0xff]  ;;  %v3281_v4 = vld [vmem:[#allocation2 + $0x28] sm:$0xff]  ;;  %v347_v44 = vshrl.u32 %v346_v43, 7 }
  0x2b   :  { %442 = vmatpush1.msra.mxu1 %v342_v60  ;;  %505 = vmatprep.mubr.f32.mxu1 %v3031_v62  ;;  %v3268_v0 = vld [vmem:[#allocation2] sm:$0xff]  ;;  %v3284_v5 = vld [vmem:[#allocation2 + $0x10] sm:$0xff]  ;;  %v3289_v7 = vld [vmem:[#allocation2 + $0x38] sm:$0xff] }
  0x2c   :  { %v517_v1 = vld [vmem:[%s4208_s4] sm:$0xff]  ;;  %2567 = vmatmul.mubr.msk.f32.vlgmr.msra.gmra.mrb[0].mxu0 %vm366_vm0, %v339_v61  ;;  %2568 = vmatmul.mubr.msk.f32.vlgmr.msra.gmra.mrb[0].mxu1 %vm366_vm0, %v339_v61  ;;  %v3293_v8 = vld [vmem:[#allocation2 + $0x48] sm:$0xff]  ;;  %v3299_v10 = vld [vmem:[#allocation2 + $0x30] sm:$0xff]  ;;  %v348_v45 = vsub.s32 0, %v347_v44  ;;  %v352_v46 = vsub.s32 1, %v347_v44  ;;  %v360_v50 = vsub.s32 3, %v347_v44 }
  0x2d   :  { %641 = vmatprep.subr.bf16.mxu1 %v3266_v63  ;;  %2700 = vmatprep.subr.mxu0 %v3031_v62  ;;  %v516_v3 = vld [vmem:[%s4205_s1] sm:$0xff]  ;;  %v3304_v12 = vld [vmem:[#allocation2 + $0x58] sm:$0xff]  ;;  %v3307_v13 = vld [vmem:[#allocation2 + $0x68] sm:$0xff]  ;;  %v356_v59 = vsub.s32 2, %v347_v44 }
  0x2e   :  { %642 = vmatpush1.bf16.msra.mxu1 %v3268_v0  ;;  %2701 = vmatpush3.msra.mxu0 %v517_v1  ;;  %v3287_v6 = vld [vmem:[#allocation2 + $0x20] sm:$0xff]  ;;  %v3312_v14 = vld [vmem:[#allocation2 + $0x50] sm:$0xff]  ;;  %v3317_v16 = vld [vmem:[#allocation2 + $0x78] sm:$0xff] }
  0x2f   :  { %2702 = vmatprep.mubr.msk.f32.mxu0 %vm3032_vm1, %v3031_v62  ;;  %682 = vmatprep.subr.bf16.mxu0 %v3275_v2  ;;  %v3302_v11 = vld [vmem:[#allocation2 + $0x40] sm:$0xff]  ;;  %v3319_v17 = vld [vmem:[#allocation2 + $0x88] sm:$0xff]  ;;  %v3324_v18 = vld [vmem:[#allocation2 + $0x70] sm:$0xff] }
  0x30   :  { %2703 = vmatmul.mubr.msk.f32.vlgmr.msra.gmra.mrb[2].mxu0 %vm366_vm0, %v516_v3  ;;  %643 = vmatprep.subr.bf16.mxu1 %v3281_v4  ;;  %v3315_v15 = vld [vmem:[#allocation2 + $0x60] sm:$0xff]  ;;  %v3329_v20 = vld [vmem:[#allocation2 + $0x98] sm:$0xff]  ;;  %v3331_v21 = vld [vmem:[#allocation2 + $0xa8] sm:$0xff] }
  0x31   :  { %683 = vmatpush1.bf16.msra.mxu0 %v3284_v5  ;;  %673 = vmatprep.mubr.bf16.mxu1 %v3033_v9  ;;  %v3327_v19 = vld [vmem:[#allocation2 + $0x80] sm:$0xff]  ;;  %v3336_v22 = vld [vmem:[#allocation2 + $0x90] sm:$0xff]  ;;  %v3341_v24 = vld [vmem:[#allocation2 + $0xb8] sm:$0xff] }
  0x32   :  { %644 = vmatpush1.bf16.msra.mxu1 %v3287_v6  ;;  %684 = vmatprep.subr.bf16.mxu0 %v3289_v7  ;;  %v3339_v23 = vld [vmem:[#allocation2 + $0xa0] sm:$0xff]  ;;  %v3343_v25 = vld [vmem:[#allocation2 + $0xc8] sm:$0xff]  ;;  %v3348_v26 = vld [vmem:[#allocation2 + $0xb0] sm:$0xff] }
  0x33   :  { %645 = vmatprep.subr.bf16.mxu1 %v3293_v8  ;;  %714 = vmatprep.mubr.bf16.mxu0 %v3033_v9  ;;  %v3351_v27 = vld [vmem:[#allocation2 + $0xc0] sm:$0xff]  ;;  %v3353_v28 = vld [vmem:[#allocation2 + $0xd8] sm:$0xff]  ;;  %v3355_v29 = vld [vmem:[#allocation2 + $0xe8] sm:$0xff] }
  0x34   :  { %v3360_v30 = vld [vmem:[#allocation2 + $0xd0] sm:$0xff]  ;;  %v3363_v31 = vld [vmem:[#allocation2 + $0xe0] sm:$0xff]  ;;  %v3365_v32 = vld [vmem:[#allocation2 + $0xf8] sm:$0xff] }
  0x35   :  { %685 = vmatpush1.bf16.msra.mxu0 %v3299_v10  ;;  %v3370_v33 = vld [vmem:[#allocation2 + $0xf0] sm:$0xff]  ;;  %v2569_v39 = vld [vmem:[%s4209_s5] ss:$0 sm:$0xff] }
  0x36   :  { %646 = vmatpush1.bf16.msra.mxu1 %v3302_v11  ;;  %686 = vmatprep.subr.bf16.mxu0 %v3304_v12  ;;  %v344_v47 = vld [vmem:[%s4207_s3] sm:$0xf] }
  0x37   :  { %647 = vmatprep.subr.bf16.mxu1 %v3307_v13  ;;  %v349_v48 = vrot.slane %v344_v47, %v348_v45  ;;  %v353_v49 = vrot.slane %v344_v47, %v352_v46  ;;  %v361_v56 = vrot.slane %v344_v47, %v360_v50 }
  0x39   :  { %687 = vmatpush1.bf16.msra.mxu0 %v3312_v14 }
  0x3a   :  { %648 = vmatpush1.bf16.msra.mxu1 %v3315_v15  ;;  %688 = vmatprep.subr.bf16.mxu0 %v3317_v16 }
  0x3b   :  { %649 = vmatprep.subr.bf16.mxu1 %v3319_v17 }
  0x3d   :  { %689 = vmatpush1.bf16.msra.mxu0 %v3324_v18 }
  0x3e   :  { %650 = vmatpush1.bf16.msra.mxu1 %v3327_v19  ;;  %690 = vmatprep.subr.bf16.mxu0 %v3329_v20 }
  0x3f   :  { %651 = vmatprep.subr.bf16.mxu1 %v3331_v21 }
  0x41   :  { %691 = vmatpush1.bf16.msra.mxu0 %v3336_v22 }
  0x42   :  { %652 = vmatpush1.bf16.msra.mxu1 %v3339_v23  ;;  %692 = vmatprep.subr.bf16.mxu0 %v3341_v24 }
  0x43   :  { %653 = vmatprep.subr.bf16.mxu1 %v3343_v25 }
  0x45   :  { %693 = vmatpush1.bf16.msra.mxu0 %v3348_v26 }
  0x46   :  { %654 = vmatpush1.bf16.msra.mxu1 %v3351_v27  ;;  %694 = vmatprep.subr.bf16.mxu0 %v3353_v28 }
  0x47   :  { %655 = vmatprep.subr.bf16.mxu1 %v3355_v29 }
  0x49   :  { %695 = vmatpush1.bf16.msra.mxu0 %v3360_v30 }
  0x4a   :  { %656 = vmatpush1.bf16.msra.mxu1 %v3363_v31  ;;  %696 = vmatprep.subr.bf16.mxu0 %v3365_v32 }
  0x4b   :  { %753 = vmatprep.subr.bf16.mxu1 %v3266_v63 }
  0x4d   :  { %674 = vmatmul.mubr.bf16.vlgmr.msra.gmra.mrb[4].mxu1 %v3034_v34  ;;  %697 = vmatpush1.bf16.msra.mxu0 %v3370_v33 }
  0x4e   :  { %794 = vmatprep.subr.bf16.mxu0 %v3275_v2  ;;  %754 = vmatpush1.bf16.msra.mxu1 %v3268_v0 }
  0x4f   :  { %755 = vmatprep.subr.bf16.mxu1 %v3281_v4  ;;  %785 = vmatprep.mubr.bf16.mxu1 %v3033_v9 }
  0x50   :  { %715 = vmatmul.mubr.bf16.vlgmr.msra.gmra.mrb[4].mxu0 %v3034_v34 }
  0x51   :  { %795 = vmatpush1.bf16.msra.mxu0 %v3284_v5  ;;  %826 = vmatprep.mubr.bf16.mxu0 %v3033_v9 }
  0x52   :  { %796 = vmatprep.subr.bf16.mxu0 %v3289_v7  ;;  %756 = vmatpush1.bf16.msra.mxu1 %v3287_v6 }
  0x53   :  { %757 = vmatprep.subr.bf16.mxu1 %v3293_v8 }
  0x55   :  { %797 = vmatpush1.bf16.msra.mxu0 %v3299_v10 }
  0x56   :  { %798 = vmatprep.subr.bf16.mxu0 %v3304_v12  ;;  %758 = vmatpush1.bf16.msra.mxu1 %v3302_v11 }
  0x57   :  { %759 = vmatprep.subr.bf16.mxu1 %v3307_v13 }
  0x59   :  { %799 = vmatpush1.bf16.msra.mxu0 %v3312_v14 }
  0x5a   :  { %800 = vmatprep.subr.bf16.mxu0 %v3317_v16  ;;  %760 = vmatpush1.bf16.msra.mxu1 %v3315_v15 }
  0x5b   :  { %761 = vmatprep.subr.bf16.mxu1 %v3319_v17 }
  0x5d   :  { %801 = vmatpush1.bf16.msra.mxu0 %v3324_v18 }
  0x5e   :  { %802 = vmatprep.subr.bf16.mxu0 %v3329_v20  ;;  %762 = vmatpush1.bf16.msra.mxu1 %v3327_v19 }
  0x5f   :  { %763 = vmatprep.subr.bf16.mxu1 %v3331_v21 }
  0x61   :  { %803 = vmatpush1.bf16.msra.mxu0 %v3336_v22 }
  0x62   :  { %804 = vmatprep.subr.bf16.mxu0 %v3341_v24  ;;  %764 = vmatpush1.bf16.msra.mxu1 %v3339_v23 }
  0x63   :  { %765 = vmatprep.subr.bf16.mxu1 %v3343_v25 }
  0x65   :  { %805 = vmatpush1.bf16.msra.mxu0 %v3348_v26 }
  0x66   :  { %806 = vmatprep.subr.bf16.mxu0 %v3353_v28  ;;  %766 = vmatpush1.bf16.msra.mxu1 %v3351_v27 }
  0x67   :  { %767 = vmatprep.subr.bf16.mxu1 %v3355_v29 }
  0x69   :  { %807 = vmatpush1.bf16.msra.mxu0 %v3360_v30 }
  0x6a   :  { %808 = vmatprep.subr.bf16.mxu0 %v3365_v32  ;;  %768 = vmatpush1.bf16.msra.mxu1 %v3363_v31 }
  0x6b   :  { %866 = vmatprep.subr.bf16.mxu1 %v3266_v63 }
  0x6d   :  { %809 = vmatpush1.bf16.msra.mxu0 %v3370_v33 }
  0x6e   :  { %907 = vmatprep.subr.bf16.mxu0 %v3275_v2 }
  0xff   :  { %v507_v35 = vpop.f32.mrb[0].mxu1  ;;  %v436_v36 = vpop.f32.mrb[0].mxu0 }
 0x100   :  { %v509_v37 = vpop.f32.mrb[1].mxu1  ;;  %v438_v38 = vpop.f32.mrb[1].mxu0  ;;  %v3418_v51 = vadd.f32 %v436_v36, %v349_v48 }
 0x101   :  { %v3420_v52 = vadd.f32 %v438_v38, %v353_v49  ;;  %v3424_v36 = vadd.f32 %v509_v37, %v361_v56 }
 0x103   :  { %v594_v40 = vpop.f32.mrb[2].mxu0 }
 0x104   :  { %v595_v41 = vadd.f32 %v2569_v39, %v594_v40  ;;  %v2704_v42 = vpop.f32.mrb[3].mxu0  ;;  %v357_v39 = vrot.slane %v344_v47, %v356_v59 }
 0x106   :  { %598 = vst [vmem:[%s4212_s8] sm:$0xff] %v595_v41  ;;  %v3427_v41 = vadd.f32 %v507_v35, %v357_v39 }
 0x120   :  { %v675_v53 = vpop.f32.mrb[4].mxu1 }
 0x121   :  { %v723_v54 = vadd.f32 %v675_v53, %v3418_v51  ;;  %v677_v55 = vpop.f32.mrb[5].mxu1 }
 0x122   :  { %v724_v57 = vadd.f32 %v677_v55, %v3420_v52  ;;  %v679_v58 = vpop.f32.mrb[6].mxu1 }
 0x123   :  { %v2571_v60 = vmul.f32 -1.442695, %v723_v54  ;;  %v680_v61 = vpop.f32.mrb[7].mxu1  ;;  %v716_v62 = vpop.f32.mrb[4].mxu0 }
 0x124   :  { %v2572_v1 = vmul.f32 -1.442695, %v724_v57  ;;  %v718_v3 = vpop.f32.mrb[5].mxu0  ;;  %v725_v43 = vadd.f32 %v716_v62, %v3427_v41 }
 0x125   :  { %2709 = vpow2.f32 %v2571_v60  ;;  %v720_v34 = vpop.f32.mrb[6].mxu0  ;;  %v726_v40 = vadd.f32 %v718_v3, %v3424_v36 }
 0x126   :  { %2711 = vpow2.f32 %v2572_v1  ;;  %v721_v38 = vpop.f32.mrb[7].mxu0 }
 0x127   :  { %v2573_v42 = vmul.f32 -1.442695, %v726_v40 }
 0x129   :  { %2713 = vpow2.f32 %v2573_v42 }
 0x12a   :  { %2715 = vtanh.f32 %v725_v43 }
 0x12f   :  { %v2710_v44 = vpop.eup %2709 }
 0x130   :  { %v2712_v45 = vpop.eup %2711  ;;  %v730_v46 = vadd.f32 1.0, %v2710_v44 }
 0x131   :  { %v736_v48 = vadd.f32 1.0, %v2712_v45 }
 0x132   :  { %2717 = vrcp.f32 %v730_v46 }
 0x133   :  { %2719 = vrcp.f32 %v736_v48  ;;  %v2714_v37 = vpop.eup %2713 }
 0x134   :  { %v2716_v49 = vpop.eup %2715  ;;  %v743_v54 = vadd.f32 1.0, %v2714_v37 }
 0x136   :  { %2721 = vrcp.f32 %v743_v54 }
 0x13c   :  { %v2718_v50 = vpop.eup %2717 }
 0x13d   :  { %v2720_v53 = vpop.eup %2719  ;;  %v747_v47 = vmul.f32 %v2718_v50, %v2716_v49 }
 0x13e   :  { %v746_v55 = vmul.f32 0.0, %v2720_v53 }
 0x140   :  { %v3430_v35 = vadd.f32 %v747_v47, %v746_v55  ;;  %v2722_v56 = vpop.eup %2721 }
 0x142   :  { %2723 = vtanh.f32 %v3430_v35 }
 0x14c   :  { %v2724_v57 = vpop.eup %2723 }
 0x14d   :  { %v3433_v58 = vmul.f32 %v2724_v57, %v2722_v56 }
 0x14f   :  { %v752_v59 = vpack.c.bf16 %v3433_v58, %v3433_v58 }
 0x151   :  { %786 = vmatmul.mubr.bf16.vlgmr.msra.gmra.mrb[8].mxu1 %v752_v59  ;;  %827 = vmatmul.mubr.bf16.vlgmr.msra.gmra.mrb[8].mxu0 %v752_v59 }
 0x152   :  { %867 = vmatpush1.bf16.msra.mxu1 %v3268_v0  ;;  %908 = vmatpush1.bf16.msra.mxu0 %v3284_v5 }
 0x153   :  { %868 = vmatprep.subr.bf16.mxu1 %v3281_v4  ;;  %909 = vmatprep.subr.bf16.mxu0 %v3289_v7 }
 0x154   :  { %898 = vmatprep.mubr.bf16.mxu1 %v3033_v9  ;;  %939 = vmatprep.mubr.bf16.mxu0 %v3033_v9 }
 0x156   :  { %869 = vmatpush1.bf16.msra.mxu1 %v3287_v6  ;;  %910 = vmatpush1.bf16.msra.mxu0 %v3299_v10 }
 0x157   :  { %870 = vmatprep.subr.bf16.mxu1 %v3293_v8  ;;  %911 = vmatprep.subr.bf16.mxu0 %v3304_v12 }
 0x15a   :  { %871 = vmatpush1.bf16.msra.mxu1 %v3302_v11  ;;  %912 = vmatpush1.bf16.msra.mxu0 %v3312_v14 }
 0x15b   :  { %872 = vmatprep.subr.bf16.mxu1 %v3307_v13  ;;  %913 = vmatprep.subr.bf16.mxu0 %v3317_v16 }
 0x15e   :  { %873 = vmatpush1.bf16.msra.mxu1 %v3315_v15  ;;  %914 = vmatpush1.bf16.msra.mxu0 %v3324_v18 }
 0x15f   :  { %874 = vmatprep.subr.bf16.mxu1 %v3319_v17  ;;  %915 = vmatprep.subr.bf16.mxu0 %v3329_v20 }
 0x162   :  { %875 = vmatpush1.bf16.msra.mxu1 %v3327_v19  ;;  %916 = vmatpush1.bf16.msra.mxu0 %v3336_v22 }
 0x163   :  { %876 = vmatprep.subr.bf16.mxu1 %v3331_v21  ;;  %917 = vmatprep.subr.bf16.mxu0 %v3341_v24 }
 0x166   :  { %877 = vmatpush1.bf16.msra.mxu1 %v3339_v23  ;;  %918 = vmatpush1.bf16.msra.mxu0 %v3348_v26 }
 0x167   :  { %878 = vmatprep.subr.bf16.mxu1 %v3343_v25  ;;  %919 = vmatprep.subr.bf16.mxu0 %v3353_v28 }
 0x16a   :  { %879 = vmatpush1.bf16.msra.mxu1 %v3351_v27  ;;  %920 = vmatpush1.bf16.msra.mxu0 %v3360_v30 }
 0x16b   :  { %880 = vmatprep.subr.bf16.mxu1 %v3355_v29  ;;  %921 = vmatprep.subr.bf16.mxu0 %v3365_v32 }
 0x16e   :  { %881 = vmatpush1.bf16.msra.mxu1 %v3363_v31  ;;  %922 = vmatpush1.bf16.msra.mxu0 %v3370_v33 }
 0x16f   :  { %979 = vmatprep.subr.bf16.mxu1 %v3266_v63  ;;  %1020 = vmatprep.subr.bf16.mxu0 %v3275_v2 }
 0x224   :  { %v787_v60 = vpop.f32.mrb[8].mxu1  ;;  %v828_v61 = vpop.f32.mrb[8].mxu0 }
 0x225   :  { %v835_v62 = vadd.f32 %v787_v60, %v3418_v51  ;;  %v789_v1 = vpop.f32.mrb[9].mxu1  ;;  %v830_v3 = vpop.f32.mrb[9].mxu0  ;;  %v837_v48 = vadd.f32 %v828_v61, %v3427_v41 }
 0x226   :  { %v836_v34 = vadd.f32 %v789_v1, %v3420_v52  ;;  %v791_v38 = vpop.f32.mrb[10].mxu1  ;;  %v832_v39 = vpop.f32.mrb[10].mxu0  ;;  %v838_v45 = vadd.f32 %v830_v3, %v3424_v36 }
 0x227   :  { %v2574_v40 = vmul.f32 -1.442695, %v835_v62  ;;  %v792_v42 = vpop.f32.mrb[11].mxu1  ;;  %v833_v43 = vpop.f32.mrb[11].mxu0 }
 0x228   :  { %v2575_v44 = vmul.f32 -1.442695, %v836_v34  ;;  %v2576_v46 = vmul.f32 -1.442695, %v838_v45 }
 0x229   :  { %2725 = vpow2.f32 %v2574_v40 }
 0x22a   :  { %2727 = vpow2.f32 %v2575_v44 }
 0x22b   :  { %2729 = vpow2.f32 %v2576_v46 }
 0x22c   :  { %2731 = vtanh.f32 %v837_v48 }
 0x233   :  { %v2726_v37 = vpop.eup %2725 }
 0x234   :  { %v2728_v49 = vpop.eup %2727  ;;  %v842_v50 = vadd.f32 1.0, %v2726_v37 }
 0x235   :  { %v848_v53 = vadd.f32 1.0, %v2728_v49  ;;  %v2730_v47 = vpop.eup %2729 }
 0x236   :  { %2733 = vrcp.f32 %v842_v50  ;;  %v2732_v54 = vpop.eup %2731  ;;  %v855_v59 = vadd.f32 1.0, %v2730_v47 }
 0x237   :  { %2735 = vrcp.f32 %v848_v53 }
 0x238   :  { %2737 = vrcp.f32 %v855_v59 }
 0x240   :  { %v2734_v55 = vpop.eup %2733 }
 0x241   :  { %v2736_v56 = vpop.eup %2735  ;;  %v859_v57 = vmul.f32 %v2734_v55, %v2732_v54 }
 0x242   :  { %v858_v60 = vmul.f32 %v2736_v56, %v3430_v35  ;;  %v2738_v61 = vpop.eup %2737 }
 0x244   :  { %v3476_v62 = vadd.f32 %v859_v57, %v858_v60 }
 0x246   :  { %2739 = vtanh.f32 %v3476_v62 }
 0x250   :  { %v2740_v1 = vpop.eup %2739 }
 0x251   :  { %v862_v3 = vmul.f32 %v2740_v1, %v2738_v61 }
 0x253   :  { %v865_v34 = vpack.c.bf16 %v862_v3, %v862_v3  ;;  %v2654_v38 = vpack.c.bf16 %v862_v3, %v3433_v58 }
 0x255   :  { %899 = vmatmul.mubr.bf16.vlgmr.msra.gmra.mrb[12].mxu1 %v865_v34  ;;  %2655 = vst [vmem:[%s4211_s7] sm:$0xff] %v2654_v38   ;;  %940 = vmatmul.mubr.bf16.vlgmr.msra.gmra.mrb[12].mxu0 %v865_v34 }
 0x256   :  { %980 = vmatpush1.bf16.msra.mxu1 %v3268_v0  ;;  %1021 = vmatpush1.bf16.msra.mxu0 %v3284_v5 }
 0x257   :  { %981 = vmatprep.subr.bf16.mxu1 %v3281_v4  ;;  %1022 = vmatprep.subr.bf16.mxu0 %v3289_v7 }
 0x258   :  { %1011 = vmatprep.mubr.bf16.mxu1 %v3033_v9  ;;  %1052 = vmatprep.mubr.bf16.mxu0 %v3033_v9 }
 0x25a   :  { %982 = vmatpush1.bf16.msra.mxu1 %v3287_v6  ;;  %1023 = vmatpush1.bf16.msra.mxu0 %v3299_v10 }
 0x25b   :  { %983 = vmatprep.subr.bf16.mxu1 %v3293_v8  ;;  %1024 = vmatprep.subr.bf16.mxu0 %v3304_v12 }
 0x25e   :  { %984 = vmatpush1.bf16.msra.mxu1 %v3302_v11  ;;  %1025 = vmatpush1.bf16.msra.mxu0 %v3312_v14 }
 0x25f   :  { %985 = vmatprep.subr.bf16.mxu1 %v3307_v13  ;;  %1026 = vmatprep.subr.bf16.mxu0 %v3317_v16 }
 0x262   :  { %986 = vmatpush1.bf16.msra.mxu1 %v3315_v15  ;;  %1027 = vmatpush1.bf16.msra.mxu0 %v3324_v18 }
 0x263   :  { %987 = vmatprep.subr.bf16.mxu1 %v3319_v17  ;;  %1028 = vmatprep.subr.bf16.mxu0 %v3329_v20 }
 0x266   :  { %988 = vmatpush1.bf16.msra.mxu1 %v3327_v19  ;;  %1029 = vmatpush1.bf16.msra.mxu0 %v3336_v22 }
 0x267   :  { %989 = vmatprep.subr.bf16.mxu1 %v3331_v21  ;;  %1030 = vmatprep.subr.bf16.mxu0 %v3341_v24 }
 0x26a   :  { %990 = vmatpush1.bf16.msra.mxu1 %v3339_v23  ;;  %1031 = vmatpush1.bf16.msra.mxu0 %v3348_v26 }
 0x26b   :  { %991 = vmatprep.subr.bf16.mxu1 %v3343_v25  ;;  %1032 = vmatprep.subr.bf16.mxu0 %v3353_v28 }
 0x26e   :  { %992 = vmatpush1.bf16.msra.mxu1 %v3351_v27  ;;  %1033 = vmatpush1.bf16.msra.mxu0 %v3360_v30 }
 0x26f   :  { %993 = vmatprep.subr.bf16.mxu1 %v3355_v29  ;;  %1034 = vmatprep.subr.bf16.mxu0 %v3365_v32 }
 0x272   :  { %994 = vmatpush1.bf16.msra.mxu1 %v3363_v31  ;;  %1035 = vmatpush1.bf16.msra.mxu0 %v3370_v33 }
 0x273   :  { %1092 = vmatprep.subr.bf16.mxu1 %v3266_v63  ;;  %1133 = vmatprep.subr.bf16.mxu0 %v3275_v2 }
 0x328   :  { %v900_v35 = vpop.f32.mrb[12].mxu1  ;;  %v941_v58 = vpop.f32.mrb[12].mxu0 }
 0x329   :  { %v948_v39 = vadd.f32 %v900_v35, %v3418_v51  ;;  %v902_v40 = vpop.f32.mrb[13].mxu1  ;;  %v943_v42 = vpop.f32.mrb[13].mxu0  ;;  %v950_v47 = vadd.f32 %v941_v58, %v3427_v41 }
 0x32a   :  { %v949_v43 = vadd.f32 %v902_v40, %v3420_v52  ;;  %v904_v44 = vpop.f32.mrb[14].mxu1  ;;  %v945_v45 = vpop.f32.mrb[14].mxu0  ;;  %v951_v50 = vadd.f32 %v943_v42, %v3424_v36 }
 0x32b   :  { %v2577_v46 = vmul.f32 -1.442695, %v948_v39  ;;  %v905_v48 = vpop.f32.mrb[15].mxu1  ;;  %v946_v37 = vpop.f32.mrb[15].mxu0 }
 0x32c   :  { %v2578_v49 = vmul.f32 -1.442695, %v949_v43  ;;  %v2579_v53 = vmul.f32 -1.442695, %v951_v50 }
 0x32d   :  { %2741 = vpow2.f32 %v2577_v46 }
 0x32e   :  { %2743 = vpow2.f32 %v2578_v49 }
 0x32f   :  { %2745 = vpow2.f32 %v2579_v53 }
 0x330   :  { %2747 = vtanh.f32 %v950_v47 }
 0x337   :  { %v2742_v54 = vpop.eup %2741 }
 0x338   :  { %v2744_v55 = vpop.eup %2743  ;;  %v955_v56 = vadd.f32 1.0, %v2742_v54 }
 0x339   :  { %v961_v57 = vadd.f32 1.0, %v2744_v55  ;;  %v2746_v59 = vpop.eup %2745 }
 0x33a   :  { %2749 = vrcp.f32 %v955_v56  ;;  %v2748_v60 = vpop.eup %2747  ;;  %v968_v34 = vadd.f32 1.0, %v2746_v59 }
 0x33b   :  { %2751 = vrcp.f32 %v961_v57 }
 0x33c   :  { %2753 = vrcp.f32 %v968_v34 }
 0x344   :  { %v2750_v61 = vpop.eup %2749 }
 0x345   :  { %v2752_v1 = vpop.eup %2751  ;;  %v972_v3 = vmul.f32 %v2750_v61, %v2748_v60 }
 0x346   :  { %v971_v38 = vmul.f32 %v2752_v1, %v3476_v62  ;;  %v2754_v58 = vpop.eup %2753 }
 0x348   :  { %v3522_v35 = vadd.f32 %v972_v3, %v971_v38 }
 0x34a   :  { %2755 = vtanh.f32 %v3522_v35 }
 0x354   :  { %v2756_v39 = vpop.eup %2755 }
 0x355   :  { %v3525_v40 = vmul.f32 %v2756_v39, %v2754_v58 }
 0x357   :  { %v978_v42 = vpack.c.bf16 %v3525_v40, %v3525_v40 }
 0x359   :  { %1012 = vmatmul.mubr.bf16.vlgmr.msra.gmra.mrb[16].mxu1 %v978_v42  ;;  %1053 = vmatmul.mubr.bf16.vlgmr.msra.gmra.mrb[16].mxu0 %v978_v42 }
 0x35a   :  { %1093 = vmatpush1.bf16.msra.mxu1 %v3268_v0  ;;  %1134 = vmatpush1.bf16.msra.mxu0 %v3284_v5 }
 0x35b   :  { %1094 = vmatprep.subr.bf16.mxu1 %v3281_v4  ;;  %1135 = vmatprep.subr.bf16.mxu0 %v3289_v7 }
 0x35c   :  { %1124 = vmatprep.mubr.bf16.mxu1 %v3033_v9  ;;  %1165 = vmatprep.mubr.bf16.mxu0 %v3033_v9 }
 0x35e   :  { %1095 = vmatpush1.bf16.msra.mxu1 %v3287_v6  ;;  %1136 = vmatpush1.bf16.msra.mxu0 %v3299_v10 }
 0x35f   :  { %1096 = vmatprep.subr.bf16.mxu1 %v3293_v8  ;;  %1137 = vmatprep.subr.bf16.mxu0 %v3304_v12 }
 0x362   :  { %1097 = vmatpush1.bf16.msra.mxu1 %v3302_v11  ;;  %1138 = vmatpush1.bf16.msra.mxu0 %v3312_v14 }
 0x363   :  { %1098 = vmatprep.subr.bf16.mxu1 %v3307_v13  ;;  %1139 = vmatprep.subr.bf16.mxu0 %v3317_v16 }
 0x366   :  { %1099 = vmatpush1.bf16.msra.mxu1 %v3315_v15  ;;  %1140 = vmatpush1.bf16.msra.mxu0 %v3324_v18 }
 0x367   :  { %1100 = vmatprep.subr.bf16.mxu1 %v3319_v17  ;;  %1141 = vmatprep.subr.bf16.mxu0 %v3329_v20 }
 0x36a   :  { %1101 = vmatpush1.bf16.msra.mxu1 %v3327_v19  ;;  %1142 = vmatpush1.bf16.msra.mxu0 %v3336_v22 }
 0x36b   :  { %1102 = vmatprep.subr.bf16.mxu1 %v3331_v21  ;;  %1143 = vmatprep.subr.bf16.mxu0 %v3341_v24 }
 0x36e   :  { %1103 = vmatpush1.bf16.msra.mxu1 %v3339_v23  ;;  %1144 = vmatpush1.bf16.msra.mxu0 %v3348_v26 }
 0x36f   :  { %1104 = vmatprep.subr.bf16.mxu1 %v3343_v25  ;;  %1145 = vmatprep.subr.bf16.mxu0 %v3353_v28 }
 0x372   :  { %1105 = vmatpush1.bf16.msra.mxu1 %v3351_v27  ;;  %1146 = vmatpush1.bf16.msra.mxu0 %v3360_v30 }
 0x373   :  { %1106 = vmatprep.subr.bf16.mxu1 %v3355_v29  ;;  %1147 = vmatprep.subr.bf16.mxu0 %v3365_v32 }
 0x376   :  { %1107 = vmatpush1.bf16.msra.mxu1 %v3363_v31  ;;  %1148 = vmatpush1.bf16.msra.mxu0 %v3370_v33 }
 0x377   :  { %1205 = vmatprep.subr.bf16.mxu1 %v3266_v63  ;;  %1246 = vmatprep.subr.bf16.mxu0 %v3275_v2 }
 0x42c   :  { %v1013_v62 = vpop.f32.mrb[16].mxu1  ;;  %v1054_v43 = vpop.f32.mrb[16].mxu0 }
 0x42d   :  { %v1061_v44 = vadd.f32 %v1013_v62, %v3418_v51  ;;  %v1015_v45 = vpop.f32.mrb[17].mxu1  ;;  %v1056_v46 = vpop.f32.mrb[17].mxu0  ;;  %v1063_v57 = vadd.f32 %v1054_v43, %v3427_v41 }
 0x42e   :  { %v1062_v48 = vadd.f32 %v1015_v45, %v3420_v52  ;;  %v1017_v37 = vpop.f32.mrb[18].mxu1  ;;  %v1058_v49 = vpop.f32.mrb[18].mxu0  ;;  %v1064_v55 = vadd.f32 %v1056_v46, %v3424_v36 }
 0x42f   :  { %v2580_v50 = vmul.f32 -1.442695, %v1061_v44  ;;  %v1018_v53 = vpop.f32.mrb[19].mxu1  ;;  %v1059_v47 = vpop.f32.mrb[19].mxu0 }
 0x430   :  { %v2581_v54 = vmul.f32 -1.442695, %v1062_v48  ;;  %v2582_v56 = vmul.f32 -1.442695, %v1064_v55 }
 0x431   :  { %2757 = vpow2.f32 %v2580_v50 }
 0x432   :  { %2759 = vpow2.f32 %v2581_v54 }
 0x433   :  { %2761 = vpow2.f32 %v2582_v56 }
 0x434   :  { %2763 = vtanh.f32 %v1063_v57 }
 0x43b   :  { %v2758_v59 = vpop.eup %2757 }
 0x43c   :  { %v2760_v60 = vpop.eup %2759  ;;  %v1068_v61 = vadd.f32 1.0, %v2758_v59 }
 0x43d   :  { %v1074_v1 = vadd.f32 1.0, %v2760_v60  ;;  %v2762_v3 = vpop.eup %2761 }
 0x43e   :  { %2765 = vrcp.f32 %v1068_v61  ;;  %v2764_v34 = vpop.eup %2763  ;;  %v1081_v42 = vadd.f32 1.0, %v2762_v3 }
 0x43f   :  { %2767 = vrcp.f32 %v1074_v1 }
 0x440   :  { %2769 = vrcp.f32 %v1081_v42 }
 0x448   :  { %v2766_v38 = vpop.eup %2765 }
 0x449   :  { %v2768_v58 = vpop.eup %2767  ;;  %v1085_v39 = vmul.f32 %v2766_v38, %v2764_v34 }
 0x44a   :  { %v1084_v62 = vmul.f32 %v2768_v58, %v3522_v35  ;;  %v2770_v43 = vpop.eup %2769 }
 0x44c   :  { %v3568_v44 = vadd.f32 %v1085_v39, %v1084_v62 }
 0x44e   :  { %2771 = vtanh.f32 %v3568_v44 }
 0x458   :  { %v2772_v45 = vpop.eup %2771 }
 0x459   :  { %v1088_v46 = vmul.f32 %v2772_v45, %v2770_v43 }
 0x45b   :  { %v1091_v48 = vpack.c.bf16 %v1088_v46, %v1088_v46  ;;  %v2659_v37 = vpack.c.bf16 %v1088_v46, %v3525_v40 }
 0x45d   :  { %1125 = vmatmul.mubr.bf16.vlgmr.msra.gmra.mrb[20].mxu1 %v1091_v48  ;;  %2691 = vst [vmem:[%s4211_s7 + $0x8] sm:$0xff] %v2659_v37   ;;  %1166 = vmatmul.mubr.bf16.vlgmr.msra.gmra.mrb[20].mxu0 %v1091_v48 }
 0x45e   :  { %1206 = vmatpush1.bf16.msra.mxu1 %v3268_v0  ;;  %1247 = vmatpush1.bf16.msra.mxu0 %v3284_v5 }
 0x45f   :  { %1207 = vmatprep.subr.bf16.mxu1 %v3281_v4  ;;  %1248 = vmatprep.subr.bf16.mxu0 %v3289_v7 }
 0x460   :  { %1237 = vmatprep.mubr.bf16.mxu1 %v3033_v9  ;;  %1278 = vmatprep.mubr.bf16.mxu0 %v3033_v9 }
 0x462   :  { %1208 = vmatpush1.bf16.msra.mxu1 %v3287_v6  ;;  %1249 = vmatpush1.bf16.msra.mxu0 %v3299_v10 }
 0x463   :  { %1209 = vmatprep.subr.bf16.mxu1 %v3293_v8  ;;  %1250 = vmatprep.subr.bf16.mxu0 %v3304_v12 }
 0x466   :  { %1210 = vmatpush1.bf16.msra.mxu1 %v3302_v11  ;;  %1251 = vmatpush1.bf16.msra.mxu0 %v3312_v14 }
 0x467   :  { %1211 = vmatprep.subr.bf16.mxu1 %v3307_v13  ;;  %1252 = vmatprep.subr.bf16.mxu0 %v3317_v16 }
 0x46a   :  { %1212 = vmatpush1.bf16.msra.mxu1 %v3315_v15  ;;  %1253 = vmatpush1.bf16.msra.mxu0 %v3324_v18 }
 0x46b   :  { %1213 = vmatprep.subr.bf16.mxu1 %v3319_v17  ;;  %1254 = vmatprep.subr.bf16.mxu0 %v3329_v20 }
 0x46e   :  { %1214 = vmatpush1.bf16.msra.mxu1 %v3327_v19  ;;  %1255 = vmatpush1.bf16.msra.mxu0 %v3336_v22 }
 0x46f   :  { %1215 = vmatprep.subr.bf16.mxu1 %v3331_v21  ;;  %1256 = vmatprep.subr.bf16.mxu0 %v3341_v24 }
 0x472   :  { %1216 = vmatpush1.bf16.msra.mxu1 %v3339_v23  ;;  %1257 = vmatpush1.bf16.msra.mxu0 %v3348_v26 }
 0x473   :  { %1217 = vmatprep.subr.bf16.mxu1 %v3343_v25  ;;  %1258 = vmatprep.subr.bf16.mxu0 %v3353_v28 }
 0x476   :  { %1218 = vmatpush1.bf16.msra.mxu1 %v3351_v27  ;;  %1259 = vmatpush1.bf16.msra.mxu0 %v3360_v30 }
 0x477   :  { %1219 = vmatprep.subr.bf16.mxu1 %v3355_v29  ;;  %1260 = vmatprep.subr.bf16.mxu0 %v3365_v32 }
 0x47a   :  { %1220 = vmatpush1.bf16.msra.mxu1 %v3363_v31  ;;  %1261 = vmatpush1.bf16.msra.mxu0 %v3370_v33 }
 0x47b   :  { %1318 = vmatprep.subr.bf16.mxu1 %v3266_v63  ;;  %1359 = vmatprep.subr.bf16.mxu0 %v3275_v2 }
 0x530   :  { %v1126_v35 = vpop.f32.mrb[20].mxu1  ;;  %v1167_v40 = vpop.f32.mrb[20].mxu0 }
 0x531   :  { %v1174_v49 = vadd.f32 %v1126_v35, %v3418_v51  ;;  %v1128_v50 = vpop.f32.mrb[21].mxu1  ;;  %v1169_v53 = vpop.f32.mrb[21].mxu0  ;;  %v1176_v1 = vadd.f32 %v1167_v40, %v3427_v41 }
 0x532   :  { %v1175_v47 = vadd.f32 %v1128_v50, %v3420_v52  ;;  %v1130_v54 = vpop.f32.mrb[22].mxu1  ;;  %v1171_v55 = vpop.f32.mrb[22].mxu0  ;;  %v1177_v63 = vadd.f32 %v1169_v53, %v3424_v36 }
 0x533   :  { %v2583_v56 = vmul.f32 -1.442695, %v1174_v49  ;;  %v1131_v57 = vpop.f32.mrb[23].mxu1  ;;  %v1172_v59 = vpop.f32.mrb[23].mxu0  ;;  %v3672_v54 = vld [vmem:[#allocation2 + $0x10] sm:$0xff]  ;;  %v3675_v55 = vld [vmem:[#allocation2 + $0x28] sm:$0xff] }
 0x534   :  { %v2584_v60 = vmul.f32 -1.442695, %v1175_v47  ;;  %v2585_v61 = vmul.f32 -1.442695, %v1177_v63  ;;  %v3669_v47 = vld [vmem:[#allocation2] sm:$0xff]  ;;  %v3686_v59 = vld [vmem:[#allocation2 + $0x30] sm:$0xff] }
 0x535   :  { %2773 = vpow2.f32 %v2583_v56  ;;  %v3678_v56 = vld [vmem:[#allocation2 + $0x38] sm:$0xff]  ;;  %v3683_v57 = vld [vmem:[#allocation2 + $0x20] sm:$0xff] }
 0x536   :  { %2775 = vpow2.f32 %v2584_v60  ;;  %v3689_v60 = vld [vmem:[#allocation2 + $0x48] sm:$0xff]  ;;  %v3692_v63 = vld [vmem:[#allocation2 + $0x58] sm:$0xff] }
 0x537   :  { %2777 = vpow2.f32 %v2585_v61  ;;  %v3695_v61 = vld [vmem:[#allocation2 + $0x40] sm:$0xff] }
 0x538   :  { %2779 = vtanh.f32 %v1176_v1  ;;  %v3698_v1 = vld [vmem:[#allocation2 + $0x50] sm:$0xff] }
 0x53f   :  { %v2774_v3 = vpop.eup %2773 }
 0x540   :  { %v2776_v34 = vpop.eup %2775  ;;  %v1181_v38 = vadd.f32 1.0, %v2774_v3  ;;  %v3701_v3 = vld [vmem:[#allocation2 + $0x68] sm:$0xff] }
 0x541   :  { %v1187_v58 = vadd.f32 1.0, %v2776_v34  ;;  %v2778_v39 = vpop.eup %2777  ;;  %v3704_v34 = vld [vmem:[#allocation2 + $0x78] sm:$0xff] }
 0x542   :  { %2781 = vrcp.f32 %v1181_v38  ;;  %v2780_v42 = vpop.eup %2779  ;;  %v1194_v46 = vadd.f32 1.0, %v2778_v39  ;;  %v3707_v38 = vld [vmem:[#allocation2 + $0x60] sm:$0xff]  ;;  %v3713_v39 = vld [vmem:[#allocation2 + $0x88] sm:$0xff] }
 0x543   :  { %2783 = vrcp.f32 %v1187_v58  ;;  %v3710_v58 = vld [vmem:[#allocation2 + $0x70] sm:$0xff] }
 0x544   :  { %2785 = vrcp.f32 %v1194_v46  ;;  %v3728_v46 = vld [vmem:[#allocation2 + $0xb8] sm:$0xff] }
 0x54c   :  { %v2782_v62 = vpop.eup %2781 }
 0x54d   :  { %v2784_v43 = vpop.eup %2783  ;;  %v1198_v45 = vmul.f32 %v2782_v62, %v2780_v42  ;;  %v3716_v42 = vld [vmem:[#allocation2 + $0x98] sm:$0xff]  ;;  %v3719_v62 = vld [vmem:[#allocation2 + $0x80] sm:$0xff] }
 0x54e   :  { %v1197_v48 = vmul.f32 %v2784_v43, %v3568_v44  ;;  %v2786_v35 = vpop.eup %2785  ;;  %v3722_v43 = vld [vmem:[#allocation2 + $0x90] sm:$0xff] }
 0x550   :  { %v3614_v37 = vadd.f32 %v1198_v45, %v1197_v48  ;;  %v3725_v45 = vld [vmem:[#allocation2 + $0xa8] sm:$0xff]  ;;  %v3731_v48 = vld [vmem:[#allocation2 + $0xa0] sm:$0xff] }
 0x552   :  { %2787 = vtanh.f32 %v3614_v37 }
 0x55c   :  { %v2788_v40 = vpop.eup %2787 }
 0x55d   :  { %v3617_v49 = vmul.f32 %v2788_v40, %v2786_v35  ;;  %v3737_v35 = vld [vmem:[#allocation2 + $0xc8] sm:$0xff]  ;;  %v3740_v40 = vld [vmem:[#allocation2 + $0xd8] sm:$0xff] }
 0x55f   :  { %v1204_v50 = vpack.c.bf16 %v3617_v49, %v3617_v49 }
 0x561   :  { %1238 = vmatmul.mubr.bf16.vlgmr.msra.gmra.mrb[24].mxu1 %v1204_v50  ;;  %1279 = vmatmul.mubr.bf16.vlgmr.msra.gmra.mrb[24].mxu0 %v1204_v50  ;;  %v3746_v50 = vld [vmem:[#allocation2 + $0xd0] sm:$0xff] }
 0x562   :  { %1319 = vmatpush1.bf16.msra.mxu1 %v3268_v0  ;;  %1360 = vmatpush1.bf16.msra.mxu0 %v3284_v5  ;;  %v3653_v0 = vld [vmem:[#allocation2 + $0x8] sm:$0xff] }
 0x563   :  { %1320 = vmatprep.subr.bf16.mxu1 %v3281_v4  ;;  %1361 = vmatprep.subr.bf16.mxu0 %v3289_v7 }
 0x564   :  { %1350 = vmatprep.mubr.bf16.mxu1 %v3033_v9  ;;  %1391 = vmatprep.mubr.bf16.mxu0 %v3033_v9 }
 0x566   :  { %1321 = vmatpush1.bf16.msra.mxu1 %v3287_v6  ;;  %1362 = vmatpush1.bf16.msra.mxu0 %v3299_v10 }
 0x567   :  { %1322 = vmatprep.subr.bf16.mxu1 %v3293_v8  ;;  %1363 = vmatprep.subr.bf16.mxu0 %v3304_v12 }
 0x56a   :  { %1323 = vmatpush1.bf16.msra.mxu1 %v3302_v11  ;;  %1364 = vmatpush1.bf16.msra.mxu0 %v3312_v14 }
 0x56b   :  { %1324 = vmatprep.subr.bf16.mxu1 %v3307_v13  ;;  %1365 = vmatprep.subr.bf16.mxu0 %v3317_v16 }
 0x56e   :  { %1325 = vmatpush1.bf16.msra.mxu1 %v3315_v15  ;;  %1366 = vmatpush1.bf16.msra.mxu0 %v3324_v18 }
 0x56f   :  { %1326 = vmatprep.subr.bf16.mxu1 %v3319_v17  ;;  %1367 = vmatprep.subr.bf16.mxu0 %v3329_v20 }
 0x572   :  { %1327 = vmatpush1.bf16.msra.mxu1 %v3327_v19  ;;  %1368 = vmatpush1.bf16.msra.mxu0 %v3336_v22 }
 0x573   :  { %1328 = vmatprep.subr.bf16.mxu1 %v3331_v21  ;;  %1369 = vmatprep.subr.bf16.mxu0 %v3341_v24 }
 0x576   :  { %1329 = vmatpush1.bf16.msra.mxu1 %v3339_v23  ;;  %1370 = vmatpush1.bf16.msra.mxu0 %v3348_v26 }
 0x577   :  { %1330 = vmatprep.subr.bf16.mxu1 %v3343_v25  ;;  %1371 = vmatprep.subr.bf16.mxu0 %v3353_v28 }
 0x57a   :  { %1331 = vmatpush1.bf16.msra.mxu1 %v3351_v27  ;;  %1372 = vmatpush1.bf16.msra.mxu0 %v3360_v30 }
 0x57b   :  { %1332 = vmatprep.subr.bf16.mxu1 %v3355_v29  ;;  %1373 = vmatprep.subr.bf16.mxu0 %v3365_v32 }
 0x57e   :  { %1333 = vmatpush1.bf16.msra.mxu1 %v3363_v31  ;;  %1374 = vmatpush1.bf16.msra.mxu0 %v3370_v33 }
 0x57f   :  { %1431 = vmatprep.subr.bf16.mxu1 %v3653_v0  ;;  %1472 = vmatprep.subr.bf16.mxu0 %v3275_v2 }
 0x634   :  { %v1239_v4 = vpop.f32.mrb[24].mxu1  ;;  %v1280_v5 = vpop.f32.mrb[24].mxu0 }
 0x635   :  { %v1287_v6 = vadd.f32 %v1239_v4, %v3418_v51  ;;  %v1241_v7 = vpop.f32.mrb[25].mxu1  ;;  %v1282_v8 = vpop.f32.mrb[25].mxu0  ;;  %v1289_v2 = vadd.f32 %v1280_v5, %v3427_v41  ;;  %v3749_v4 = vld [vmem:[#allocation2 + $0xe8] sm:$0xff]  ;;  %v3752_v5 = vld [vmem:[#allocation2 + $0xf8] sm:$0xff] }
 0x636   :  { %v1288_v10 = vadd.f32 %v1241_v7, %v3420_v52  ;;  %v1243_v11 = vpop.f32.mrb[26].mxu1  ;;  %v1284_v12 = vpop.f32.mrb[26].mxu0  ;;  %v1290_v17 = vadd.f32 %v1282_v8, %v3424_v36  ;;  %v3758_v7 = vld [vmem:[#allocation2 + $0xf0] sm:$0xff]  ;;  %v3762_v8 = vld [vmem:[#allocation2 + $0x18] sm:$0xff] }
 0x637   :  { %v2586_v13 = vmul.f32 -1.442695, %v1287_v6  ;;  %v1244_v14 = vpop.f32.mrb[27].mxu1  ;;  %v1285_v15 = vpop.f32.mrb[27].mxu0  ;;  %v3755_v6 = vld [vmem:[#allocation2 + $0xe0] sm:$0xff] }
 0x638   :  { %v2587_v16 = vmul.f32 -1.442695, %v1288_v10  ;;  %v2588_v18 = vmul.f32 -1.442695, %v1290_v17 }
 0x639   :  { %2789 = vpow2.f32 %v2586_v13 }
 0x63a   :  { %2791 = vpow2.f32 %v2587_v16 }
 0x63b   :  { %2793 = vpow2.f32 %v2588_v18 }
 0x63c   :  { %2795 = vtanh.f32 %v1289_v2 }
 0x643   :  { %v2790_v19 = vpop.eup %2789 }
 0x644   :  { %v2792_v20 = vpop.eup %2791  ;;  %v1294_v21 = vadd.f32 1.0, %v2790_v19 }
 0x645   :  { %v1300_v22 = vadd.f32 1.0, %v2792_v20  ;;  %v2794_v23 = vpop.eup %2793 }
 0x646   :  { %2797 = vrcp.f32 %v1294_v21  ;;  %v2796_v24 = vpop.eup %2795  ;;  %v1307_v28 = vadd.f32 1.0, %v2794_v23 }
 0x647   :  { %2799 = vrcp.f32 %v1300_v22 }
 0x648   :  { %2801 = vrcp.f32 %v1307_v28 }
 0x650   :  { %v2798_v25 = vpop.eup %2797 }
 0x651   :  { %v2800_v26 = vpop.eup %2799  ;;  %v1311_v27 = vmul.f32 %v2798_v25, %v2796_v24 }
 0x652   :  { %v1310_v29 = vmul.f32 %v2800_v26, %v3614_v37  ;;  %v2802_v31 = vpop.eup %2801  ;;  %v3734_v37 = vld [vmem:[#allocation2 + $0xb0] sm:$0xff] }
 0x654   :  { %v3662_v30 = vadd.f32 %v1311_v27, %v1310_v29 }
 0x656   :  { %2803 = vtanh.f32 %v3662_v30 }
 0x660   :  { %v2804_v32 = vpop.eup %2803 }
 0x661   :  { %v1314_v33 = vmul.f32 %v2804_v32, %v2802_v31 }
 0x663   :  { %v1317_v44 = vpack.c.bf16 %v1314_v33, %v1314_v33  ;;  %v2664_v53 = vpack.c.bf16 %v1314_v33, %v3617_v49  ;;  %v3743_v49 = vld [vmem:[#allocation2 + $0xc0] sm:$0xff] }
 0x665   :  { %1351 = vmatmul.mubr.bf16.vlgmr.msra.gmra.mrb[28].mxu1 %v1317_v44  ;;  %2692 = vst [vmem:[%s4211_s7 + $0x10] sm:$0xff] %v2664_v53   ;;  %1392 = vmatmul.mubr.bf16.vlgmr.msra.gmra.mrb[28].mxu0 %v1317_v44 }
 0x666   :  { %1432 = vmatpush1.bf16.msra.mxu1 %v3669_v47  ;;  %1473 = vmatpush1.bf16.msra.mxu0 %v3672_v54 }
 0x667   :  { %1433 = vmatprep.subr.bf16.mxu1 %v3675_v55  ;;  %1474 = vmatprep.subr.bf16.mxu0 %v3678_v56 }
 0x668   :  { %1463 = vmatprep.mubr.bf16.mxu1 %v3033_v9  ;;  %1504 = vmatprep.mubr.bf16.mxu0 %v3033_v9 }
 0x66a   :  { %1434 = vmatpush1.bf16.msra.mxu1 %v3683_v57  ;;  %1475 = vmatpush1.bf16.msra.mxu0 %v3686_v59 }
 0x66b   :  { %1435 = vmatprep.subr.bf16.mxu1 %v3689_v60  ;;  %1476 = vmatprep.subr.bf16.mxu0 %v3692_v63 }
 0x66e   :  { %1436 = vmatpush1.bf16.msra.mxu1 %v3695_v61  ;;  %1477 = vmatpush1.bf16.msra.mxu0 %v3698_v1 }
 0x66f   :  { %1437 = vmatprep.subr.bf16.mxu1 %v3701_v3  ;;  %1478 = vmatprep.subr.bf16.mxu0 %v3704_v34 }
 0x672   :  { %1438 = vmatpush1.bf16.msra.mxu1 %v3707_v38  ;;  %1479 = vmatpush1.bf16.msra.mxu0 %v3710_v58 }
 0x673   :  { %1439 = vmatprep.subr.bf16.mxu1 %v3713_v39  ;;  %1480 = vmatprep.subr.bf16.mxu0 %v3716_v42 }
 0x676   :  { %1440 = vmatpush1.bf16.msra.mxu1 %v3719_v62  ;;  %1481 = vmatpush1.bf16.msra.mxu0 %v3722_v43 }
 0x677   :  { %1441 = vmatprep.subr.bf16.mxu1 %v3725_v45  ;;  %1482 = vmatprep.subr.bf16.mxu0 %v3728_v46 }
 0x67a   :  { %1442 = vmatpush1.bf16.msra.mxu1 %v3731_v48  ;;  %1483 = vmatpush1.bf16.msra.mxu0 %v3734_v37 }
 0x67b   :  { %1443 = vmatprep.subr.bf16.mxu1 %v3737_v35  ;;  %1484 = vmatprep.subr.bf16.mxu0 %v3740_v40 }
 0x67e   :  { %1444 = vmatpush1.bf16.msra.mxu1 %v3743_v49  ;;  %1485 = vmatpush1.bf16.msra.mxu0 %v3746_v50 }
 0x67f   :  { %1445 = vmatprep.subr.bf16.mxu1 %v3749_v4  ;;  %1486 = vmatprep.subr.bf16.mxu0 %v3752_v5 }
 0x682   :  { %1446 = vmatpush1.bf16.msra.mxu1 %v3755_v6  ;;  %1487 = vmatpush1.bf16.msra.mxu0 %v3758_v7 }
 0x683   :  { %1544 = vmatprep.subr.bf16.mxu1 %v3653_v0  ;;  %1585 = vmatprep.subr.bf16.mxu0 %v3762_v8 }
 0x738   :  { %v1352_v10 = vpop.f32.mrb[28].mxu1  ;;  %v1393_v11 = vpop.f32.mrb[28].mxu0 }
 0x739   :  { %v1400_v12 = vadd.f32 %v1352_v10, %v3418_v51  ;;  %v1354_v13 = vpop.f32.mrb[29].mxu1  ;;  %v1395_v14 = vpop.f32.mrb[29].mxu0  ;;  %v1402_v23 = vadd.f32 %v1393_v11, %v3427_v41 }
 0x73a   :  { %v1401_v15 = vadd.f32 %v1354_v13, %v3420_v52  ;;  %v1356_v16 = vpop.f32.mrb[30].mxu1  ;;  %v1397_v17 = vpop.f32.mrb[30].mxu0  ;;  %v1403_v21 = vadd.f32 %v1395_v14, %v3424_v36 }
 0x73b   :  { %v2589_v18 = vmul.f32 -1.442695, %v1400_v12  ;;  %v1357_v2 = vpop.f32.mrb[31].mxu1  ;;  %v1398_v19 = vpop.f32.mrb[31].mxu0 }
 0x73c   :  { %v2590_v20 = vmul.f32 -1.442695, %v1401_v15  ;;  %v2591_v22 = vmul.f32 -1.442695, %v1403_v21 }
 0x73d   :  { %2805 = vpow2.f32 %v2589_v18 }
 0x73e   :  { %2807 = vpow2.f32 %v2590_v20 }
 0x73f   :  { %2809 = vpow2.f32 %v2591_v22 }
 0x740   :  { %2811 = vtanh.f32 %v1402_v23 }
 0x747   :  { %v2806_v24 = vpop.eup %2805 }
 0x748   :  { %v2808_v25 = vpop.eup %2807  ;;  %v1407_v26 = vadd.f32 1.0, %v2806_v24 }
 0x749   :  { %v1413_v27 = vadd.f32 1.0, %v2808_v25  ;;  %v2810_v28 = vpop.eup %2809 }
 0x74a   :  { %2813 = vrcp.f32 %v1407_v26  ;;  %v2812_v29 = vpop.eup %2811  ;;  %v1420_v44 = vadd.f32 1.0, %v2810_v28 }
 0x74b   :  { %2815 = vrcp.f32 %v1413_v27 }
 0x74c   :  { %2817 = vrcp.f32 %v1420_v44 }
 0x754   :  { %v2814_v31 = vpop.eup %2813 }
 0x755   :  { %v2816_v32 = vpop.eup %2815  ;;  %v1424_v33 = vmul.f32 %v2814_v31, %v2812_v29 }
 0x756   :  { %v1423_v53 = vmul.f32 %v2816_v32, %v3662_v30  ;;  %v2818_v11 = vpop.eup %2817 }
 0x758   :  { %v3770_v10 = vadd.f32 %v1424_v33, %v1423_v53 }
 0x75a   :  { %2819 = vtanh.f32 %v3770_v10 }
 0x764   :  { %v2820_v12 = vpop.eup %2819 }
 0x765   :  { %v3773_v13 = vmul.f32 %v2820_v12, %v2818_v11 }
 0x767   :  { %v1430_v14 = vpack.c.bf16 %v3773_v13, %v3773_v13 }
 0x769   :  { %1464 = vmatmul.mubr.bf16.vlgmr.msra.gmra.mrb[32].mxu1 %v1430_v14  ;;  %1505 = vmatmul.mubr.bf16.vlgmr.msra.gmra.mrb[32].mxu0 %v1430_v14 }
 0x76a   :  { %1545 = vmatpush1.bf16.msra.mxu1 %v3669_v47  ;;  %1586 = vmatpush1.bf16.msra.mxu0 %v3672_v54 }
 0x76b   :  { %1546 = vmatprep.subr.bf16.mxu1 %v3675_v55  ;;  %1587 = vmatprep.subr.bf16.mxu0 %v3678_v56 }
 0x76c   :  { %1576 = vmatprep.mubr.bf16.mxu1 %v3033_v9  ;;  %1617 = vmatprep.mubr.bf16.mxu0 %v3033_v9 }
 0x76e   :  { %1547 = vmatpush1.bf16.msra.mxu1 %v3683_v57  ;;  %1588 = vmatpush1.bf16.msra.mxu0 %v3686_v59 }
 0x76f   :  { %1548 = vmatprep.subr.bf16.mxu1 %v3689_v60  ;;  %1589 = vmatprep.subr.bf16.mxu0 %v3692_v63 }
 0x772   :  { %1549 = vmatpush1.bf16.msra.mxu1 %v3695_v61  ;;  %1590 = vmatpush1.bf16.msra.mxu0 %v3698_v1 }
 0x773   :  { %1550 = vmatprep.subr.bf16.mxu1 %v3701_v3  ;;  %1591 = vmatprep.subr.bf16.mxu0 %v3704_v34 }
 0x776   :  { %1551 = vmatpush1.bf16.msra.mxu1 %v3707_v38  ;;  %1592 = vmatpush1.bf16.msra.mxu0 %v3710_v58 }
 0x777   :  { %1552 = vmatprep.subr.bf16.mxu1 %v3713_v39  ;;  %1593 = vmatprep.subr.bf16.mxu0 %v3716_v42 }
 0x77a   :  { %1553 = vmatpush1.bf16.msra.mxu1 %v3719_v62  ;;  %1594 = vmatpush1.bf16.msra.mxu0 %v3722_v43 }
 0x77b   :  { %1554 = vmatprep.subr.bf16.mxu1 %v3725_v45  ;;  %1595 = vmatprep.subr.bf16.mxu0 %v3728_v46 }
 0x77e   :  { %1555 = vmatpush1.bf16.msra.mxu1 %v3731_v48  ;;  %1596 = vmatpush1.bf16.msra.mxu0 %v3734_v37 }
 0x77f   :  { %1556 = vmatprep.subr.bf16.mxu1 %v3737_v35  ;;  %1597 = vmatprep.subr.bf16.mxu0 %v3740_v40 }
 0x782   :  { %1557 = vmatpush1.bf16.msra.mxu1 %v3743_v49  ;;  %1598 = vmatpush1.bf16.msra.mxu0 %v3746_v50 }
 0x783   :  { %1558 = vmatprep.subr.bf16.mxu1 %v3749_v4  ;;  %1599 = vmatprep.subr.bf16.mxu0 %v3752_v5 }
 0x786   :  { %1559 = vmatpush1.bf16.msra.mxu1 %v3755_v6  ;;  %1600 = vmatpush1.bf16.msra.mxu0 %v3758_v7 }
 0x787   :  { %1657 = vmatprep.subr.bf16.mxu1 %v3653_v0  ;;  %1698 = vmatprep.subr.bf16.mxu0 %v3762_v8 }
 0x83c   :  { %v1465_v30 = vpop.f32.mrb[32].mxu1  ;;  %v1506_v15 = vpop.f32.mrb[32].mxu0 }
 0x83d   :  { %v1513_v16 = vadd.f32 %v1465_v30, %v3418_v51  ;;  %v1467_v17 = vpop.f32.mrb[33].mxu1  ;;  %v1508_v18 = vpop.f32.mrb[33].mxu0  ;;  %v1515_v27 = vadd.f32 %v1506_v15, %v3427_v41 }
 0x83e   :  { %v1514_v2 = vadd.f32 %v1467_v17, %v3420_v52  ;;  %v1469_v19 = vpop.f32.mrb[34].mxu1  ;;  %v1510_v20 = vpop.f32.mrb[34].mxu0  ;;  %v1516_v25 = vadd.f32 %v1508_v18, %v3424_v36 }
 0x83f   :  { %v2592_v21 = vmul.f32 -1.442695, %v1513_v16  ;;  %v1470_v22 = vpop.f32.mrb[35].mxu1  ;;  %v1511_v23 = vpop.f32.mrb[35].mxu0 }
 0x840   :  { %v2593_v24 = vmul.f32 -1.442695, %v1514_v2  ;;  %v2594_v26 = vmul.f32 -1.442695, %v1516_v25 }
 0x841   :  { %2821 = vpow2.f32 %v2592_v21 }
 0x842   :  { %2823 = vpow2.f32 %v2593_v24 }
 0x843   :  { %2825 = vpow2.f32 %v2594_v26 }
 0x844   :  { %2827 = vtanh.f32 %v1515_v27 }
 0x84b   :  { %v2822_v28 = vpop.eup %2821 }
 0x84c   :  { %v2824_v29 = vpop.eup %2823  ;;  %v1520_v31 = vadd.f32 1.0, %v2822_v28 }
 0x84d   :  { %v1526_v32 = vadd.f32 1.0, %v2824_v29  ;;  %v2826_v33 = vpop.eup %2825 }
 0x84e   :  { %2829 = vrcp.f32 %v1520_v31  ;;  %v2828_v44 = vpop.eup %2827  ;;  %v1533_v14 = vadd.f32 1.0, %v2826_v33 }
 0x84f   :  { %2831 = vrcp.f32 %v1526_v32 }
 0x850   :  { %2833 = vrcp.f32 %v1533_v14 }
 0x858   :  { %v2830_v53 = vpop.eup %2829 }
 0x859   :  { %v2832_v11 = vpop.eup %2831  ;;  %v1537_v12 = vmul.f32 %v2830_v53, %v2828_v44 }
 0x85a   :  { %v1536_v30 = vmul.f32 %v2832_v11, %v3770_v10  ;;  %v2834_v15 = vpop.eup %2833 }
 0x85c   :  { %v3816_v16 = vadd.f32 %v1537_v12, %v1536_v30 }
 0x85e   :  { %2835 = vtanh.f32 %v3816_v16 }
 0x868   :  { %v2836_v17 = vpop.eup %2835 }
 0x869   :  { %v1540_v18 = vmul.f32 %v2836_v17, %v2834_v15 }
 0x86b   :  { %v1543_v2 = vpack.c.bf16 %v1540_v18, %v1540_v18  ;;  %v2669_v19 = vpack.c.bf16 %v1540_v18, %v3773_v13 }
 0x86d   :  { %1577 = vmatmul.mubr.bf16.vlgmr.msra.gmra.mrb[36].mxu1 %v1543_v2  ;;  %2693 = vst [vmem:[%s4211_s7 + $0x18] sm:$0xff] %v2669_v19   ;;  %1618 = vmatmul.mubr.bf16.vlgmr.msra.gmra.mrb[36].mxu0 %v1543_v2 }
 0x86e   :  { %1658 = vmatpush1.bf16.msra.mxu1 %v3669_v47  ;;  %1699 = vmatpush1.bf16.msra.mxu0 %v3672_v54 }
 0x86f   :  { %1659 = vmatprep.subr.bf16.mxu1 %v3675_v55  ;;  %1700 = vmatprep.subr.bf16.mxu0 %v3678_v56 }
 0x870   :  { %1689 = vmatprep.mubr.bf16.mxu1 %v3033_v9  ;;  %1730 = vmatprep.mubr.bf16.mxu0 %v3033_v9 }
 0x872   :  { %1660 = vmatpush1.bf16.msra.mxu1 %v3683_v57  ;;  %1701 = vmatpush1.bf16.msra.mxu0 %v3686_v59 }
 0x873   :  { %1661 = vmatprep.subr.bf16.mxu1 %v3689_v60  ;;  %1702 = vmatprep.subr.bf16.mxu0 %v3692_v63 }
 0x876   :  { %1662 = vmatpush1.bf16.msra.mxu1 %v3695_v61  ;;  %1703 = vmatpush1.bf16.msra.mxu0 %v3698_v1 }
 0x877   :  { %1663 = vmatprep.subr.bf16.mxu1 %v3701_v3  ;;  %1704 = vmatprep.subr.bf16.mxu0 %v3704_v34 }
 0x87a   :  { %1664 = vmatpush1.bf16.msra.mxu1 %v3707_v38  ;;  %1705 = vmatpush1.bf16.msra.mxu0 %v3710_v58 }
 0x87b   :  { %1665 = vmatprep.subr.bf16.mxu1 %v3713_v39  ;;  %1706 = vmatprep.subr.bf16.mxu0 %v3716_v42 }
 0x87e   :  { %1666 = vmatpush1.bf16.msra.mxu1 %v3719_v62  ;;  %1707 = vmatpush1.bf16.msra.mxu0 %v3722_v43 }
 0x87f   :  { %1667 = vmatprep.subr.bf16.mxu1 %v3725_v45  ;;  %1708 = vmatprep.subr.bf16.mxu0 %v3728_v46 }
 0x882   :  { %1668 = vmatpush1.bf16.msra.mxu1 %v3731_v48  ;;  %1709 = vmatpush1.bf16.msra.mxu0 %v3734_v37 }
 0x883   :  { %1669 = vmatprep.subr.bf16.mxu1 %v3737_v35  ;;  %1710 = vmatprep.subr.bf16.mxu0 %v3740_v40 }
 0x886   :  { %1670 = vmatpush1.bf16.msra.mxu1 %v3743_v49  ;;  %1711 = vmatpush1.bf16.msra.mxu0 %v3746_v50 }
 0x887   :  { %1671 = vmatprep.subr.bf16.mxu1 %v3749_v4  ;;  %1712 = vmatprep.subr.bf16.mxu0 %v3752_v5 }
 0x88a   :  { %1672 = vmatpush1.bf16.msra.mxu1 %v3755_v6  ;;  %1713 = vmatpush1.bf16.msra.mxu0 %v3758_v7 }
 0x88b   :  { %1770 = vmatprep.subr.bf16.mxu1 %v3653_v0  ;;  %1811 = vmatprep.subr.bf16.mxu0 %v3762_v8 }
 0x940   :  { %v1578_v10 = vpop.f32.mrb[36].mxu1  ;;  %v1619_v13 = vpop.f32.mrb[36].mxu0 }
 0x941   :  { %v1626_v20 = vadd.f32 %v1578_v10, %v3418_v51  ;;  %v1580_v21 = vpop.f32.mrb[37].mxu1  ;;  %v1621_v22 = vpop.f32.mrb[37].mxu0  ;;  %v1628_v33 = vadd.f32 %v1619_v13, %v3427_v41 }
 0x942   :  { %v1627_v23 = vadd.f32 %v1580_v21, %v3420_v52  ;;  %v1582_v24 = vpop.f32.mrb[38].mxu1  ;;  %v1623_v25 = vpop.f32.mrb[38].mxu0  ;;  %v1629_v31 = vadd.f32 %v1621_v22, %v3424_v36 }
 0x943   :  { %v2595_v26 = vmul.f32 -1.442695, %v1626_v20  ;;  %v1583_v27 = vpop.f32.mrb[39].mxu1  ;;  %v1624_v28 = vpop.f32.mrb[39].mxu0 }
 0x944   :  { %v2596_v29 = vmul.f32 -1.442695, %v1627_v23  ;;  %v2597_v32 = vmul.f32 -1.442695, %v1629_v31 }
 0x945   :  { %2837 = vpow2.f32 %v2595_v26 }
 0x946   :  { %2839 = vpow2.f32 %v2596_v29 }
 0x947   :  { %2841 = vpow2.f32 %v2597_v32 }
 0x948   :  { %2843 = vtanh.f32 %v1628_v33 }
 0x94f   :  { %v2838_v44 = vpop.eup %2837 }
 0x950   :  { %v2840_v53 = vpop.eup %2839  ;;  %v1633_v11 = vadd.f32 1.0, %v2838_v44 }
 0x951   :  { %v1639_v12 = vadd.f32 1.0, %v2840_v53  ;;  %v2842_v14 = vpop.eup %2841 }
 0x952   :  { %2845 = vrcp.f32 %v1633_v11  ;;  %v2844_v30 = vpop.eup %2843  ;;  %v1646_v2 = vadd.f32 1.0, %v2842_v14 }
 0x953   :  { %2847 = vrcp.f32 %v1639_v12 }
 0x954   :  { %2849 = vrcp.f32 %v1646_v2 }
 0x95c   :  { %v2846_v15 = vpop.eup %2845 }
 0x95d   :  { %v2848_v17 = vpop.eup %2847  ;;  %v1650_v18 = vmul.f32 %v2846_v15, %v2844_v30 }
 0x95e   :  { %v1649_v19 = vmul.f32 %v2848_v17, %v3816_v16  ;;  %v2850_v13 = vpop.eup %2849 }
 0x960   :  { %v3862_v10 = vadd.f32 %v1650_v18, %v1649_v19 }
 0x962   :  { %2851 = vtanh.f32 %v3862_v10 }
 0x96c   :  { %v2852_v20 = vpop.eup %2851 }
 0x96d   :  { %v3865_v21 = vmul.f32 %v2852_v20, %v2850_v13 }
 0x96f   :  { %v1656_v22 = vpack.c.bf16 %v3865_v21, %v3865_v21 }
 0x971   :  { %1690 = vmatmul.mubr.bf16.vlgmr.msra.gmra.mrb[40].mxu1 %v1656_v22  ;;  %1731 = vmatmul.mubr.bf16.vlgmr.msra.gmra.mrb[40].mxu0 %v1656_v22 }
 0x972   :  { %1771 = vmatpush1.bf16.msra.mxu1 %v3669_v47  ;;  %1812 = vmatpush1.bf16.msra.mxu0 %v3672_v54 }
 0x973   :  { %1772 = vmatprep.subr.bf16.mxu1 %v3675_v55  ;;  %1813 = vmatprep.subr.bf16.mxu0 %v3678_v56 }
 0x974   :  { %1802 = vmatprep.mubr.bf16.mxu1 %v3033_v9  ;;  %1843 = vmatprep.mubr.bf16.mxu0 %v3033_v9 }
 0x976   :  { %1773 = vmatpush1.bf16.msra.mxu1 %v3683_v57  ;;  %1814 = vmatpush1.bf16.msra.mxu0 %v3686_v59 }
 0x977   :  { %1774 = vmatprep.subr.bf16.mxu1 %v3689_v60  ;;  %1815 = vmatprep.subr.bf16.mxu0 %v3692_v63 }
 0x97a   :  { %1775 = vmatpush1.bf16.msra.mxu1 %v3695_v61  ;;  %1816 = vmatpush1.bf16.msra.mxu0 %v3698_v1 }
 0x97b   :  { %1776 = vmatprep.subr.bf16.mxu1 %v3701_v3  ;;  %1817 = vmatprep.subr.bf16.mxu0 %v3704_v34 }
 0x97e   :  { %1777 = vmatpush1.bf16.msra.mxu1 %v3707_v38  ;;  %1818 = vmatpush1.bf16.msra.mxu0 %v3710_v58 }
 0x97f   :  { %1778 = vmatprep.subr.bf16.mxu1 %v3713_v39  ;;  %1819 = vmatprep.subr.bf16.mxu0 %v3716_v42 }
 0x982   :  { %1779 = vmatpush1.bf16.msra.mxu1 %v3719_v62  ;;  %1820 = vmatpush1.bf16.msra.mxu0 %v3722_v43 }
 0x983   :  { %1780 = vmatprep.subr.bf16.mxu1 %v3725_v45  ;;  %1821 = vmatprep.subr.bf16.mxu0 %v3728_v46 }
 0x986   :  { %1781 = vmatpush1.bf16.msra.mxu1 %v3731_v48  ;;  %1822 = vmatpush1.bf16.msra.mxu0 %v3734_v37 }
 0x987   :  { %1782 = vmatprep.subr.bf16.mxu1 %v3737_v35  ;;  %1823 = vmatprep.subr.bf16.mxu0 %v3740_v40 }
 0x98a   :  { %1783 = vmatpush1.bf16.msra.mxu1 %v3743_v49  ;;  %1824 = vmatpush1.bf16.msra.mxu0 %v3746_v50 }
 0x98b   :  { %1784 = vmatprep.subr.bf16.mxu1 %v3749_v4  ;;  %1825 = vmatprep.subr.bf16.mxu0 %v3752_v5 }
 0x98e   :  { %1785 = vmatpush1.bf16.msra.mxu1 %v3755_v6  ;;  %1826 = vmatpush1.bf16.msra.mxu0 %v3758_v7 }
 0x98f   :  { %1883 = vmatprep.subr.bf16.mxu1 %v3653_v0  ;;  %1924 = vmatprep.subr.bf16.mxu0 %v3762_v8 }
 0xa44   :  { %v1691_v16 = vpop.f32.mrb[40].mxu1  ;;  %v1732_v23 = vpop.f32.mrb[40].mxu0 }
 0xa45   :  { %v1739_v24 = vadd.f32 %v1691_v16, %v3418_v51  ;;  %v1693_v25 = vpop.f32.mrb[41].mxu1  ;;  %v1734_v26 = vpop.f32.mrb[41].mxu0  ;;  %v1741_v12 = vadd.f32 %v1732_v23, %v3427_v41 }
 0xa46   :  { %v1740_v27 = vadd.f32 %v1693_v25, %v3420_v52  ;;  %v1695_v28 = vpop.f32.mrb[42].mxu1  ;;  %v1736_v29 = vpop.f32.mrb[42].mxu0  ;;  %v1742_v53 = vadd.f32 %v1734_v26, %v3424_v36 }
 0xa47   :  { %v2598_v31 = vmul.f32 -1.442695, %v1739_v24  ;;  %v1696_v32 = vpop.f32.mrb[43].mxu1  ;;  %v1737_v33 = vpop.f32.mrb[43].mxu0 }
 0xa48   :  { %v2599_v44 = vmul.f32 -1.442695, %v1740_v27  ;;  %v2600_v11 = vmul.f32 -1.442695, %v1742_v53 }
 0xa49   :  { %2853 = vpow2.f32 %v2598_v31 }
 0xa4a   :  { %2855 = vpow2.f32 %v2599_v44 }
 0xa4b   :  { %2857 = vpow2.f32 %v2600_v11 }
 0xa4c   :  { %2859 = vtanh.f32 %v1741_v12 }
 0xa53   :  { %v2854_v14 = vpop.eup %2853 }
 0xa54   :  { %v2856_v30 = vpop.eup %2855  ;;  %v1746_v15 = vadd.f32 1.0, %v2854_v14 }
 0xa55   :  { %v1752_v17 = vadd.f32 1.0, %v2856_v30  ;;  %v2858_v18 = vpop.eup %2857 }
 0xa56   :  { %2861 = vrcp.f32 %v1746_v15  ;;  %v2860_v2 = vpop.eup %2859  ;;  %v1759_v22 = vadd.f32 1.0, %v2858_v18 }
 0xa57   :  { %2863 = vrcp.f32 %v1752_v17 }
 0xa58   :  { %2865 = vrcp.f32 %v1759_v22 }
 0xa60   :  { %v2862_v19 = vpop.eup %2861 }
 0xa61   :  { %v2864_v13 = vpop.eup %2863  ;;  %v1763_v20 = vmul.f32 %v2862_v19, %v2860_v2 }
 0xa62   :  { %v1762_v16 = vmul.f32 %v2864_v13, %v3862_v10  ;;  %v2866_v23 = vpop.eup %2865 }
 0xa64   :  { %v3908_v24 = vadd.f32 %v1763_v20, %v1762_v16 }
 0xa66   :  { %2867 = vtanh.f32 %v3908_v24 }
 0xa70   :  { %v2868_v25 = vpop.eup %2867 }
 0xa71   :  { %v1766_v26 = vmul.f32 %v2868_v25, %v2866_v23 }
 0xa73   :  { %v1769_v27 = vpack.c.bf16 %v1766_v26, %v1766_v26  ;;  %v2674_v28 = vpack.c.bf16 %v1766_v26, %v3865_v21 }
 0xa75   :  { %1803 = vmatmul.mubr.bf16.vlgmr.msra.gmra.mrb[44].mxu1 %v1769_v27  ;;  %2694 = vst [vmem:[%s4211_s7 + $0x20] sm:$0xff] %v2674_v28   ;;  %1844 = vmatmul.mubr.bf16.vlgmr.msra.gmra.mrb[44].mxu0 %v1769_v27 }
 0xa76   :  { %1884 = vmatpush1.bf16.msra.mxu1 %v3669_v47  ;;  %1925 = vmatpush1.bf16.msra.mxu0 %v3672_v54 }
 0xa77   :  { %1885 = vmatprep.subr.bf16.mxu1 %v3675_v55  ;;  %1926 = vmatprep.subr.bf16.mxu0 %v3678_v56 }
 0xa78   :  { %1915 = vmatprep.mubr.bf16.mxu1 %v3033_v9  ;;  %1956 = vmatprep.mubr.bf16.mxu0 %v3033_v9 }
 0xa7a   :  { %1886 = vmatpush1.bf16.msra.mxu1 %v3683_v57  ;;  %1927 = vmatpush1.bf16.msra.mxu0 %v3686_v59 }
 0xa7b   :  { %1887 = vmatprep.subr.bf16.mxu1 %v3689_v60  ;;  %1928 = vmatprep.subr.bf16.mxu0 %v3692_v63 }
 0xa7e   :  { %1888 = vmatpush1.bf16.msra.mxu1 %v3695_v61  ;;  %1929 = vmatpush1.bf16.msra.mxu0 %v3698_v1 }
 0xa7f   :  { %1889 = vmatprep.subr.bf16.mxu1 %v3701_v3  ;;  %1930 = vmatprep.subr.bf16.mxu0 %v3704_v34 }
 0xa82   :  { %1890 = vmatpush1.bf16.msra.mxu1 %v3707_v38  ;;  %1931 = vmatpush1.bf16.msra.mxu0 %v3710_v58 }
 0xa83   :  { %1891 = vmatprep.subr.bf16.mxu1 %v3713_v39  ;;  %1932 = vmatprep.subr.bf16.mxu0 %v3716_v42 }
 0xa86   :  { %1892 = vmatpush1.bf16.msra.mxu1 %v3719_v62  ;;  %1933 = vmatpush1.bf16.msra.mxu0 %v3722_v43 }
 0xa87   :  { %1893 = vmatprep.subr.bf16.mxu1 %v3725_v45  ;;  %1934 = vmatprep.subr.bf16.mxu0 %v3728_v46 }
 0xa8a   :  { %1894 = vmatpush1.bf16.msra.mxu1 %v3731_v48  ;;  %1935 = vmatpush1.bf16.msra.mxu0 %v3734_v37 }
 0xa8b   :  { %1895 = vmatprep.subr.bf16.mxu1 %v3737_v35  ;;  %1936 = vmatprep.subr.bf16.mxu0 %v3740_v40 }
 0xa8e   :  { %1896 = vmatpush1.bf16.msra.mxu1 %v3743_v49  ;;  %1937 = vmatpush1.bf16.msra.mxu0 %v3746_v50 }
 0xa8f   :  { %1897 = vmatprep.subr.bf16.mxu1 %v3749_v4  ;;  %1938 = vmatprep.subr.bf16.mxu0 %v3752_v5 }
 0xa92   :  { %1898 = vmatpush1.bf16.msra.mxu1 %v3755_v6  ;;  %1939 = vmatpush1.bf16.msra.mxu0 %v3758_v7 }
 0xa93   :  { %1996 = vmatprep.subr.bf16.mxu1 %v3653_v0  ;;  %2037 = vmatprep.subr.bf16.mxu0 %v3762_v8 }
 0xb48   :  { %v1804_v10 = vpop.f32.mrb[44].mxu1  ;;  %v1845_v21 = vpop.f32.mrb[44].mxu0 }
 0xb49   :  { %v1852_v29 = vadd.f32 %v1804_v10, %v3418_v51  ;;  %v1806_v31 = vpop.f32.mrb[45].mxu1  ;;  %v1847_v32 = vpop.f32.mrb[45].mxu0  ;;  %v1854_v18 = vadd.f32 %v1845_v21, %v3427_v41 }
 0xb4a   :  { %v1853_v33 = vadd.f32 %v1806_v31, %v3420_v52  ;;  %v1808_v44 = vpop.f32.mrb[46].mxu1  ;;  %v1849_v53 = vpop.f32.mrb[46].mxu0  ;;  %v1855_v15 = vadd.f32 %v1847_v32, %v3424_v36 }
 0xb4b   :  { %v2601_v11 = vmul.f32 -1.442695, %v1852_v29  ;;  %v1809_v12 = vpop.f32.mrb[47].mxu1  ;;  %v1850_v14 = vpop.f32.mrb[47].mxu0 }
 0xb4c   :  { %v2602_v30 = vmul.f32 -1.442695, %v1853_v33  ;;  %v2603_v17 = vmul.f32 -1.442695, %v1855_v15 }
 0xb4d   :  { %2869 = vpow2.f32 %v2601_v11 }
 0xb4e   :  { %2871 = vpow2.f32 %v2602_v30 }
 0xb4f   :  { %2873 = vpow2.f32 %v2603_v17 }
 0xb50   :  { %2875 = vtanh.f32 %v1854_v18 }
 0xb57   :  { %v2870_v2 = vpop.eup %2869 }
 0xb58   :  { %v2872_v19 = vpop.eup %2871  ;;  %v1859_v13 = vadd.f32 1.0, %v2870_v2 }
 0xb59   :  { %v1865_v20 = vadd.f32 1.0, %v2872_v19  ;;  %v2874_v22 = vpop.eup %2873 }
 0xb5a   :  { %2877 = vrcp.f32 %v1859_v13  ;;  %v2876_v16 = vpop.eup %2875  ;;  %v1872_v27 = vadd.f32 1.0, %v2874_v22 }
 0xb5b   :  { %2879 = vrcp.f32 %v1865_v20 }
 0xb5c   :  { %2881 = vrcp.f32 %v1872_v27 }
 0xb64   :  { %v2878_v23 = vpop.eup %2877 }
 0xb65   :  { %v2880_v25 = vpop.eup %2879  ;;  %v1876_v26 = vmul.f32 %v2878_v23, %v2876_v16 }
 0xb66   :  { %v1875_v28 = vmul.f32 %v2880_v25, %v3908_v24  ;;  %v2882_v21 = vpop.eup %2881 }
 0xb68   :  { %v3954_v10 = vadd.f32 %v1876_v26, %v1875_v28 }
 0xb6a   :  { %2883 = vtanh.f32 %v3954_v10 }
 0xb74   :  { %v2884_v29 = vpop.eup %2883 }
 0xb75   :  { %v3957_v31 = vmul.f32 %v2884_v29, %v2882_v21 }
 0xb77   :  { %v1882_v32 = vpack.c.bf16 %v3957_v31, %v3957_v31 }
 0xb79   :  { %1916 = vmatmul.mubr.bf16.vlgmr.msra.gmra.mrb[48].mxu1 %v1882_v32  ;;  %1957 = vmatmul.mubr.bf16.vlgmr.msra.gmra.mrb[48].mxu0 %v1882_v32 }
 0xb7a   :  { %1997 = vmatpush1.bf16.msra.mxu1 %v3669_v47  ;;  %2038 = vmatpush1.bf16.msra.mxu0 %v3672_v54 }
 0xb7b   :  { %1998 = vmatprep.subr.bf16.mxu1 %v3675_v55  ;;  %2039 = vmatprep.subr.bf16.mxu0 %v3678_v56 }
 0xb7c   :  { %2028 = vmatprep.mubr.bf16.mxu1 %v3033_v9  ;;  %2069 = vmatprep.mubr.bf16.mxu0 %v3033_v9 }
 0xb7e   :  { %1999 = vmatpush1.bf16.msra.mxu1 %v3683_v57  ;;  %2040 = vmatpush1.bf16.msra.mxu0 %v3686_v59 }
 0xb7f   :  { %2000 = vmatprep.subr.bf16.mxu1 %v3689_v60  ;;  %2041 = vmatprep.subr.bf16.mxu0 %v3692_v63 }
 0xb82   :  { %2001 = vmatpush1.bf16.msra.mxu1 %v3695_v61  ;;  %2042 = vmatpush1.bf16.msra.mxu0 %v3698_v1 }
 0xb83   :  { %2002 = vmatprep.subr.bf16.mxu1 %v3701_v3  ;;  %2043 = vmatprep.subr.bf16.mxu0 %v3704_v34 }
 0xb86   :  { %2003 = vmatpush1.bf16.msra.mxu1 %v3707_v38  ;;  %2044 = vmatpush1.bf16.msra.mxu0 %v3710_v58 }
 0xb87   :  { %2004 = vmatprep.subr.bf16.mxu1 %v3713_v39  ;;  %2045 = vmatprep.subr.bf16.mxu0 %v3716_v42 }
 0xb8a   :  { %2005 = vmatpush1.bf16.msra.mxu1 %v3719_v62  ;;  %2046 = vmatpush1.bf16.msra.mxu0 %v3722_v43 }
 0xb8b   :  { %2006 = vmatprep.subr.bf16.mxu1 %v3725_v45  ;;  %2047 = vmatprep.subr.bf16.mxu0 %v3728_v46 }
 0xb8e   :  { %2007 = vmatpush1.bf16.msra.mxu1 %v3731_v48  ;;  %2048 = vmatpush1.bf16.msra.mxu0 %v3734_v37 }
 0xb8f   :  { %2008 = vmatprep.subr.bf16.mxu1 %v3737_v35  ;;  %2049 = vmatprep.subr.bf16.mxu0 %v3740_v40 }
 0xb92   :  { %2009 = vmatpush1.bf16.msra.mxu1 %v3743_v49  ;;  %2050 = vmatpush1.bf16.msra.mxu0 %v3746_v50 }
 0xb93   :  { %2010 = vmatprep.subr.bf16.mxu1 %v3749_v4  ;;  %2051 = vmatprep.subr.bf16.mxu0 %v3752_v5 }
 0xb96   :  { %2011 = vmatpush1.bf16.msra.mxu1 %v3755_v6  ;;  %2052 = vmatpush1.bf16.msra.mxu0 %v3758_v7 }
 0xb97   :  { %2109 = vmatprep.subr.bf16.mxu1 %v3653_v0  ;;  %2150 = vmatprep.subr.bf16.mxu0 %v3762_v8 }
 0xc4c   :  { %v1917_v24 = vpop.f32.mrb[48].mxu1  ;;  %v1958_v33 = vpop.f32.mrb[48].mxu0 }
 0xc4d   :  { %v1965_v44 = vadd.f32 %v1917_v24, %v3418_v51  ;;  %v1919_v53 = vpop.f32.mrb[49].mxu1  ;;  %v1960_v11 = vpop.f32.mrb[49].mxu0  ;;  %v1967_v13 = vadd.f32 %v1958_v33, %v3427_v41 }
 0xc4e   :  { %v1966_v12 = vadd.f32 %v1919_v53, %v3420_v52  ;;  %v1921_v14 = vpop.f32.mrb[50].mxu1  ;;  %v1962_v30 = vpop.f32.mrb[50].mxu0  ;;  %v1968_v0 = vadd.f32 %v1960_v11, %v3424_v36 }
 0xc4f   :  { %v2604_v15 = vmul.f32 -1.442695, %v1965_v44  ;;  %v1922_v17 = vpop.f32.mrb[51].mxu1  ;;  %v1963_v18 = vpop.f32.mrb[51].mxu0  ;;  %v4058_v14 = vld [vmem:[#allocation2 + $0x10] sm:$0xff]  ;;  %v4061_v30 = vld [vmem:[#allocation2 + $0x28] sm:$0xff] }
 0xc50   :  { %v2605_v2 = vmul.f32 -1.442695, %v1966_v12  ;;  %v2606_v19 = vmul.f32 -1.442695, %v1968_v0  ;;  %v4069_v17 = vld [vmem:[#allocation2 + $0x20] sm:$0xff]  ;;  %v4072_v18 = vld [vmem:[#allocation2 + $0x30] sm:$0xff] }
 0xc51   :  { %2885 = vpow2.f32 %v2604_v15  ;;  %v4064_v15 = vld [vmem:[#allocation2 + $0x38] sm:$0xff] }
 0xc52   :  { %2887 = vpow2.f32 %v2605_v2  ;;  %v4075_v2 = vld [vmem:[#allocation2 + $0x48] sm:$0xff]  ;;  %v4078_v0 = vld [vmem:[#allocation2 + $0x58] sm:$0xff] }
 0xc53   :  { %2889 = vpow2.f32 %v2606_v19  ;;  %v4081_v19 = vld [vmem:[#allocation2 + $0x40] sm:$0xff] }
 0xc54   :  { %2891 = vtanh.f32 %v1967_v13  ;;  %v4084_v13 = vld [vmem:[#allocation2 + $0x50] sm:$0xff] }
 0xc5b   :  { %v2886_v20 = vpop.eup %2885 }
 0xc5c   :  { %v2888_v22 = vpop.eup %2887  ;;  %v1972_v16 = vadd.f32 1.0, %v2886_v20  ;;  %v4087_v20 = vld [vmem:[#allocation2 + $0x68] sm:$0xff] }
 0xc5d   :  { %v1978_v23 = vadd.f32 1.0, %v2888_v22  ;;  %v2890_v25 = vpop.eup %2889  ;;  %v4090_v22 = vld [vmem:[#allocation2 + $0x78] sm:$0xff] }
 0xc5e   :  { %2893 = vrcp.f32 %v1972_v16  ;;  %v2892_v26 = vpop.eup %2891  ;;  %v1985_v29 = vadd.f32 1.0, %v2890_v25  ;;  %v4093_v16 = vld [vmem:[#allocation2 + $0x60] sm:$0xff]  ;;  %v4099_v25 = vld [vmem:[#allocation2 + $0x88] sm:$0xff] }
 0xc5f   :  { %2895 = vrcp.f32 %v1978_v23  ;;  %v4096_v23 = vld [vmem:[#allocation2 + $0x70] sm:$0xff] }
 0xc60   :  { %2897 = vrcp.f32 %v1985_v29  ;;  %v4114_v29 = vld [vmem:[#allocation2 + $0xb8] sm:$0xff] }
 0xc68   :  { %v2894_v27 = vpop.eup %2893 }
 0xc69   :  { %v2896_v28 = vpop.eup %2895  ;;  %v1989_v21 = vmul.f32 %v2894_v27, %v2892_v26  ;;  %v4102_v26 = vld [vmem:[#allocation2 + $0x98] sm:$0xff]  ;;  %v4105_v27 = vld [vmem:[#allocation2 + $0x80] sm:$0xff] }
 0xc6a   :  { %v1988_v32 = vmul.f32 %v2896_v28, %v3954_v10  ;;  %v2898_v33 = vpop.eup %2897  ;;  %v4108_v28 = vld [vmem:[#allocation2 + $0x90] sm:$0xff] }
 0xc6c   :  { %v4000_v24 = vadd.f32 %v1989_v21, %v1988_v32  ;;  %v4111_v21 = vld [vmem:[#allocation2 + $0xa8] sm:$0xff]  ;;  %v4117_v32 = vld [vmem:[#allocation2 + $0xa0] sm:$0xff] }
 0xc6e   :  { %2899 = vtanh.f32 %v4000_v24 }
 0xc78   :  { %v2900_v44 = vpop.eup %2899 }
 0xc79   :  { %v1992_v53 = vmul.f32 %v2900_v44, %v2898_v33  ;;  %v4123_v33 = vld [vmem:[#allocation2 + $0xc8] sm:$0xff]  ;;  %v4126_v44 = vld [vmem:[#allocation2 + $0xd8] sm:$0xff] }
 0xc7b   :  { %v1995_v11 = vpack.c.bf16 %v1992_v53, %v1992_v53  ;;  %v2679_v12 = vpack.c.bf16 %v1992_v53, %v3957_v31  ;;  %v4055_v31 = vld [vmem:[#allocation2] sm:$0xff] }
 0xc7c   :  { %v4129_v53 = vld [vmem:[#allocation2 + $0xc0] sm:$0xff] }
 0xc7d   :  { %2029 = vmatmul.mubr.bf16.vlgmr.msra.gmra.mrb[52].mxu1 %v1995_v11  ;;  %2695 = vst [vmem:[%s4211_s7 + $0x28] sm:$0xff] %v2679_v12   ;;  %2070 = vmatmul.mubr.bf16.vlgmr.msra.gmra.mrb[52].mxu0 %v1995_v11  ;;  %v4132_v11 = vld [vmem:[#allocation2 + $0xd0] sm:$0xff]  ;;  %v4135_v12 = vld [vmem:[#allocation2 + $0xe8] sm:$0xff] }
 0xc7e   :  { %2110 = vmatpush1.bf16.msra.mxu1 %v3669_v47  ;;  %2151 = vmatpush1.bf16.msra.mxu0 %v3672_v54  ;;  %v4039_v47 = vld [vmem:[#allocation2 + $0x8] sm:$0xff] }
 0xc7f   :  { %2111 = vmatprep.subr.bf16.mxu1 %v3675_v55  ;;  %2152 = vmatprep.subr.bf16.mxu0 %v3678_v56 }
 0xc80   :  { %2141 = vmatprep.mubr.bf16.mxu1 %v3033_v9  ;;  %2182 = vmatprep.mubr.bf16.mxu0 %v3033_v9 }
 0xc82   :  { %2112 = vmatpush1.bf16.msra.mxu1 %v3683_v57  ;;  %2153 = vmatpush1.bf16.msra.mxu0 %v3686_v59 }
 0xc83   :  { %2113 = vmatprep.subr.bf16.mxu1 %v3689_v60  ;;  %2154 = vmatprep.subr.bf16.mxu0 %v3692_v63 }
 0xc86   :  { %2114 = vmatpush1.bf16.msra.mxu1 %v3695_v61  ;;  %2155 = vmatpush1.bf16.msra.mxu0 %v3698_v1 }
 0xc87   :  { %2115 = vmatprep.subr.bf16.mxu1 %v3701_v3  ;;  %2156 = vmatprep.subr.bf16.mxu0 %v3704_v34 }
 0xc8a   :  { %2116 = vmatpush1.bf16.msra.mxu1 %v3707_v38  ;;  %2157 = vmatpush1.bf16.msra.mxu0 %v3710_v58 }
 0xc8b   :  { %2117 = vmatprep.subr.bf16.mxu1 %v3713_v39  ;;  %2158 = vmatprep.subr.bf16.mxu0 %v3716_v42 }
 0xc8e   :  { %2118 = vmatpush1.bf16.msra.mxu1 %v3719_v62  ;;  %2159 = vmatpush1.bf16.msra.mxu0 %v3722_v43 }
 0xc8f   :  { %2119 = vmatprep.subr.bf16.mxu1 %v3725_v45  ;;  %2160 = vmatprep.subr.bf16.mxu0 %v3728_v46 }
 0xc92   :  { %2120 = vmatpush1.bf16.msra.mxu1 %v3731_v48  ;;  %2161 = vmatpush1.bf16.msra.mxu0 %v3734_v37 }
 0xc93   :  { %2121 = vmatprep.subr.bf16.mxu1 %v3737_v35  ;;  %2162 = vmatprep.subr.bf16.mxu0 %v3740_v40 }
 0xc96   :  { %2122 = vmatpush1.bf16.msra.mxu1 %v3743_v49  ;;  %2163 = vmatpush1.bf16.msra.mxu0 %v3746_v50 }
 0xc97   :  { %2123 = vmatprep.subr.bf16.mxu1 %v3749_v4  ;;  %2164 = vmatprep.subr.bf16.mxu0 %v3752_v5 }
 0xc9a   :  { %2124 = vmatpush1.bf16.msra.mxu1 %v3755_v6  ;;  %2165 = vmatpush1.bf16.msra.mxu0 %v3758_v7 }
 0xc9b   :  { %2222 = vmatprep.subr.bf16.mxu1 %v4039_v47  ;;  %2263 = vmatprep.subr.bf16.mxu0 %v3762_v8 }
 0xd50   :  { %v2030_v54 = vpop.f32.mrb[52].mxu1  ;;  %v2071_v55 = vpop.f32.mrb[52].mxu0 }
 0xd51   :  { %v2078_v56 = vadd.f32 %v2030_v54, %v3418_v51  ;;  %v2032_v57 = vpop.f32.mrb[53].mxu1  ;;  %v2073_v59 = vpop.f32.mrb[53].mxu0  ;;  %v2080_v42 = vadd.f32 %v2071_v55, %v3427_v41  ;;  %v4138_v54 = vld [vmem:[#allocation2 + $0xf8] sm:$0xff]  ;;  %v4141_v55 = vld [vmem:[#allocation2 + $0xe0] sm:$0xff] }
 0xd52   :  { %v2079_v60 = vadd.f32 %v2032_v57, %v3420_v52  ;;  %v2034_v63 = vpop.f32.mrb[54].mxu1  ;;  %v2075_v61 = vpop.f32.mrb[54].mxu0  ;;  %v2081_v58 = vadd.f32 %v2073_v59, %v3424_v36  ;;  %v3028_v57 = vld [vmem:[#allocation2 + $0x18] sm:$0xff] }
 0xd53   :  { %v2607_v1 = vmul.f32 -1.442695, %v2078_v56  ;;  %v2035_v3 = vpop.f32.mrb[55].mxu1  ;;  %v2076_v34 = vpop.f32.mrb[55].mxu0  ;;  %v4144_v56 = vld [vmem:[#allocation2 + $0xf0] sm:$0xff] }
 0xd54   :  { %v2608_v38 = vmul.f32 -1.442695, %v2079_v60  ;;  %v2609_v39 = vmul.f32 -1.442695, %v2081_v58 }
 0xd55   :  { %2901 = vpow2.f32 %v2607_v1 }
 0xd56   :  { %2903 = vpow2.f32 %v2608_v38 }
 0xd57   :  { %2905 = vpow2.f32 %v2609_v39 }
 0xd58   :  { %2907 = vtanh.f32 %v2080_v42 }
 0xd5f   :  { %v2902_v62 = vpop.eup %2901 }
 0xd60   :  { %v2904_v43 = vpop.eup %2903  ;;  %v2085_v45 = vadd.f32 1.0, %v2902_v62 }
 0xd61   :  { %v2091_v46 = vadd.f32 1.0, %v2904_v43  ;;  %v2906_v48 = vpop.eup %2905 }
 0xd62   :  { %2909 = vrcp.f32 %v2085_v45  ;;  %v2908_v37 = vpop.eup %2907  ;;  %v2098_v50 = vadd.f32 1.0, %v2906_v48 }
 0xd63   :  { %2911 = vrcp.f32 %v2091_v46 }
 0xd64   :  { %2913 = vrcp.f32 %v2098_v50 }
 0xd6c   :  { %v2910_v35 = vpop.eup %2909 }
 0xd6d   :  { %v2912_v40 = vpop.eup %2911  ;;  %v2102_v49 = vmul.f32 %v2910_v35, %v2908_v37 }
 0xd6e   :  { %v2101_v4 = vmul.f32 %v2912_v40, %v4000_v24  ;;  %v2914_v6 = vpop.eup %2913  ;;  %v4120_v24 = vld [vmem:[#allocation2 + $0xb0] sm:$0xff] }
 0xd70   :  { %v4048_v5 = vadd.f32 %v2102_v49, %v2101_v4 }
 0xd72   :  { %2915 = vtanh.f32 %v4048_v5 }
 0xd7c   :  { %v2916_v7 = vpop.eup %2915 }
 0xd7d   :  { %v4051_v8 = vmul.f32 %v2916_v7, %v2914_v6 }
 0xd7f   :  { %v2108_v10 = vpack.c.bf16 %v4051_v8, %v4051_v8 }
 0xd81   :  { %2142 = vmatmul.mubr.bf16.vlgmr.msra.gmra.mrb[56].mxu1 %v2108_v10  ;;  %2183 = vmatmul.mubr.bf16.vlgmr.msra.gmra.mrb[56].mxu0 %v2108_v10 }
 0xd82   :  { %2223 = vmatpush1.bf16.msra.mxu1 %v4055_v31  ;;  %2264 = vmatpush1.bf16.msra.mxu0 %v4058_v14 }
 0xd83   :  { %2224 = vmatprep.subr.bf16.mxu1 %v4061_v30  ;;  %2265 = vmatprep.subr.bf16.mxu0 %v4064_v15 }
 0xd84   :  { %2254 = vmatprep.mubr.bf16.mxu1 %v3033_v9  ;;  %2295 = vmatprep.mubr.bf16.mxu0 %v3033_v9 }
 0xd86   :  { %2225 = vmatpush1.bf16.msra.mxu1 %v4069_v17  ;;  %2266 = vmatpush1.bf16.msra.mxu0 %v4072_v18 }
 0xd87   :  { %2226 = vmatprep.subr.bf16.mxu1 %v4075_v2  ;;  %2267 = vmatprep.subr.bf16.mxu0 %v4078_v0 }
 0xd8a   :  { %2227 = vmatpush1.bf16.msra.mxu1 %v4081_v19  ;;  %2268 = vmatpush1.bf16.msra.mxu0 %v4084_v13 }
 0xd8b   :  { %2228 = vmatprep.subr.bf16.mxu1 %v4087_v20  ;;  %2269 = vmatprep.subr.bf16.mxu0 %v4090_v22 }
 0xd8e   :  { %2229 = vmatpush1.bf16.msra.mxu1 %v4093_v16  ;;  %2270 = vmatpush1.bf16.msra.mxu0 %v4096_v23 }
 0xd8f   :  { %2230 = vmatprep.subr.bf16.mxu1 %v4099_v25  ;;  %2271 = vmatprep.subr.bf16.mxu0 %v4102_v26 }
 0xd92   :  { %2231 = vmatpush1.bf16.msra.mxu1 %v4105_v27  ;;  %2272 = vmatpush1.bf16.msra.mxu0 %v4108_v28 }
 0xd93   :  { %2232 = vmatprep.subr.bf16.mxu1 %v4111_v21  ;;  %2273 = vmatprep.subr.bf16.mxu0 %v4114_v29 }
 0xd96   :  { %2233 = vmatpush1.bf16.msra.mxu1 %v4117_v32  ;;  %2274 = vmatpush1.bf16.msra.mxu0 %v4120_v24 }
 0xd97   :  { %2234 = vmatprep.subr.bf16.mxu1 %v4123_v33  ;;  %2275 = vmatprep.subr.bf16.mxu0 %v4126_v44 }
 0xd9a   :  { %2235 = vmatpush1.bf16.msra.mxu1 %v4129_v53  ;;  %2276 = vmatpush1.bf16.msra.mxu0 %v4132_v11 }
 0xd9b   :  { %2236 = vmatprep.subr.bf16.mxu1 %v4135_v12  ;;  %2277 = vmatprep.subr.bf16.mxu0 %v4138_v54 }
 0xd9e   :  { %2237 = vmatpush1.bf16.msra.mxu1 %v4141_v55  ;;  %2278 = vmatpush1.bf16.msra.mxu0 %v4144_v56 }
 0xd9f   :  { %2335 = vmatprep.subr.bf16.mxu1 %v4039_v47  ;;  %2376 = vmatprep.subr.bf16.mxu0 %v3028_v57 }
 0xe54   :  { %v2143_v59 = vpop.f32.mrb[56].mxu1  ;;  %v2184_v60 = vpop.f32.mrb[56].mxu0 }
 0xe55   :  { %v2191_v63 = vadd.f32 %v2143_v59, %v3418_v51  ;;  %v2145_v61 = vpop.f32.mrb[57].mxu1  ;;  %v2186_v1 = vpop.f32.mrb[57].mxu0  ;;  %v2193_v45 = vadd.f32 %v2184_v60, %v3427_v41 }
 0xe56   :  { %v2192_v3 = vadd.f32 %v2145_v61, %v3420_v52  ;;  %v2147_v34 = vpop.f32.mrb[58].mxu1  ;;  %v2188_v38 = vpop.f32.mrb[58].mxu0  ;;  %v2194_v47 = vadd.f32 %v2186_v1, %v3424_v36 }
 0xe57   :  { %v2610_v58 = vmul.f32 -1.442695, %v2191_v63  ;;  %v2148_v39 = vpop.f32.mrb[59].mxu1  ;;  %v2189_v42 = vpop.f32.mrb[59].mxu0 }
 0xe58   :  { %v2611_v62 = vmul.f32 -1.442695, %v2192_v3  ;;  %v2612_v43 = vmul.f32 -1.442695, %v2194_v47 }
 0xe59   :  { %2917 = vpow2.f32 %v2610_v58 }
 0xe5a   :  { %2919 = vpow2.f32 %v2611_v62 }
 0xe5b   :  { %2921 = vpow2.f32 %v2612_v43 }
 0xe5c   :  { %2923 = vtanh.f32 %v2193_v45 }
 0xe63   :  { %v2918_v46 = vpop.eup %2917 }
 0xe64   :  { %v2920_v48 = vpop.eup %2919  ;;  %v2198_v37 = vadd.f32 1.0, %v2918_v46 }
 0xe65   :  { %v2204_v35 = vadd.f32 1.0, %v2920_v48  ;;  %v2922_v40 = vpop.eup %2921 }
 0xe66   :  { %2925 = vrcp.f32 %v2198_v37  ;;  %v2924_v49 = vpop.eup %2923  ;;  %v2211_v7 = vadd.f32 1.0, %v2922_v40 }
 0xe67   :  { %2927 = vrcp.f32 %v2204_v35 }
 0xe68   :  { %2929 = vrcp.f32 %v2211_v7 }
 0xe70   :  { %v2926_v50 = vpop.eup %2925 }
 0xe71   :  { %v2928_v4 = vpop.eup %2927  ;;  %v2215_v6 = vmul.f32 %v2926_v50, %v2924_v49 }
 0xe72   :  { %v2214_v10 = vmul.f32 %v2928_v4, %v4048_v5  ;;  %v2930_v59 = vpop.eup %2929 }
 0xe74   :  { %v4153_v57 = vadd.f32 %v2215_v6, %v2214_v10 }
 0xe76   :  { %2931 = vtanh.f32 %v4153_v57 }
 0xe80   :  { %v2932_v60 = vpop.eup %2931 }
 0xe81   :  { %v2218_v63 = vmul.f32 %v2932_v60, %v2930_v59 }
 0xe83   :  { %v2221_v61 = vpack.c.bf16 %v2218_v63, %v2218_v63  ;;  %v2684_v1 = vpack.c.bf16 %v2218_v63, %v4051_v8 }
 0xe85   :  { %2255 = vmatmul.mubr.bf16.vlgmr.msra.gmra.mrb[60].mxu1 %v2221_v61  ;;  %2696 = vst [vmem:[%s4211_s7 + $0x30] sm:$0xff] %v2684_v1   ;;  %2296 = vmatmul.mubr.bf16.vlgmr.msra.gmra.mrb[60].mxu0 %v2221_v61 }
 0xe86   :  { %2336 = vmatpush1.bf16.msra.mxu1 %v4055_v31  ;;  %2377 = vmatpush1.bf16.msra.mxu0 %v4058_v14 }
 0xe87   :  { %2337 = vmatprep.subr.bf16.mxu1 %v4061_v30  ;;  %2378 = vmatprep.subr.bf16.mxu0 %v4064_v15 }
 0xe88   :  { %2367 = vmatprep.mubr.bf16.mxu1 %v3033_v9  ;;  %2408 = vmatprep.mubr.bf16.mxu0 %v3033_v9 }
 0xe8a   :  { %2338 = vmatpush1.bf16.msra.mxu1 %v4069_v17  ;;  %2379 = vmatpush1.bf16.msra.mxu0 %v4072_v18 }
 0xe8b   :  { %2339 = vmatprep.subr.bf16.mxu1 %v4075_v2  ;;  %2380 = vmatprep.subr.bf16.mxu0 %v4078_v0 }
 0xe8e   :  { %2340 = vmatpush1.bf16.msra.mxu1 %v4081_v19  ;;  %2381 = vmatpush1.bf16.msra.mxu0 %v4084_v13 }
 0xe8f   :  { %2341 = vmatprep.subr.bf16.mxu1 %v4087_v20  ;;  %2382 = vmatprep.subr.bf16.mxu0 %v4090_v22 }
 0xe92   :  { %2342 = vmatpush1.bf16.msra.mxu1 %v4093_v16  ;;  %2383 = vmatpush1.bf16.msra.mxu0 %v4096_v23 }
 0xe93   :  { %2343 = vmatprep.subr.bf16.mxu1 %v4099_v25  ;;  %2384 = vmatprep.subr.bf16.mxu0 %v4102_v26 }
 0xe96   :  { %2344 = vmatpush1.bf16.msra.mxu1 %v4105_v27  ;;  %2385 = vmatpush1.bf16.msra.mxu0 %v4108_v28 }
 0xe97   :  { %2345 = vmatprep.subr.bf16.mxu1 %v4111_v21  ;;  %2386 = vmatprep.subr.bf16.mxu0 %v4114_v29 }
 0xe9a   :  { %2346 = vmatpush1.bf16.msra.mxu1 %v4117_v32  ;;  %2387 = vmatpush1.bf16.msra.mxu0 %v4120_v24 }
 0xe9b   :  { %2347 = vmatprep.subr.bf16.mxu1 %v4123_v33  ;;  %2388 = vmatprep.subr.bf16.mxu0 %v4126_v44 }
 0xe9e   :  { %2348 = vmatpush1.bf16.msra.mxu1 %v4129_v53  ;;  %2389 = vmatpush1.bf16.msra.mxu0 %v4132_v11 }
 0xe9f   :  { %2349 = vmatprep.subr.bf16.mxu1 %v4135_v12  ;;  %2390 = vmatprep.subr.bf16.mxu0 %v4138_v54 }
 0xea2   :  { %2350 = vmatpush1.bf16.msra.mxu1 %v4141_v55  ;;  %2391 = vmatpush1.bf16.msra.mxu0 %v4144_v56 }
 0xf58   :  { %v2256_v9 = vpop.f32.mrb[60].mxu1  ;;  %v2297_v5 = vpop.f32.mrb[60].mxu0 }
 0xf59   :  { %v2304_v8 = vadd.f32 %v2256_v9, %v3418_v51  ;;  %v2258_v31 = vpop.f32.mrb[61].mxu1  ;;  %v2299_v14 = vpop.f32.mrb[61].mxu0  ;;  %v2306_v22 = vadd.f32 %v2297_v5, %v3427_v41 }
 0xf5a   :  { %v2305_v30 = vadd.f32 %v2258_v31, %v3420_v52  ;;  %v2260_v15 = vpop.f32.mrb[62].mxu1  ;;  %v2301_v17 = vpop.f32.mrb[62].mxu0  ;;  %v2307_v13 = vadd.f32 %v2299_v14, %v3424_v36 }
 0xf5b   :  { %v2613_v18 = vmul.f32 -1.442695, %v2304_v8  ;;  %v2261_v2 = vpop.f32.mrb[63].mxu1  ;;  %v2302_v0 = vpop.f32.mrb[63].mxu0 }
 0xf5c   :  { %v2614_v19 = vmul.f32 -1.442695, %v2305_v30  ;;  %v2615_v20 = vmul.f32 -1.442695, %v2307_v13 }
 0xf5d   :  { %2933 = vpow2.f32 %v2613_v18 }
 0xf5e   :  { %2935 = vpow2.f32 %v2614_v19 }
 0xf5f   :  { %2937 = vpow2.f32 %v2615_v20 }
 0xf60   :  { %2939 = vtanh.f32 %v2306_v22 }
 0xf67   :  { %v2934_v16 = vpop.eup %2933 }
 0xf68   :  { %v2936_v23 = vpop.eup %2935  ;;  %v2311_v25 = vadd.f32 1.0, %v2934_v16 }
 0xf69   :  { %v2317_v26 = vadd.f32 1.0, %v2936_v23  ;;  %v2938_v27 = vpop.eup %2937 }
 0xf6a   :  { %2941 = vrcp.f32 %v2311_v25  ;;  %v2940_v28 = vpop.eup %2939  ;;  %v2324_v24 = vadd.f32 1.0, %v2938_v27 }
 0xf6b   :  { %2943 = vrcp.f32 %v2317_v26 }
 0xf6c   :  { %2945 = vrcp.f32 %v2324_v24 }
 0xf74   :  { %v2942_v21 = vpop.eup %2941 }
 0xf75   :  { %v2944_v29 = vpop.eup %2943  ;;  %v2328_v32 = vmul.f32 %v2942_v21, %v2940_v28 }
 0xf76   :  { %v2327_v33 = vmul.f32 %v2944_v29, %v4153_v57  ;;  %v2946_v53 = vpop.eup %2945 }
 0xf78   :  { %v2329_v44 = vadd.f32 %v2328_v32, %v2327_v33 }
 0xf7a   :  { %2947 = vtanh.f32 %v2329_v44 }
 0xf84   :  { %v2948_v11 = vpop.eup %2947 }
 0xf85   :  { %v2331_v12 = vmul.f32 %v2948_v11, %v2946_v53 }
 0xf87   :  { %v2334_v54 = vpack.c.bf16 %v2331_v12, %v2331_v12 }
 0xf89   :  { %2368 = vmatmul.mubr.bf16.vlgmr.msra.gmra.mrb[64].mxu1 %v2334_v54  ;;  %2409 = vmatmul.mubr.bf16.vlgmr.msra.gmra.mrb[64].mxu0 %v2334_v54 }
0x105c   :  { %v2369_v55 = vpop.f32.mrb[64].mxu1  ;;  %v2410_v56 = vpop.f32.mrb[64].mxu0 }
0x105d   :  { %v2417_v3 = vadd.f32 %v2369_v55, %v3418_v51  ;;  %v2371_v34 = vpop.f32.mrb[65].mxu1  ;;  %v2412_v38 = vpop.f32.mrb[65].mxu0  ;;  %v2419_v37 = vadd.f32 %v2410_v56, %v3427_v41 }
0x105e   :  { %v2418_v58 = vadd.f32 %v2371_v34, %v3420_v52  ;;  %v2373_v39 = vpop.f32.mrb[66].mxu1  ;;  %v2414_v42 = vpop.f32.mrb[66].mxu0  ;;  %v2420_v46 = vadd.f32 %v2412_v38, %v3424_v36 }
0x105f   :  { %v2616_v62 = vmul.f32 -1.442695, %v2417_v3  ;;  %v2374_v47 = vpop.f32.mrb[67].mxu1  ;;  %v2415_v43 = vpop.f32.mrb[67].mxu0 }
0x1060   :  { %v2617_v45 = vmul.f32 -1.442695, %v2418_v58  ;;  %v2618_v48 = vmul.f32 -1.442695, %v2420_v46 }
0x1061   :  { %2949 = vpow2.f32 %v2616_v62 }
0x1062   :  { %2951 = vpow2.f32 %v2617_v45 }
0x1063   :  { %2953 = vpow2.f32 %v2618_v48 }
0x1064   :  { %2955 = vtanh.f32 %v2419_v37 }
0x106b   :  { %v2950_v35 = vpop.eup %2949 }
0x106c   :  { %v2952_v40 = vpop.eup %2951  ;;  %v2424_v51 = vadd.f32 1.0, %v2950_v35 }
0x106d   :  { %v2430_v49 = vadd.f32 1.0, %v2952_v40  ;;  %v2954_v52 = vpop.eup %2953 }
0x106e   :  { %2957 = vrcp.f32 %v2424_v51  ;;  %v2956_v50 = vpop.eup %2955  ;;  %v2437_v10 = vadd.f32 1.0, %v2954_v52 }
0x106f   :  { %2959 = vrcp.f32 %v2430_v49 }
0x1070   :  { %2961 = vrcp.f32 %v2437_v10 }
0x1078   :  { %v2958_v4 = vpop.eup %2957 }
0x1079   :  { %v2960_v6 = vpop.eup %2959  ;;  %v2441_v7 = vmul.f32 %v2958_v4, %v2956_v50 }
0x107a   :  { %v2440_v57 = vmul.f32 %v2960_v6, %v2329_v44  ;;  %v2962_v36 = vpop.eup %2961 }
0x107c   :  { %v2442_v59 = vadd.f32 %v2441_v7, %v2440_v57 }
0x107e   :  { %2963 = vtanh.f32 %v2442_v59 }
0x1088   :  { %v2964_v41 = vpop.eup %2963 }
0x1089   :  { %v2444_v60 = vmul.f32 %v2964_v41, %v2962_v36 }
0x108b   :  { %v2689_v63 = vpack.c.bf16 %v2444_v60, %v2331_v12 }
0x108d   :  { %2697 = vst [vmem:[%s4211_s7 + $0x38] sm:$0xff] %v2689_v63  }

// kernel: lstm_decoder_forward.3
= control target key start
LH: loop header
LB: loop body
LE: loop exit
PB: predicated region body
PF: predicated region fallthrough
CT: control target
= control target key end

     0   :  { %v1749_v24 = vmov 0   ;;  %s2288_s2 = inlined_call_operand.vmem [shape: bf16[128,128], index: 2, kind: input, shape index: {}]   ;;  %s2289_s0 = inlined_call_operand.vmem [shape: bf16[128,128], index: 0, kind: input, shape index: {}]   ;;  %s2290_s3 = inlined_call_operand.vmem [shape: bf16[128,128], index: 3, kind: input, shape index: {}]   ;;  %s2291_s5 = inlined_call_operand.vmem [shape: s32[128,1], index: 5, kind: input, shape index: {}]   ;;  %s2292_s6 = inlined_call_operand.vmem [shape: f32[1,1,128], index: 6, kind: input, shape index: {}]   ;;  %s2293_s1 = inlined_call_operand.vmem [shape: f32[8,128], index: 1, kind: input, shape index: {}]   ;;  %s2294_s4 = inlined_call_operand.vmem [shape: f32[1,128], index: 4, kind: input, shape index: {}]   ;;  %s2295_s7 = inlined_call_operand.vmem [shape: f32[1,1,128], index: 7, kind: output, shape index: {}]  }
   0x1   :  { %v1597_v0 = vld [vmem:[%s2288_s2] sm:$0xff]   ;;  %v1598_v1 = vld [vmem:[%s2288_s2 + $0x8] sm:$0xff]   ;;  %v1599_v2 = vld [vmem:[%s2288_s2 + $0x10] sm:$0xff]   ;;  %1596 = vset.pattern.permute.xlu1 %v1749_v24  ;;  %1595 = vset.pattern.permute.xlu0 %v1749_v24 }
   0x2   :  { %1530 = vmatprep.subr.bf16.mxu0 %v1597_v0  ;;  %v1600_v3 = vld [vmem:[%s2288_s2 + $0x18] sm:$0xff]   ;;  %v1605_v4 = vld [vmem:[%s2289_s0] sm:$0xff]   ;;  %v1602_v6 = vld [vmem:[%s2288_s2 + $0x28] sm:$0xff]  }
   0x3   :  { %1531 = vmatpush3.bf16.msra.mxu0 %v1597_v0  ;;  %1546 = vmatprep.mubr.bf16.mxu0 %v1605_v4  ;;  %v1601_v5 = vld [vmem:[%s2288_s2 + $0x20] sm:$0xff]   ;;  %v1614_v8 = vld [vmem:[%s2290_s3 + $0x8] sm:$0xff]   ;;  %v1603_v9 = vld [vmem:[%s2288_s2 + $0x30] sm:$0xff]  }
   0x4   :  { %1532 = vmatprep.subr.bf16.mxu0 %v1598_v1  ;;  %v1613_v7 = vld [vmem:[%s2290_s3] sm:$0xff]   ;;  %v1615_v10 = vld [vmem:[%s2290_s3 + $0x10] sm:$0xff]   ;;  %v1604_v11 = vld [vmem:[%s2288_s2 + $0x38] sm:$0xff]  }
   0x5   :  { %1562 = vmatprep.subr.bf16.mxu1 %v1613_v7  ;;  %v1616_v12 = vld [vmem:[%s2290_s3 + $0x18] sm:$0xff]   ;;  %v1617_v13 = vld [vmem:[%s2290_s3 + $0x20] sm:$0xff]   ;;  %v1606_v14 = vld [vmem:[%s2289_s0 + $0x8] sm:$0xff]  }
   0x6   :  { %1563 = vmatpush3.bf16.msra.mxu1 %v1613_v7  ;;  %v1607_v15 = vld [vmem:[%s2289_s0 + $0x10] sm:$0xff]   ;;  %v1618_v16 = vld [vmem:[%s2290_s3 + $0x28] sm:$0xff]   ;;  %v1608_v17 = vld [vmem:[%s2289_s0 + $0x18] sm:$0xff]  }
   0x7   :  { %1533 = vmatpush3.bf16.msra.mxu0 %v1598_v1  ;;  %1564 = vmatprep.subr.bf16.mxu1 %v1614_v8  ;;  %v1609_v18 = vld [vmem:[%s2289_s0 + $0x20] sm:$0xff]   ;;  %v1610_v19 = vld [vmem:[%s2289_s0 + $0x28] sm:$0xff]   ;;  %v1611_v20 = vld [vmem:[%s2289_s0 + $0x30] sm:$0xff]  }
   0x8   :  { %1534 = vmatprep.subr.bf16.mxu0 %v1599_v2  ;;  %v1612_v21 = vld [vmem:[%s2289_s0 + $0x38] sm:$0xff]   ;;  %v1619_v22 = vld [vmem:[%s2290_s3 + $0x30] sm:$0xff]   ;;  %v593_v26 = vld [vmem:[%s2291_s5] sm:$0xff] }
   0x9   :  { %v1620_v23 = vld [vmem:[%s2290_s3 + $0x38] sm:$0xff]   ;;  %v595_v25 = vld [vmem:[%s2291_s5 + $0x10] sm:$0xff]  ;;  %694 = vperm.xlu0 %1595, %v593_v26   ;;  %v594_v28 = vld [vmem:[%s2291_s5 + $0x8] sm:$0xff] }
   0xa   :  { %1565 = vmatpush3.bf16.msra.mxu1 %v1614_v8  ;;  %700 = vperm.xlu1 %1596, %v595_v25   ;;  %v596_v27 = vld [vmem:[%s2291_s5 + $0x18] sm:$0xff]  ;;  %v599_v29 = vld [vmem:[%s2291_s5 + $0x30] sm:$0xff]  ;;  %v597_v30 = vld [vmem:[%s2291_s5 + $0x20] sm:$0xff] }
   0xb   :  { %1535 = vmatpush3.bf16.msra.mxu0 %v1599_v2  ;;  %1566 = vmatprep.subr.bf16.mxu1 %v1615_v10  ;;  %v600_v31 = vld [vmem:[%s2291_s5 + $0x38] sm:$0xff]  ;;  %v598_v32 = vld [vmem:[%s2291_s5 + $0x28] sm:$0xff]  ;;  %v601_v34 = vld [vmem:[%s2291_s5 + $0x40] sm:$0xff] }
   0xc   :  { %1536 = vmatprep.subr.bf16.mxu0 %v1600_v3  ;;  %v602_v33 = vld [vmem:[%s2291_s5 + $0x48] sm:$0xff]  ;;  %v604_v35 = vld [vmem:[%s2291_s5 + $0x58] sm:$0xff]  ;;  %v603_v36 = vld [vmem:[%s2291_s5 + $0x50] sm:$0xff] }
   0xd   :  { %697 = vperm.xlu0 %1595, %v594_v28   ;;  %v606_v37 = vld [vmem:[%s2291_s5 + $0x68] sm:$0xff]  ;;  %v605_v38 = vld [vmem:[%s2291_s5 + $0x60] sm:$0xff]  ;;  %v608_v39 = vld [vmem:[%s2291_s5 + $0x78] sm:$0xff] }
   0xe   :  { %1567 = vmatpush3.bf16.msra.mxu1 %v1615_v10  ;;  %703 = vperm.xlu1 %1596, %v596_v27   ;;  %v607_v40 = vld [vmem:[%s2291_s5 + $0x70] sm:$0xff]  ;;  %v1913_v41 = vld [vmem:[%s2292_s6] ss:$0 sm:$0xff] }
   0xf   :  { %1537 = vmatpush3.bf16.msra.mxu0 %v1600_v3  ;;  %1568 = vmatprep.subr.bf16.mxu1 %v1616_v12  ;;  %v31_v42 = vld [vmem:[%s2293_s1] sm:$0xff] }
  0x10   :  { %1538 = vmatprep.subr.bf16.mxu0 %v1601_v5 }
  0x11   :  { %706 = vperm.xlu0 %1595, %v597_v30  }
  0x12   :  { %1569 = vmatpush3.bf16.msra.mxu1 %v1616_v12  ;;  %712 = vperm.xlu1 %1596, %v599_v29  }
  0x13   :  { %1539 = vmatpush3.bf16.msra.mxu0 %v1601_v5  ;;  %1570 = vmatprep.subr.bf16.mxu1 %v1617_v13 }
  0x14   :  { %1540 = vmatprep.subr.bf16.mxu0 %v1602_v6 }
  0x15   :  { %709 = vperm.xlu0 %1595, %v598_v32  }
  0x16   :  { %1571 = vmatpush3.bf16.msra.mxu1 %v1617_v13  ;;  %715 = vperm.xlu1 %1596, %v600_v31  }
  0x17   :  { %1541 = vmatpush3.bf16.msra.mxu0 %v1602_v6  ;;  %1572 = vmatprep.subr.bf16.mxu1 %v1618_v16 }
  0x18   :  { %1542 = vmatprep.subr.bf16.mxu0 %v1603_v9 }
  0x19   :  { %718 = vperm.xlu0 %1595, %v601_v34  }
  0x1a   :  { %1573 = vmatpush3.bf16.msra.mxu1 %v1618_v16  ;;  %721 = vperm.xlu1 %1596, %v602_v33  }
  0x1b   :  { %1543 = vmatpush3.bf16.msra.mxu0 %v1603_v9  ;;  %1574 = vmatprep.subr.bf16.mxu1 %v1619_v22 }
  0x1c   :  { %1544 = vmatprep.subr.bf16.mxu0 %v1604_v11 }
  0x1d   :  { %724 = vperm.xlu0 %1595, %v603_v36   ;;  %v1928_v36 = vld [vmem:[%s2294_s4] ss:$0 sm:$0xff] }
  0x1e   :  { %1575 = vmatpush3.bf16.msra.mxu1 %v1619_v22  ;;  %727 = vperm.xlu1 %1596, %v604_v35   ;;  %v627_v35 = vlaneseq }
  0x1f   :  { %1545 = vmatpush3.bf16.msra.mxu0 %v1604_v11  ;;  %1576 = vmatprep.subr.bf16.mxu1 %v1620_v23 }
  0x21   :  { %730 = vperm.xlu0 %1595, %v605_v38  }
  0x22   :  { %1547 = vmatmul.mubr.bf16.vlgmr.msra.gmra.mrb[0].mxu0 %v1606_v14  ;;  %1577 = vmatpush3.bf16.msra.mxu1 %v1620_v23 }
  0x23   :  { %1550 = vmatprep.mubr.bf16.mxu0 %v1607_v15  ;;  %733 = vperm.xlu1 %1596, %v606_v37   ;;  %v1931_v37 = vand.u32 127, %v627_v35 }
  0x25   :  { %736 = vperm.xlu0 %1595, %v607_v40  }
  0x27   :  { %739 = vperm.xlu1 %1596, %v608_v39  }
  0x29   :  { %1203 = vbcast.lane.b32.xlu0 %v1913_v41, 264 }
  0x2a   :  { %1551 = vmatmul.mubr.bf16.gmra.mrb[4].mxu0 %v1608_v17 }
  0x2b   :  { %1554 = vmatprep.mubr.bf16.mxu0 %v1609_v18  ;;  %1199 = vbcast.lane.b32.xlu1 %v1913_v41, 256 }
  0x2d   :  { %1215 = vbcast.lane.b32.xlu0 %v1913_v41, 288 }
  0x2f   :  { %1207 = vbcast.lane.b32.xlu1 %v1913_v41, 272 }
  0x31   :  { %1223 = vbcast.lane.b32.xlu0 %v1913_v41, 304 }
  0x32   :  { %1555 = vmatmul.mubr.bf16.gmra.mrb[8].mxu0 %v1610_v19 }
  0x33   :  { %1558 = vmatprep.mubr.bf16.mxu0 %v1611_v20  ;;  %1211 = vbcast.lane.b32.xlu1 %v1913_v41, 280 }
  0x37   :  { %1219 = vbcast.lane.b32.xlu1 %v1913_v41, 296 }
  0x3a   :  { %1559 = vmatmul.mubr.bf16.gmra.mrb[12].mxu0 %v1612_v21 }
  0x89   :  { %v701_v38 = vpop.permute.xlu1 %700 }
  0x8a   :  { %vm743_vm0 = vcmp.eq.s32.totalorder %v1931_v37, %v701_v38 }
  0xf5   :  { %v1548_v43 = vpop.f32.mrb[0].mxu0 }
  0xf6   :  { %v203_v44 = vadd.f32 %v1548_v43, %v31_v42  ;;  %v194_v45 = vpop.f32.mrb[1].mxu0 }
  0xf7   :  { %v195_v46 = vadd.f32 %v194_v45, %v31_v42  ;;  %v1549_v47 = vpop.f32.mrb[2].mxu0  ;;  %v695_v45 = vpop.permute.xlu0 %694 }
  0xf8   :  { %v206_v48 = vadd.f32 %v1549_v47, %v31_v42  ;;  %v197_v49 = vpop.f32.mrb[3].mxu0  ;;  %v259_v51 = vmax.f32 %v203_v44, 0.0  ;;  %vm741_vm3 = vcmp.eq.s32.totalorder %v1931_v37, %v695_v45 }
  0xf9   :  { %v198_v50 = vadd.f32 %v197_v49, %v31_v42  ;;  %v257_v53 = vmax.f32 %v195_v46, 0.0 }
  0xfa   :  { %v260_v52 = vmax.f32 %v206_v48, 0.0  ;;  %v704_v48 = vpop.permute.xlu1 %703 }
  0xfb   :  { %v258_v54 = vmax.f32 %v198_v50, 0.0  ;;  %vm744_vm1 = vcmp.eq.s32.totalorder %v1931_v37, %v704_v48 }
  0xfc   :  { %v274_v55 = vpack.c.bf16 %v260_v52, %v259_v51  ;;  %v698_v52 = vpop.permute.xlu0 %697 }
  0xfd   :  { %v1552_v56 = vpop.f32.mrb[4].mxu0  ;;  %v273_v57 = vpack.c.bf16 %v258_v54, %v257_v53  ;;  %vm742_vm2 = vcmp.eq.s32.totalorder %v1931_v37, %v698_v52 }
  0xfe   :  { %v219_v58 = vadd.f32 %v1552_v56, %v31_v42  ;;  %v210_v59 = vpop.f32.mrb[5].mxu0 }
  0xff   :  { %v211_v60 = vadd.f32 %v210_v59, %v31_v42  ;;  %v1553_v61 = vpop.f32.mrb[6].mxu0  ;;  %1578 = vmatprep.mubr.bf16.mxu1 %v273_v57 }
 0x100   :  { %v263_v62 = vmax.f32 %v219_v58, 0.0  ;;  %v222_v63 = vadd.f32 %v1553_v61, %v31_v42  ;;  %v213_v0 = vpop.f32.mrb[7].mxu0  ;;  %1579 = vmatmul.mubr.bf16.vlgmr.msra.gmra.mrb[0].mxu1 %v274_v55  ;;  %v707_v58 = vpop.permute.xlu0 %706 }
 0x101   :  { %v261_v1 = vmax.f32 %v211_v60, 0.0  ;;  %v214_v2 = vadd.f32 %v213_v0, %v31_v42  ;;  %vm745_vm5 = vcmp.eq.s32.totalorder %v1931_v37, %v707_v58 }
 0x102   :  { %v264_v3 = vmax.f32 %v222_v63, 0.0 }
 0x103   :  { %v262_v4 = vmax.f32 %v214_v2, 0.0 }
 0x104   :  { %v276_v5 = vpack.c.bf16 %v264_v3, %v263_v62  ;;  %v713_v62 = vpop.permute.xlu1 %712  ;;  %v710_v3 = vpop.permute.xlu0 %709 }
 0x105   :  { %v275_v6 = vpack.c.bf16 %v262_v4, %v261_v1  ;;  %v1556_v7 = vpop.f32.mrb[8].mxu0  ;;  %vm747_vm4 = vcmp.eq.s32.totalorder %v1931_v37, %v713_v62  ;;  %vm746_vm7 = vcmp.eq.s32.totalorder %v1931_v37, %v710_v3 }
 0x106   :  { %v235_v8 = vadd.f32 %v1556_v7, %v31_v42  ;;  %v226_v9 = vpop.f32.mrb[9].mxu0 }
 0x107   :  { %v227_v10 = vadd.f32 %v226_v9, %v31_v42  ;;  %v1557_v11 = vpop.f32.mrb[10].mxu0  ;;  %1582 = vmatprep.mubr.bf16.mxu1 %v275_v6 }
 0x108   :  { %v267_v12 = vmax.f32 %v235_v8, 0.0  ;;  %v238_v13 = vadd.f32 %v1557_v11, %v31_v42  ;;  %v229_v14 = vpop.f32.mrb[11].mxu0  ;;  %1583 = vmatmul.mubr.bf16.gmra.mrb[4].mxu1 %v276_v5  ;;  %v716_v6 = vpop.permute.xlu1 %715 }
 0x109   :  { %v265_v15 = vmax.f32 %v227_v10, 0.0  ;;  %v230_v16 = vadd.f32 %v229_v14, %v31_v42  ;;  %vm748_vm6 = vcmp.eq.s32.totalorder %v1931_v37, %v716_v6 }
 0x10a   :  { %v268_v17 = vmax.f32 %v238_v13, 0.0 }
 0x10b   :  { %v266_v18 = vmax.f32 %v230_v16, 0.0 }
 0x10c   :  { %v278_v19 = vpack.c.bf16 %v268_v17, %v267_v12  ;;  %v719_v12 = vpop.permute.xlu0 %718 }
 0x10d   :  { %v277_v20 = vpack.c.bf16 %v266_v18, %v265_v15  ;;  %v1560_v21 = vpop.f32.mrb[12].mxu0  ;;  %v722_v18 = vpop.permute.xlu1 %721  ;;  %vm749_vm10 = vcmp.eq.s32.totalorder %v1931_v37, %v719_v12 }
 0x10e   :  { %v251_v22 = vadd.f32 %v1560_v21, %v31_v42  ;;  %v242_v23 = vpop.f32.mrb[13].mxu0  ;;  %vm750_vm11 = vcmp.eq.s32.totalorder %v1931_v37, %v722_v18 }
 0x10f   :  { %v243_v24 = vadd.f32 %v242_v23, %v31_v42  ;;  %v1561_v25 = vpop.f32.mrb[14].mxu0  ;;  %1586 = vmatprep.mubr.bf16.mxu1 %v277_v20 }
 0x110   :  { %v271_v26 = vmax.f32 %v251_v22, 0.0  ;;  %v254_v27 = vadd.f32 %v1561_v25, %v31_v42  ;;  %v245_v28 = vpop.f32.mrb[15].mxu0  ;;  %1587 = vmatmul.mubr.bf16.gmra.mrb[8].mxu1 %v278_v19  ;;  %v725_v17 = vpop.permute.xlu0 %724 }
 0x111   :  { %v269_v29 = vmax.f32 %v243_v24, 0.0  ;;  %v246_v30 = vadd.f32 %v245_v28, %v31_v42  ;;  %vm751_vm8 = vcmp.eq.s32.totalorder %v1931_v37, %v725_v17  ;;  %v728_v22 = vpop.permute.xlu1 %727 }
 0x112   :  { %v272_v31 = vmax.f32 %v254_v27, 0.0  ;;  %vm752_vm9 = vcmp.eq.s32.totalorder %v1931_v37, %v728_v22 }
 0x113   :  { %v270_v32 = vmax.f32 %v246_v30, 0.0 }
 0x114   :  { %v280_v33 = vpack.c.bf16 %v272_v31, %v271_v26  ;;  %v731_v23 = vpop.permute.xlu0 %730 }
 0x115   :  { %v279_v34 = vpack.c.bf16 %v270_v32, %v269_v29  ;;  %vm753_vm13 = vcmp.eq.s32.totalorder %v1931_v37, %v731_v23  ;;  %v734_v38 = vpop.permute.xlu1 %733 }
 0x116   :  { %vm754_vm15 = vcmp.eq.s32.totalorder %v1931_v37, %v734_v38 }
 0x117   :  { %1590 = vmatprep.mubr.bf16.mxu1 %v279_v34 }
 0x118   :  { %1591 = vmatmul.mubr.bf16.gmra.mrb[12].mxu1 %v280_v33  ;;  %v737_v28 = vpop.permute.xlu0 %736 }
 0x119   :  { %vm755_vm12 = vcmp.eq.s32.totalorder %v1931_v37, %v737_v28 }
 0x11c   :  { %v2036_v45 = vpop.permute.xlu0 %1203 }
 0x1d3   :  { %v1580_v39 = vpop.f32.mrb[0].mxu1 }
 0x1d4   :  { %v1934_v40 = vadd.f32 %v1580_v39, %v1928_v36  ;;  %v450_v42 = vpop.f32.mrb[1].mxu1  ;;  %v740_v39 = vpop.permute.xlu1 %739 }
 0x1d5   :  { %v1937_v43 = vadd.f32 %v1928_v36, %v450_v42  ;;  %v1581_v44 = vpop.f32.mrb[2].mxu1  ;;  %vm756_vm14 = vcmp.eq.s32.totalorder %v1931_v37, %v740_v39 }
 0x1d6   :  { %940 = vmax.xlane.f32.xlu0 %v1934_v40  ;;  %v453_v46 = vpop.f32.mrb[3].mxu1  ;;  %v1946_v49 = vadd.f32 %v1581_v44, %v1928_v36  ;;  %v759_v50 = vsel %vm743_vm0, %v1934_v40, 0.0  ;;  %v547_v48 = vsub.f32 -inf, %v1934_v40  ;;  %vm1366_vm0 = vcmask 130112  }
 0x1d7   :  { %v1942_v47 = vadd.f32 %v1928_v36, %v453_v46  ;;  %936 = vmax.xlane.f32.xlu1 %v1937_v43  ;;  %v757_v60 = vsel %vm741_vm3, %v1937_v43, 0.0  ;;  %vm1387_vm3 = vcmask 326912  }
 0x1d8   :  { %v760_v55 = vsel %vm744_vm1, %v1946_v49, 0.0  ;;  %v2034_v44 = vpop.permute.xlu1 %1199  ;;  %v632_v12 = vsub.f32 %v1946_v49, %v1946_v49  ;;  %vm1373_vm1 = vcmask 195712  }
 0x1d9   :  { %v758_v57 = vsel %vm742_vm2, %v1942_v47, 0.0  ;;  %v546_v52 = vsub.f32 -inf, %v1942_v47  ;;  %vm1380_vm2 = vcmask 261312  }
 0x1da   :  { %938 = vmax.xlane.f32.xlu0 %v1942_v47 }
 0x1db   :  { %v1584_v51 = vpop.f32.mrb[4].mxu1  ;;  %1100 = vadd.xlane.f32.xlu1 %v759_v50  ;;  %v2041_v50 = vpop.permute.xlu0 %1215 }
 0x1dc   :  { %v466_v53 = vpop.f32.mrb[5].mxu1  ;;  %v1957_v59 = vadd.f32 %v1584_v51, %v1928_v36  ;;  %v2038_v46 = vpop.permute.xlu1 %1207 }
 0x1dd   :  { %v1585_v54 = vpop.f32.mrb[6].mxu1  ;;  %v1964_v4 = vadd.f32 %v1928_v36, %v466_v53  ;;  %v565_v53 = vmul.f32 1.442695, %v547_v48 }
 0x1de   :  { %v469_v56 = vpop.f32.mrb[7].mxu1  ;;  %1102 = vadd.xlane.f32.xlu0 %v760_v55  ;;  %v763_v2 = vsel %vm747_vm4, %v1957_v59, 0.0  ;;  %v1967_v5 = vadd.f32 %v1585_v54, %v1928_v36  ;;  %v545_v54 = vsub.f32 -inf, %v1937_v43  ;;  %v631_v55 = vsub.f32 %v1934_v40, %v1934_v40 }
 0x1df   :  { %942 = vmax.xlane.f32.xlu1 %v1946_v49  ;;  %v1974_v9 = vadd.f32 %v1928_v36, %v469_v56  ;;  %v761_v14 = vsel %vm745_vm5, %v1964_v4, 0.0  ;;  %v629_v56 = vsub.f32 %v1937_v43, %v1937_v43  ;;  %v2053_v58 = vpop.permute.xlu0 %1223  ;;  %1621 = vpow2.f32 %v565_v53 }
 0x1e0   :  { %v764_v11 = vsel %vm748_vm6, %v1967_v5, 0.0  ;;  %v2043_v51 = vpop.permute.xlu1 %1211  ;;  %v561_v62 = vmul.f32 1.442695, %v545_v54  ;;  %v551_v17 = vsub.f32 -inf, %v1957_v59  ;;  %v635_v22 = vsub.f32 %v1957_v59, %v1957_v59 }
 0x1e1   :  { %v762_v15 = vsel %vm746_vm7, %v1974_v9, 0.0  ;;  %v636_v54 = vsub.f32 %v1967_v5, %v1967_v5  ;;  %vm1394_vm4 = vcmask 392512   ;;  %vm1401_vm5 = vcmask 458112  }
 0x1e2   :  { %1098 = vadd.xlane.f32.xlu0 %v758_v57  ;;  %v630_v57 = vsub.f32 %v1942_v47, %v1942_v47  ;;  %vm1408_vm6 = vcmask 523712   ;;  %vm1415_vm7 = vcmask 589312  }
 0x1e3   :  { %v1588_v61 = vpop.f32.mrb[8].mxu1  ;;  %1096 = vadd.xlane.f32.xlu1 %v757_v60  ;;  %v563_v60 = vmul.f32 1.442695, %v546_v52 }
 0x1e4   :  { %v482_v63 = vpop.f32.mrb[9].mxu1  ;;  %v1981_v16 = vadd.f32 %v1588_v61, %v1928_v36  ;;  %v2055_v61 = vpop.permute.xlu1 %1219 }
 0x1e5   :  { %v1589_v0 = vpop.f32.mrb[10].mxu1  ;;  %v1988_v20 = vadd.f32 %v1928_v36, %v482_v63  ;;  %v649_v63 = vmul.f32 1.442695, %v631_v55  ;;  %1623 = vpow2.f32 %v563_v60 }
 0x1e6   :  { %v485_v1 = vpop.f32.mrb[11].mxu1  ;;  %948 = vmax.xlane.f32.xlu0 %v1957_v59  ;;  %v767_v19 = vsel %vm751_vm8, %v1981_v16, 0.0  ;;  %v1991_v21 = vadd.f32 %v1589_v0, %v1928_v36  ;;  %v548_v0 = vsub.f32 -inf, %v1946_v49  ;;  %1625 = vpow2.f32 %v561_v62 }
 0x1e7   :  { %1108 = vadd.xlane.f32.xlu1 %v763_v2  ;;  %v1998_v24 = vadd.f32 %v1928_v36, %v485_v1  ;;  %v765_v26 = vsel %vm749_vm10, %v1988_v20, 0.0  ;;  %v645_v1 = vmul.f32 1.442695, %v629_v56  ;;  %v647_v2 = vmul.f32 1.442695, %v630_v57 }
 0x1e8   :  { %v768_v25 = vsel %vm752_vm9, %v1991_v21, 0.0  ;;  %1627 = vpow2.f32 %v649_v63  ;;  %vm1422_vm8 = vcmask 654912   ;;  %vm1429_vm9 = vcmask 720512  }
 0x1e9   :  { %v766_v27 = vsel %vm750_vm11, %v1998_v24, 0.0  ;;  %1629 = vpow2.f32 %v645_v1  ;;  %vm1436_vm10 = vcmask 786112   ;;  %vm1443_vm11 = vcmask 851712  }
 0x1ea   :  { %944 = vmax.xlane.f32.xlu0 %v1964_v4  ;;  %1631 = vpow2.f32 %v647_v2 }
 0x1eb   :  { %v1592_v7 = vpop.f32.mrb[12].mxu1  ;;  %950 = vmax.xlane.f32.xlu1 %v1967_v5 }
 0x1ec   :  { %v498_v8 = vpop.f32.mrb[13].mxu1  ;;  %v2005_v29 = vadd.f32 %v1592_v7, %v1928_v36 }
 0x1ed   :  { %v1593_v10 = vpop.f32.mrb[14].mxu1  ;;  %v2012_v31 = vadd.f32 %v1928_v36, %v498_v8 }
 0x1ee   :  { %v501_v13 = vpop.f32.mrb[15].mxu1  ;;  %1110 = vadd.xlane.f32.xlu0 %v764_v11  ;;  %v771_v30 = vsel %vm755_vm12, %v2005_v29, 0.0  ;;  %v2015_v32 = vadd.f32 %v1593_v10, %v1928_v36  ;;  %v567_v10 = vmul.f32 1.442695, %v548_v0  ;;  %vm1450_vm12 = vcmask 917312  }
 0x1ef   :  { %1104 = vadd.xlane.f32.xlu1 %v761_v14  ;;  %v769_v33 = vsel %vm753_vm13, %v2012_v31, 0.0  ;;  %v2022_v34 = vadd.f32 %v1928_v36, %v501_v13  ;;  %vm1457_vm13 = vcmask 982912  }
 0x1f0   :  { %v772_v42 = vsel %vm756_vm14, %v2015_v32, 0.0  ;;  %vm1464_vm14 = vcmask 1048512  }
 0x1f1   :  { %v770_v36 = vsel %vm754_vm15, %v2022_v34, 0.0 }
 0x1f2   :  { %1106 = vadd.xlane.f32.xlu0 %v762_v15 }
 0x1f3   :  { %946 = vmax.xlane.f32.xlu1 %v1974_v9 }
 0x1f6   :  { %956 = vmax.xlane.f32.xlu0 %v1981_v16 }
 0x1f7   :  { %1116 = vadd.xlane.f32.xlu1 %v767_v19  ;;  %v651_v19 = vmul.f32 1.442695, %v632_v12 }
 0x1fa   :  { %952 = vmax.xlane.f32.xlu0 %v1988_v20 }
 0x1fb   :  { %958 = vmax.xlane.f32.xlu1 %v1991_v21 }
 0x1fe   :  { %1118 = vadd.xlane.f32.xlu0 %v768_v25 }
 0x1ff   :  { %1112 = vadd.xlane.f32.xlu1 %v765_v26  ;;  %v573_v26 = vmul.f32 1.442695, %v551_v17 }
 0x202   :  { %1114 = vadd.xlane.f32.xlu0 %v766_v27  ;;  %v552_v27 = vsub.f32 -inf, %v1967_v5 }
 0x203   :  { %954 = vmax.xlane.f32.xlu1 %v1998_v24 }
 0x206   :  { %964 = vmax.xlane.f32.xlu0 %v2005_v29 }
 0x207   :  { %1124 = vadd.xlane.f32.xlu1 %v771_v30 }
 0x20a   :  { %960 = vmax.xlane.f32.xlu0 %v2012_v31 }
 0x20b   :  { %966 = vmax.xlane.f32.xlu1 %v2015_v32 }
 0x20f   :  { %1120 = vadd.xlane.f32.xlu1 %v769_v33 }
 0x213   :  { %962 = vmax.xlane.f32.xlu1 %v2022_v34 }
 0x220   :  { %1231 = vbcast.lane.b32.xlu0 %v1913_v41, 320 }
 0x224   :  { %1239 = vbcast.lane.b32.xlu0 %v1913_v41, 336  ;;  %1227 = vbcast.lane.b32.xlu1 %v1913_v41, 312 }
 0x228   :  { %1235 = vbcast.lane.b32.xlu1 %v1913_v41, 328 }
 0x22c   :  { %1243 = vbcast.lane.b32.xlu1 %v1913_v41, 344 }
 0x243   :  { %1126 = vadd.xlane.f32.xlu0 %v772_v42  ;;  %v657_v42 = vmul.f32 1.442695, %v635_v22 }
 0x247   :  { %1122 = vadd.xlane.f32.xlu0 %v770_v36  ;;  %v633_v36 = vsub.f32 %v1964_v4, %v1964_v4 }
 0x249   :  { %v653_v2 = vmul.f32 1.442695, %v633_v36 }
 0x263   :  { %v2058_v3 = vpop.xlane.xlu0 %940 }
 0x264   :  { %v986_v6 = vsub.f32 %v1934_v40, %v2058_v3  ;;  %v2062_v7 = vpop.xlane.xlu1 %936 }
 0x265   :  { %v984_v8 = vsub.f32 %v1937_v43, %v2062_v7  ;;  %v1622_v43 = vpop.eup %1621 }
 0x266   :  { %v1004_v11 = vmul.f32 1.442695, %v986_v6  ;;  %v1624_v28 = vpop.eup %1623  ;;  %v807_v33 = vmul.f32 0.0, %v1622_v43 }
 0x267   :  { %v1000_v13 = vmul.f32 1.442695, %v984_v8  ;;  %v2068_v14 = vpop.xlane.xlu0 %938  ;;  %v1626_v38 = vpop.eup %1625  ;;  %v806_v62 = vmul.f32 0.0, %v1624_v28 }
 0x268   :  { %1633 = vpow2.f32 %v1004_v11  ;;  %v985_v40 = vsub.f32 %v1942_v47, %v2068_v14  ;;  %v2072_v15 = vpop.xlane.xlu1 %1100  ;;  %v549_v47 = vsub.f32 -inf, %v1964_v4  ;;  %v1628_v39 = vpop.eup %1627  ;;  %v805_v63 = vmul.f32 0.0, %v1626_v38 }
 0x269   :  { %1635 = vpow2.f32 %v567_v10  ;;  %v1630_v53 = vpop.eup %1629  ;;  %v823_v60 = vadd.f32 %v1628_v39, %v807_v33  ;;  %v550_v10 = vsub.f32 -inf, %v1974_v9  ;;  %v555_v38 = vsub.f32 -inf, %v1981_v16 }
 0x26a   :  { %1637 = vpow2.f32 %v1000_v13  ;;  %v1002_v18 = vmul.f32 1.442695, %v985_v40  ;;  %v569_v56 = vmul.f32 1.442695, %v549_v47  ;;  %v1632_v57 = vpop.eup %1631  ;;  %v659_v40 = vmul.f32 1.442695, %v636_v54 }
 0x26b   :  { %v2077_v23 = vpop.xlane.xlu0 %1102  ;;  %v822_v17 = vadd.f32 %v1632_v57, %v806_v62  ;;  %v821_v43 = vadd.f32 %v1630_v53, %v805_v63  ;;  %v581_v63 = vmul.f32 1.442695, %v555_v38 }
 0x26c   :  { %1639 = vpow2.f32 %v1002_v18  ;;  %v2079_v25 = vpop.xlane.xlu1 %942 }
 0x26d   :  { %v987_v30 = vsub.f32 %v1946_v49, %v2079_v25  ;;  %1641 = vpow2.f32 %v651_v19  ;;  %v575_v49 = vmul.f32 1.442695, %v552_v27  ;;  %v634_v19 = vsub.f32 %v1974_v9, %v1974_v9 }
 0x26e   :  { %1643 = vpow2.f32 %v573_v26 }
 0x26f   :  { %v1006_v48 = vmul.f32 1.442695, %v987_v30  ;;  %v2087_v52 = vpop.xlane.xlu0 %1098 }
 0x270   :  { %v2091_v55 = vpop.xlane.xlu1 %1096 }
 0x271   :  { %1645 = vpow2.f32 %v1006_v48  ;;  %v639_v48 = vsub.f32 %v1981_v16, %v1981_v16 }
 0x272   :  { %v1634_v0 = vpop.eup %1633  ;;  %1647 = vpow2.f32 %v657_v42 }
 0x273   :  { %v1636_v1 = vpop.eup %1635  ;;  %v2093_v6 = vpop.xlane.xlu0 %948  ;;  %v1034_v8 = vmul.f32 %v1634_v0, %v823_v60  ;;  %1649 = vpow2.f32 %v569_v56  ;;  %v553_v60 = vsub.f32 -inf, %v1988_v20  ;;  %v556_v0 = vsub.f32 -inf, %v1991_v21 }
 0x274   :  { %v1638_v11 = vpop.eup %1637  ;;  %v990_v12 = vsub.f32 %v1957_v59, %v2093_v6  ;;  %v2098_v13 = vpop.xlane.xlu1 %1108  ;;  %1651 = vpow2.f32 %v575_v49  ;;  %v808_v26 = vmul.f32 0.0, %v1636_v1  ;;  %v571_v59 = vmul.f32 1.442695, %v550_v10 }
 0x275   :  { %1052 = vadd.xlane.f32.xlu0 %v1034_v8  ;;  %1653 = vpow2.f32 %v653_v2  ;;  %v1032_v28 = vmul.f32 %v1638_v11, %v821_v43  ;;  %v655_v49 = vmul.f32 1.442695, %v634_v19  ;;  %v665_v10 = vmul.f32 1.442695, %v639_v48 }
 0x276   :  { %v1640_v18 = vpop.eup %1639  ;;  %v1012_v22 = vmul.f32 1.442695, %v990_v12  ;;  %v637_v11 = vsub.f32 %v1988_v20, %v1988_v20 }
 0x277   :  { %v2102_v47 = vpop.xlane.xlu0 %944  ;;  %v1033_v27 = vmul.f32 %v1640_v18, %v822_v17  ;;  %v1642_v39 = vpop.eup %1641  ;;  %v577_v17 = vmul.f32 1.442695, %v553_v60  ;;  %v583_v18 = vmul.f32 1.442695, %v556_v0 }
 0x278   :  { %1655 = vpow2.f32 %v1012_v22  ;;  %v988_v30 = vsub.f32 %v1964_v4, %v2102_v47  ;;  %v2106_v33 = vpop.xlane.xlu1 %950  ;;  %v1644_v36 = vpop.eup %1643  ;;  %v824_v54 = vadd.f32 %v1642_v39, %v808_v26  ;;  %v640_v22 = vsub.f32 %v1991_v21, %v1991_v21 }
 0x279   :  { %1657 = vpow2.f32 %v659_v40  ;;  %v991_v42 = vsub.f32 %v1967_v5, %v2106_v33  ;;  %1050 = vadd.xlane.f32.xlu1 %v1033_v27  ;;  %1048 = vadd.xlane.f32.xlu0 %v1032_v28  ;;  %v811_v2 = vmul.f32 0.0, %v1644_v36 }
 0x27a   :  { %v1008_v53 = vmul.f32 1.442695, %v988_v30  ;;  %1659 = vpow2.f32 %v571_v59  ;;  %v661_v30 = vmul.f32 1.442695, %v637_v11 }
 0x27b   :  { %v1646_v56 = vpop.eup %1645  ;;  %v1014_v4 = vmul.f32 1.442695, %v991_v42  ;;  %v2113_v57 = vpop.xlane.xlu0 %1110 }
 0x27c   :  { %1661 = vpow2.f32 %v1008_v53  ;;  %v2116_v62 = vpop.xlane.xlu1 %1104  ;;  %v1035_v5 = vmul.f32 %v1646_v56, %v824_v54  ;;  %v1648_v1 = vpop.eup %1647  ;;  %v554_v53 = vsub.f32 -inf, %v1998_v24 }
 0x27d   :  { %1663 = vpow2.f32 %v1014_v4  ;;  %v1650_v8 = vpop.eup %1649  ;;  %v827_v27 = vadd.f32 %v1648_v1, %v811_v2  ;;  %v638_v1 = vsub.f32 %v1998_v24, %v1998_v24 }
 0x27e   :  { %1054 = vadd.xlane.f32.xlu0 %v1035_v5  ;;  %v1652_v12 = vpop.eup %1651  ;;  %1665 = vpow2.f32 %v655_v49  ;;  %v809_v28 = vmul.f32 0.0, %v1650_v8  ;;  %v667_v49 = vmul.f32 1.442695, %v640_v22 }
 0x27f   :  { %v2121_v40 = vpop.xlane.xlu0 %1106  ;;  %1667 = vpow2.f32 %v581_v63  ;;  %v1654_v19 = vpop.eup %1653  ;;  %v812_v38 = vmul.f32 0.0, %v1652_v12 }
 0x280   :  { %v2123_v43 = vpop.xlane.xlu1 %946  ;;  %1669 = vpow2.f32 %v665_v10  ;;  %v825_v4 = vadd.f32 %v1654_v19, %v809_v28 }
 0x281   :  { %v989_v26 = vsub.f32 %v1974_v9, %v2123_v43  ;;  %1671 = vpow2.f32 %v577_v17  ;;  %v559_v17 = vsub.f32 -inf, %v2005_v29 }
 0x282   :  { %v1656_v59 = vpop.eup %1655  ;;  %1673 = vpow2.f32 %v583_v18 }
 0x283   :  { %v1658_v39 = vpop.eup %1657  ;;  %v1010_v42 = vmul.f32 1.442695, %v989_v26  ;;  %v2129_v36 = vpop.xlane.xlu0 %956  ;;  %v1038_v48 = vmul.f32 %v1656_v59, %v827_v27  ;;  %v643_v26 = vsub.f32 %v2005_v29, %v2005_v29  ;;  %v663_v59 = vmul.f32 1.442695, %v638_v1 }
 0x284   :  { %v994_v54 = vsub.f32 %v1981_v16, %v2129_v36  ;;  %v2134_v56 = vpop.xlane.xlu1 %1116  ;;  %v1660_v9 = vpop.eup %1659  ;;  %v828_v63 = vadd.f32 %v1658_v39, %v812_v38  ;;  %v579_v16 = vmul.f32 1.442695, %v554_v53  ;;  %v557_v38 = vsub.f32 -inf, %v2012_v31 }
 0x285   :  { %1675 = vpow2.f32 %v1010_v42  ;;  %1060 = vadd.xlane.f32.xlu1 %v1038_v48  ;;  %v810_v28 = vmul.f32 0.0, %v1660_v9  ;;  %v560_v48 = vsub.f32 -inf, %v2015_v32  ;;  %v641_v9 = vsub.f32 %v2012_v31, %v2012_v31 }
 0x286   :  { %v1662_v60 = vpop.eup %1661  ;;  %v1020_v5 = vmul.f32 1.442695, %v994_v54  ;;  %1677 = vpow2.f32 %v661_v30 }
 0x287   :  { %v1664_v0 = vpop.eup %1663  ;;  %v2138_v2 = vpop.xlane.xlu0 %952  ;;  %v1036_v8 = vmul.f32 %v1662_v60, %v825_v4  ;;  %v673_v4 = vmul.f32 1.442695, %v643_v26  ;;  %v669_v26 = vmul.f32 1.442695, %v641_v9 }
 0x288   :  { %1679 = vpow2.f32 %v1020_v5  ;;  %v992_v10 = vsub.f32 %v1988_v20, %v2138_v2  ;;  %v2142_v11 = vpop.xlane.xlu1 %958  ;;  %v1039_v12 = vmul.f32 %v1664_v0, %v828_v63  ;;  %v1666_v18 = vpop.eup %1665  ;;  %v585_v0 = vmul.f32 1.442695, %v557_v38 }
 0x289   :  { %1681 = vpow2.f32 %v667_v49  ;;  %v995_v19 = vsub.f32 %v1991_v21, %v2142_v11  ;;  %1056 = vadd.xlane.f32.xlu1 %v1036_v8  ;;  %v1668_v22 = vpop.eup %1667  ;;  %v589_v21 = vmul.f32 1.442695, %v559_v17  ;;  %v826_v60 = vadd.f32 %v1666_v18, %v810_v28 }
 0x28a   :  { %v1016_v27 = vmul.f32 1.442695, %v992_v10  ;;  %1062 = vadd.xlane.f32.xlu0 %v1039_v12  ;;  %1683 = vpow2.f32 %v579_v16  ;;  %v1670_v39 = vpop.eup %1669  ;;  %v815_v54 = vmul.f32 0.0, %v1668_v22  ;;  %v591_v16 = vmul.f32 1.442695, %v560_v48 }
 0x28b   :  { %v1022_v20 = vmul.f32 1.442695, %v995_v19  ;;  %v2149_v30 = vpop.xlane.xlu0 %1118  ;;  %v1672_v53 = vpop.eup %1671  ;;  %v644_v12 = vsub.f32 %v2015_v32, %v2015_v32 }
 0x28c   :  { %1685 = vpow2.f32 %v1016_v27  ;;  %v2152_v42 = vpop.xlane.xlu1 %1112  ;;  %v1674_v49 = vpop.eup %1673  ;;  %v831_v19 = vadd.f32 %v1670_v39, %v815_v54  ;;  %v813_v22 = vmul.f32 0.0, %v1672_v53 }
 0x28d   :  { %1687 = vpow2.f32 %v1022_v20  ;;  %v816_v27 = vmul.f32 0.0, %v1674_v49  ;;  %v675_v39 = vmul.f32 1.442695, %v644_v12 }
 0x28e   :  { %1689 = vpow2.f32 %v663_v59 }
 0x28f   :  { %v1676_v5 = vpop.eup %1675  ;;  %v2157_v63 = vpop.xlane.xlu0 %1114  ;;  %1691 = vpow2.f32 %v589_v21  ;;  %v558_v21 = vsub.f32 -inf, %v2022_v34 }
 0x290   :  { %v2159_v1 = vpop.xlane.xlu1 %954  ;;  %v1037_v8 = vmul.f32 %v1676_v5, %v826_v60  ;;  %v1678_v10 = vpop.eup %1677  ;;  %1693 = vpow2.f32 %v673_v4 }
 0x291   :  { %v993_v17 = vsub.f32 %v1998_v24, %v2159_v1  ;;  %1695 = vpow2.f32 %v585_v0  ;;  %v829_v53 = vadd.f32 %v1678_v10, %v813_v22  ;;  %v642_v10 = vsub.f32 %v2022_v34, %v2022_v34 }
 0x292   :  { %v1680_v18 = vpop.eup %1679  ;;  %1058 = vadd.xlane.f32.xlu0 %v1037_v8  ;;  %1697 = vpow2.f32 %v591_v16  ;;  %v587_v8 = vmul.f32 1.442695, %v558_v21 }
 0x293   :  { %v1682_v28 = vpop.eup %1681  ;;  %v1018_v59 = vmul.f32 1.442695, %v993_v17  ;;  %v2165_v20 = vpop.xlane.xlu0 %964  ;;  %v1042_v38 = vmul.f32 %v1680_v18, %v831_v19 }
 0x294   :  { %v998_v48 = vsub.f32 %v2005_v29, %v2165_v20  ;;  %v2170_v60 = vpop.xlane.xlu1 %1124  ;;  %v1684_v24 = vpop.eup %1683  ;;  %v832_v4 = vadd.f32 %v1682_v28, %v816_v27 }
 0x295   :  { %1699 = vpow2.f32 %v1018_v59  ;;  %1068 = vadd.xlane.f32.xlu1 %v1042_v38  ;;  %v671_v38 = vmul.f32 1.442695, %v642_v10 }
 0x296   :  { %v1686_v54 = vpop.eup %1685  ;;  %v1028_v49 = vmul.f32 1.442695, %v998_v48  ;;  %1701 = vpow2.f32 %v669_v26  ;;  %v814_v26 = vmul.f32 0.0, %v1684_v24 }
 0x297   :  { %v1688_v9 = vpop.eup %1687  ;;  %v2172_v5 = vpop.xlane.xlu0 %960  ;;  %v1040_v0 = vmul.f32 %v1686_v54, %v829_v53 }
 0x298   :  { %1703 = vpow2.f32 %v1028_v49  ;;  %v996_v29 = vsub.f32 %v2012_v31, %v2172_v5  ;;  %v2176_v17 = vpop.xlane.xlu1 %966  ;;  %v1043_v16 = vmul.f32 %v1688_v9, %v832_v4  ;;  %v1690_v12 = vpop.eup %1689 }
 0x299   :  { %1705 = vpow2.f32 %v675_v39  ;;  %v999_v19 = vsub.f32 %v2015_v32, %v2176_v17  ;;  %1064 = vadd.xlane.f32.xlu1 %v1040_v0  ;;  %v1692_v22 = vpop.eup %1691  ;;  %v830_v39 = vadd.f32 %v1690_v12, %v814_v26 }
 0x29a   :  { %v1024_v18 = vmul.f32 1.442695, %v996_v29  ;;  %1070 = vadd.xlane.f32.xlu0 %v1043_v16  ;;  %1707 = vpow2.f32 %v587_v8  ;;  %v1694_v28 = vpop.eup %1693  ;;  %v819_v21 = vmul.f32 0.0, %v1692_v22 }
 0x29b   :  { %v1030_v27 = vmul.f32 1.442695, %v999_v19  ;;  %v1696_v59 = vpop.eup %1695 }
 0x29c   :  { %1709 = vpow2.f32 %v1024_v18  ;;  %v2182_v31 = vpop.xlane.xlu1 %1120  ;;  %v1698_v48 = vpop.eup %1697  ;;  %v835_v4 = vadd.f32 %v1694_v28, %v819_v21  ;;  %v817_v9 = vmul.f32 0.0, %v1696_v59 }
 0x29d   :  { %1711 = vpow2.f32 %v1030_v27  ;;  %v820_v8 = vmul.f32 0.0, %v1698_v48  ;;  %v2192_v48 = vpop.permute.xlu0 %1231 }
 0x29e   :  { %1713 = vpow2.f32 %v671_v38 }
 0x29f   :  { %v1700_v53 = vpop.eup %1699 }
 0x2a0   :  { %v2184_v54 = vpop.xlane.xlu1 %962  ;;  %v1041_v32 = vmul.f32 %v1700_v53, %v830_v39  ;;  %v1702_v49 = vpop.eup %1701 }
 0x2a1   :  { %v997_v24 = vsub.f32 %v2022_v34, %v2184_v54  ;;  %v833_v12 = vadd.f32 %v1702_v49, %v817_v9  ;;  %v2194_v53 = vpop.permute.xlu0 %1239 }
 0x2a2   :  { %v1704_v0 = vpop.eup %1703  ;;  %1066 = vadd.xlane.f32.xlu0 %v1041_v32 }
 0x2a3   :  { %v1706_v29 = vpop.eup %1705  ;;  %v1026_v16 = vmul.f32 1.442695, %v997_v24  ;;  %v1046_v10 = vmul.f32 %v1704_v0, %v835_v4 }
 0x2a4   :  { %v1708_v19 = vpop.eup %1707  ;;  %v836_v18 = vadd.f32 %v1706_v29, %v820_v8  ;;  %v2196_v32 = vpop.permute.xlu1 %1227 }
 0x2a5   :  { %1715 = vpow2.f32 %v1026_v16  ;;  %1076 = vadd.xlane.f32.xlu1 %v1046_v10  ;;  %v818_v34 = vmul.f32 0.0, %v1708_v19 }
 0x2a6   :  { %v1710_v22 = vpop.eup %1709 }
 0x2a7   :  { %v1712_v26 = vpop.eup %1711  ;;  %v1044_v27 = vmul.f32 %v1710_v22, %v833_v12 }
 0x2a8   :  { %v1047_v38 = vmul.f32 %v1712_v26, %v836_v18  ;;  %v1714_v28 = vpop.eup %1713  ;;  %v2200_v24 = vpop.permute.xlu1 %1235 }
 0x2a9   :  { %1072 = vadd.xlane.f32.xlu1 %v1044_v27  ;;  %v834_v59 = vadd.f32 %v1714_v28, %v818_v34 }
 0x2aa   :  { %1078 = vadd.xlane.f32.xlu0 %v1047_v38 }
 0x2ac   :  { %v2204_v9 = vpop.permute.xlu1 %1243 }
 0x2af   :  { %v1716_v21 = vpop.eup %1715 }
 0x2b0   :  { %v1045_v39 = vmul.f32 %v1716_v21, %v834_v59 }
 0x2b2   :  { %1074 = vadd.xlane.f32.xlu0 %v1045_v39 }
 0x2ba   :  { %1251 = vbcast.lane.b32.xlu1 %v1913_v41, 360 }
 0x2be   :  { %1259 = vbcast.lane.b32.xlu1 %v1913_v41, 376 }
 0x2c8   :  { %1247 = vbcast.lane.b32.xlu0 %v1913_v41, 352 }
 0x2cc   :  { %1255 = vbcast.lane.b32.xlu0 %v1913_v41, 368 }
 0x2d0   :  { %v2198_v49 = vpop.xlane.xlu0 %1126 }
 0x2d4   :  { %v2202_v4 = vpop.xlane.xlu0 %1122 }
 0x302   :  { %v1053_v0 = vpop.xlane.xlu0 %1052 }
 0x303   :  { %1717 = vlog2.f32 %v1053_v0 }
 0x306   :  { %v1051_v8 = vpop.xlane.xlu1 %1050  ;;  %v1049_v29 = vpop.xlane.xlu0 %1048 }
 0x307   :  { %1719 = vlog2.f32 %v1051_v8 }
 0x308   :  { %1721 = vlog2.f32 %v1049_v29 }
 0x30b   :  { %v1055_v41 = vpop.xlane.xlu0 %1054 }
 0x30c   :  { %1723 = vlog2.f32 %v1055_v41 }
 0x30d   :  { %v1718_v16 = vpop.eup %1717 }
 0x30e   :  { %v1133_v10 = vmul.f32 0.6931472, %v1718_v16 }
 0x310   :  { %v1162_v19 = vadd.f32 %v1133_v10, %v2058_v3 }
 0x311   :  { %v1720_v12 = vpop.eup %1719 }
 0x312   :  { %v1722_v22 = vpop.eup %1721  ;;  %v1061_v18 = vpop.xlane.xlu1 %1060  ;;  %v1178_v26 = vsub.f32 %v1162_v19, %v2072_v15  ;;  %v1131_v34 = vmul.f32 0.6931472, %v1720_v12 }
 0x313   :  { %v1129_v27 = vmul.f32 0.6931472, %v1722_v22  ;;  %1725 = vlog2.f32 %v1061_v18 }
 0x314   :  { %v1279_v38 = vmul.f32 %v2038_v46, %v1178_v26  ;;  %v1161_v8 = vadd.f32 %v1131_v34, %v2068_v14 }
 0x315   :  { %v1160_v28 = vadd.f32 %v1129_v27, %v2062_v7 }
 0x316   :  { %v1724_v59 = vpop.eup %1723  ;;  %v1057_v21 = vpop.xlane.xlu1 %1056  ;;  %1316 = vperm.xlu0 %1595, %v1279_v38   ;;  %v1177_v16 = vsub.f32 %v1161_v8, %v2087_v52 }
 0x317   :  { %v1135_v39 = vmul.f32 0.6931472, %v1724_v59  ;;  %1727 = vlog2.f32 %v1057_v21  ;;  %v1063_v0 = vpop.xlane.xlu0 %1062  ;;  %v1176_v3 = vsub.f32 %v1160_v28, %v2091_v55 }
 0x318   :  { %1729 = vlog2.f32 %v1063_v0  ;;  %v1278_v14 = vmul.f32 %v2036_v45, %v1177_v16 }
 0x319   :  { %v1163_v15 = vadd.f32 %v1135_v39, %v2079_v25  ;;  %v1277_v29 = vmul.f32 %v2034_v44, %v1176_v3 }
 0x31b   :  { %1310 = vperm.xlu0 %1595, %v1277_v29   ;;  %v1179_v46 = vsub.f32 %v1163_v15, %v2077_v23 }
 0x31d   :  { %v1726_v41 = vpop.eup %1725  ;;  %v1280_v7 = vmul.f32 %v2043_v51, %v1179_v46 }
 0x31e   :  { %v1141_v10 = vmul.f32 0.6931472, %v1726_v41 }
 0x31f   :  { %1319 = vperm.xlu1 %1596, %v1280_v7   ;;  %v1059_v19 = vpop.xlane.xlu0 %1058 }
 0x320   :  { %v1166_v55 = vadd.f32 %v1141_v10, %v2093_v6  ;;  %1731 = vlog2.f32 %v1059_v19 }
 0x321   :  { %v1728_v12 = vpop.eup %1727 }
 0x322   :  { %v1730_v25 = vpop.eup %1729  ;;  %v1137_v22 = vmul.f32 0.6931472, %v1728_v12  ;;  %v1069_v44 = vpop.xlane.xlu1 %1068  ;;  %v1182_v18 = vsub.f32 %v1166_v55, %v2098_v13 }
 0x323   :  { %v1143_v23 = vmul.f32 0.6931472, %v1730_v25  ;;  %1733 = vlog2.f32 %v1069_v44  ;;  %1313 = vperm.xlu1 %1596, %v1278_v14  }
 0x324   :  { %v1164_v51 = vadd.f32 %v1137_v22, %v2102_v47  ;;  %v1283_v52 = vmul.f32 %v2053_v58, %v1182_v18 }
 0x325   :  { %v1167_v26 = vadd.f32 %v1143_v23, %v2106_v33 }
 0x326   :  { %v1065_v27 = vpop.xlane.xlu1 %1064  ;;  %1328 = vperm.xlu0 %1595, %v1283_v52   ;;  %v1180_v6 = vsub.f32 %v1164_v51, %v2116_v62 }
 0x327   :  { %1735 = vlog2.f32 %v1065_v27  ;;  %v1071_v45 = vpop.xlane.xlu0 %1070  ;;  %v1183_v38 = vsub.f32 %v1167_v26, %v2113_v57 }
 0x328   :  { %1737 = vlog2.f32 %v1071_v45  ;;  %v1281_v13 = vmul.f32 %v2041_v50, %v1180_v6 }
 0x329   :  { %v1284_v34 = vmul.f32 %v2196_v32, %v1183_v38 }
 0x32a   :  { %v1732_v28 = vpop.eup %1731  ;;  %1322 = vperm.xlu0 %1595, %v1281_v13  }
 0x32b   :  { %v1139_v47 = vmul.f32 0.6931472, %v1732_v28  ;;  %1331 = vperm.xlu1 %1596, %v1284_v34   ;;  %v1361_v34 = vadd.s32 4294967288, %v1931_v37  ;;  %v2252_v28 = vshrl.u32 %v627_v35, 7 }
 0x32d   :  { %v1734_v58 = vpop.eup %1733  ;;  %v1165_v33 = vadd.f32 %v1139_v47, %v2123_v43 }
 0x32e   :  { %v1149_v59 = vmul.f32 0.6931472, %v1734_v58  ;;  %v1382_v58 = vadd.s32 4294967264, %v1931_v37 }
 0x32f   :  { %v1067_v21 = vpop.xlane.xlu0 %1066  ;;  %v1181_v62 = vsub.f32 %v1165_v33, %v2121_v40  ;;  %v1375_v33 = vadd.s32 4294967272, %v1931_v37 }
 0x330   :  { %v1170_v39 = vadd.f32 %v1149_v59, %v2129_v36  ;;  %1739 = vlog2.f32 %v1067_v21  ;;  %v1389_v21 = vadd.s32 4294967256, %v1931_v37 }
 0x331   :  { %v1736_v57 = vpop.eup %1735  ;;  %v1282_v0 = vmul.f32 %v2055_v61, %v1181_v62 }
 0x332   :  { %v1738_v50 = vpop.eup %1737  ;;  %v1145_v3 = vmul.f32 0.6931472, %v1736_v57  ;;  %v1077_v32 = vpop.xlane.xlu1 %1076  ;;  %v1186_v8 = vsub.f32 %v1170_v39, %v2134_v56 }
 0x333   :  { %v1151_v15 = vmul.f32 0.6931472, %v1738_v50  ;;  %1325 = vperm.xlu1 %1596, %v1282_v0   ;;  %1741 = vlog2.f32 %v1077_v32  ;;  %v1385_v0 = vsub.s32 %v1382_v58, %v2252_v28  ;;  %v1378_v50 = vsub.s32 %v1375_v33, %v2252_v28 }
 0x334   :  { %v1168_v29 = vadd.f32 %v1145_v3, %v2138_v2  ;;  %v1287_v43 = vmul.f32 %v2194_v53, %v1186_v8  ;;  %v1392_v32 = vsub.s32 %v1389_v21, %v2252_v28 }
 0x335   :  { %v1171_v46 = vadd.f32 %v1151_v15, %v2142_v11  ;;  %v1396_v15 = vadd.s32 4294967248, %v1931_v37 }
 0x336   :  { %v1073_v40 = vpop.xlane.xlu1 %1072  ;;  %1340 = vperm.xlu0 %1595, %v1287_v43   ;;  %v1184_v36 = vsub.f32 %v1168_v29, %v2152_v42 }
 0x337   :  { %1743 = vlog2.f32 %v1073_v40  ;;  %v1187_v61 = vsub.f32 %v1171_v46, %v2149_v30  ;;  %v1079_v7 = vpop.xlane.xlu0 %1078 }
 0x338   :  { %v1285_v41 = vmul.f32 %v2192_v48, %v1184_v36  ;;  %1745 = vlog2.f32 %v1079_v7  ;;  %v1410_v36 = vadd.s32 4294967232, %v1931_v37 }
 0x339   :  { %v1288_v56 = vmul.f32 %v2204_v9, %v1187_v61 }
 0x33a   :  { %v1740_v16 = vpop.eup %1739  ;;  %1334 = vperm.xlu0 %1595, %v1285_v41   ;;  %v1403_v41 = vadd.s32 4294967240, %v1931_v37 }
 0x33b   :  { %v1147_v2 = vmul.f32 0.6931472, %v1740_v16  ;;  %1343 = vperm.xlu1 %1596, %v1288_v56   ;;  %v1417_v56 = vadd.s32 4294967224, %v1931_v37  ;;  %v1399_v16 = vsub.s32 %v1396_v15, %v2252_v28 }
 0x33d   :  { %v1169_v11 = vadd.f32 %v1147_v2, %v2159_v1  ;;  %v1742_v53 = vpop.eup %1741 }
 0x33e   :  { %v1157_v55 = vmul.f32 0.6931472, %v1742_v53 }
 0x33f   :  { %v1075_v10 = vpop.xlane.xlu0 %1074  ;;  %v1185_v19 = vsub.f32 %v1169_v11, %v2157_v63 }
 0x340   :  { %1747 = vlog2.f32 %v1075_v10  ;;  %v1174_v22 = vadd.f32 %v1157_v55, %v2165_v20  ;;  %v1413_v10 = vsub.s32 %v1410_v36, %v2252_v28  ;;  %v1420_v55 = vsub.s32 %v1417_v56, %v2252_v28 }
 0x341   :  { %v1744_v42 = vpop.eup %1743  ;;  %v1286_v30 = vmul.f32 %v2200_v24, %v1185_v19  ;;  %v1252_v24 = vpop.permute.xlu1 %1251  ;;  %v1406_v19 = vsub.s32 %v1403_v41, %v2252_v28 }
 0x342   :  { %v1153_v48 = vmul.f32 0.6931472, %v1744_v42  ;;  %v1746_v14 = vpop.eup %1745  ;;  %v1190_v63 = vsub.f32 %v1174_v22, %v2170_v60  ;;  %v1438_v22 = vadd.s32 4294967200, %v1931_v37 }
 0x343   :  { %1337 = vperm.xlu1 %1596, %v1286_v30   ;;  %v1248_v12 = vpop.permute.xlu0 %1247  ;;  %v1159_v44 = vmul.f32 0.6931472, %v1746_v14 }
 0x344   :  { %v1172_v9 = vadd.f32 %v1153_v48, %v2172_v5 }
 0x345   :  { %v1175_v27 = vadd.f32 %v1159_v44, %v2176_v17  ;;  %v1260_v6 = vpop.permute.xlu1 %1259  ;;  %v1364_v17 = vsub.s32 %v1361_v34, %v2252_v28  ;;  %v1431_v44 = vadd.s32 4294967208, %v1931_v37 }
 0x346   :  { %v1188_v25 = vsub.f32 %v1172_v9, %v2182_v31 }
 0x347   :  { %v1256_v18 = vpop.permute.xlu0 %1255  ;;  %v1191_v20 = vsub.f32 %v1175_v27, %v2198_v49  ;;  %v1359_v49 = vsub.s32 %v1931_v37, %v2252_v28 }
 0x348   :  { %v1289_v1 = vmul.f32 %v1248_v12, %v1188_v25  ;;  %v1291_v52 = vmul.f32 %v1256_v18, %v1190_v63  ;;  %v1424_v12 = vadd.s32 4294967216, %v1931_v37 }
 0x349   :  { %v1292_v45 = vmul.f32 %v1260_v6, %v1191_v20  ;;  %v1452_v20 = vadd.s32 4294967184, %v1931_v37 }
 0x34a   :  { %v1748_v23 = vpop.eup %1747  ;;  %1346 = vperm.xlu0 %1595, %v1289_v1  }
 0x34b   :  { %v1155_v51 = vmul.f32 0.6931472, %v1748_v23  ;;  %v1427_v23 = vsub.s32 %v1424_v12, %v2252_v28  ;;  %v1455_v34 = vsub.s32 %v1452_v20, %v2252_v28 }
 0x34d   :  { %v1173_v26 = vadd.f32 %v1155_v51, %v2184_v54  ;;  %v1445_v51 = vadd.s32 4294967192, %v1931_v37 }
 0x34e   :  { %1352 = vperm.xlu0 %1595, %v1291_v52   ;;  %v1441_v52 = vsub.s32 %v1438_v22, %v2252_v28 }
 0x34f   :  { %v1189_v5 = vsub.f32 %v1173_v26, %v2202_v4  ;;  %v1368_v4 = vadd.s32 4294967280, %v1931_v37  ;;  %v1434_v26 = vsub.s32 %v1431_v44, %v2252_v28  ;;  %v1448_v6 = vsub.s32 %v1445_v51, %v2252_v28 }
 0x351   :  { %v1290_v31 = vmul.f32 %v1252_v24, %v1189_v5  ;;  %v1371_v62 = vsub.s32 %v1368_v4, %v2252_v28 }
 0x353   :  { %1349 = vperm.xlu1 %1596, %v1290_v31  }
 0x357   :  { %1355 = vperm.xlu1 %1596, %v1292_v45   ;;  %v1459_v45 = vadd.s32 4294967176, %v1931_v37 }
 0x395   :  { %v1317_v38 = vpop.permute.xlu0 %1316 }
 0x396   :  { %v1372_v8 = vrot.slane %v1317_v38, %v1371_v62 }
 0x39a   :  { %v1311_v13 = vpop.permute.xlu0 %1310 }
 0x39b   :  { %v1360_v39 = vrot.slane %v1311_v13, %v1359_v49  ;;  %v1462_v49 = vsub.s32 %v1459_v45, %v2252_v28 }
 0x39e   :  { %v1320_v60 = vpop.permute.xlu1 %1319 }
 0x39f   :  { %v1379_v61 = vrot.slane %v1320_v60, %v1378_v50 }
 0x3a2   :  { %v1314_v47 = vpop.permute.xlu1 %1313 }
 0x3a3   :  { %v1365_v59 = vrot.slane %v1314_v47, %v1364_v17 }
 0x3a5   :  { %v1329_v54 = vpop.permute.xlu0 %1328  ;;  %v1367_v3 = vsel %vm1366_vm0, %v1365_v59, %v1360_v39 }
 0x3a6   :  { %v1374_v46 = vsel %vm1373_vm1, %v1372_v8, %v1367_v3  ;;  %v1400_v48 = vrot.slane %v1329_v54, %v1399_v16 }
 0x3a7   :  { %v1381_v11 = vsel %vm1380_vm2, %v1379_v61, %v1374_v46 }
 0x3a9   :  { %v1323_v57 = vpop.permute.xlu0 %1322 }
 0x3aa   :  { %v1332_v35 = vpop.permute.xlu1 %1331  ;;  %v1386_v40 = vrot.slane %v1323_v57, %v1385_v0 }
 0x3ab   :  { %v1407_v1 = vrot.slane %v1332_v35, %v1406_v19 }
 0x3ac   :  { %v1388_v53 = vsel %vm1387_vm3, %v1386_v40, %v1381_v11 }
 0x3b2   :  { %v1326_v29 = vpop.permute.xlu1 %1325 }
 0x3b3   :  { %v1393_v7 = vrot.slane %v1326_v29, %v1392_v32 }
 0x3b5   :  { %v1341_v43 = vpop.permute.xlu0 %1340  ;;  %v1395_v42 = vsel %vm1394_vm4, %v1393_v7, %v1388_v53 }
 0x3b6   :  { %v1402_v14 = vsel %vm1401_vm5, %v1400_v48, %v1395_v42  ;;  %v1428_v31 = vrot.slane %v1341_v43, %v1427_v23 }
 0x3b7   :  { %v1409_v63 = vsel %vm1408_vm6, %v1407_v1, %v1402_v14 }
 0x3b9   :  { %v1335_v30 = vpop.permute.xlu0 %1334 }
 0x3ba   :  { %v1344_v2 = vpop.permute.xlu1 %1343  ;;  %v1414_v25 = vrot.slane %v1335_v30, %v1413_v10 }
 0x3bb   :  { %v1435_v13 = vrot.slane %v1344_v2, %v1434_v26 }
 0x3bc   :  { %v1416_v24 = vsel %vm1415_vm7, %v1414_v25, %v1409_v63 }
 0x3c2   :  { %v1338_v9 = vpop.permute.xlu1 %1337 }
 0x3c3   :  { %v1421_v18 = vrot.slane %v1338_v9, %v1420_v55 }
 0x3c5   :  { %v1423_v27 = vsel %vm1422_vm8, %v1421_v18, %v1416_v24 }
 0x3c6   :  { %v1430_v38 = vsel %vm1429_vm9, %v1428_v31, %v1423_v27 }
 0x3c7   :  { %v1437_v54 = vsel %vm1436_vm10, %v1435_v13, %v1430_v38 }
 0x3c9   :  { %v1347_v5 = vpop.permute.xlu0 %1346 }
 0x3ca   :  { %v1442_v60 = vrot.slane %v1347_v5, %v1441_v52 }
 0x3cc   :  { %v1444_v58 = vsel %vm1443_vm11, %v1442_v60, %v1437_v54 }
 0x3cd   :  { %v1353_v4 = vpop.permute.xlu0 %1352 }
 0x3ce   :  { %v1456_v59 = vrot.slane %v1353_v4, %v1455_v34 }
 0x3d2   :  { %v1350_v17 = vpop.permute.xlu1 %1349 }
 0x3d3   :  { %v1449_v47 = vrot.slane %v1350_v17, %v1448_v6 }
 0x3d5   :  { %v1451_v33 = vsel %vm1450_vm12, %v1449_v47, %v1444_v58 }
 0x3d6   :  { %v1356_v37 = vpop.permute.xlu1 %1355  ;;  %v1458_v62 = vsel %vm1457_vm13, %v1456_v59, %v1451_v33 }
 0x3d7   :  { %v1463_v21 = vrot.slane %v1356_v37, %v1462_v49 }
 0x3d9   :  { %v1465_v35 = vsel %vm1464_vm14, %v1463_v21, %v1458_v62 }
 0x3da   :  { %1467 = vst [vmem:[%s2295_s7] sm:$0x1] %v1465_v35 }

</bundles_post_ra>
